<compile_context>
chip_gen: v7x
topology: tpu7x:2x2x1
jax: 0.10.0
libtpu: 0.0.40
codegen_flags: <defaults>
</compile_context>

<pallas_src>
import functools

import jax
import jax.numpy as jnp
from jax.experimental import pallas as pl
from jax.experimental.pallas import tpu as pltpu

KX = 3        # kernel_size_x
KW = 3        # fixed kernel width in CausalConv2d
LEVELS = 2    # AutoRegressive default; the fused kernel is specialized to 2.


# ------------------------------ Pallas kernel -------------------------------

def _fused_kernel(temp_ref, perm_ref, w0_ref, b0_ref, w1_ref, b1_ref, o_ref,
                  zin_ref, z1_ref, *, H, W, C0, C1, kx):
    """Whole AutoRegressive.forward for one batch element.

    Path 0 = temperature encoder (causal, top zero padding).  Path 1 =
    permeability encoder: flip(Enc(flip(x)))[1:] == anti-causal Enc
    (kh-reversed weights, bottom zero padding) applied to x[1:], so both paths
    share the same tap offsets and live channel-concatenated in the same
    scratch buffers.

    temp_ref, perm_ref: (1, L, W)            single-channel inputs (L = H + 1)
    w0_ref:  (kx*3, 2*C0)                    level-0 taps, paths side by side
    b0_ref:  (1, 1, 2*C0)
    w1_ref:  (kx, 2*3*C0, 2*C1)              level-1 block-diag kw-im2col taps
    b1_ref:  (1, 2*C1)
    o_ref:   (1, H*W, 2*C1)                  prediction duplicated in both halves
    zin_ref: (H + (kx-1),   W + 2, 2*C0)     level-0 padded input (paths fused)
    z1_ref:  (H + 2*(kx-1), W,     2*3*C0)   level-1 kw-im2col input (paths fused)
    """
    d1 = 2                                   # level-1 dilation (= 2**1)
    pad0 = kx - 1                            # level-0 row padding (dilation 1)
    pad1 = (kx - 1) * d1                     # level-1 row padding
    HW = H * W
    C0x2, C0x3, C0x6, C1x2 = 2 * C0, 3 * C0, 6 * C0, 2 * C1

    # ---- stage A: lane-dense padded level-0 input.  Zero only the borders
    #      (scratch persists across grid steps, so pads are re-zeroed here). --
    zin_ref[:, 0:1, :] = jnp.zeros((H + pad0, 1, C0x2), jnp.float32)
    zin_ref[:, W + 1:W + 2, :] = jnp.zeros((H + pad0, 1, C0x2), jnp.float32)
    zin_ref[0:pad0, 1:1 + W, 0:C0] = jnp.zeros((pad0, W, C0), jnp.float32)
    zin_ref[H:H + pad0, 1:1 + W, C0:C0x2] = jnp.zeros((pad0, W, C0), jnp.float32)
    t = temp_ref[0, 0:H, :]                                        # (H, W)
    p = perm_ref[0, 1:1 + H, :]                                    # (H, W)
    zin_ref[pad0:pad0 + H, 1:1 + W, 0:C0] = jnp.broadcast_to(
        t[:, :, None], (H, W, C0))
    zin_ref[0:H, 1:1 + W, C0:C0x2] = jnp.broadcast_to(
        p[:, :, None], (H, W, C0))

    # ---- level 0 (Cin=1): 9 VPU broadcast-MACs, both paths fused on lanes. --
    w0_all = w0_ref[...]                                           # load once
    acc0 = jnp.zeros((H, W, C0x2), jnp.float32)
    for kh in range(kx):
        for kw in range(KW):
            tap = zin_ref[kh:kh + H, kw:kw + W, :]                 # (H, W, 2*C0)
            acc0 = acc0 + tap * w0_all[kh * KW + kw][None, None, :]
    out0 = jnp.maximum(acc0 + b0_ref[...], 0.0)                    # (H, W, 2*C0)

    # ---- stage B: kw-im2col of the level-1 input.  Channel layout is
    #      [path][kw][C0]; path-0 rows sit at offset pad1 (top padded, causal),
    #      path-1 rows at offset 0 (bottom padded, anti-causal). --------------
    z1_ref[0:pad1, :, 0:C0x3] = jnp.zeros((pad1, W, C0x3), jnp.float32)
    z1_ref[H:H + pad1, :, C0x3:C0x6] = jnp.zeros((pad1, W, C0x3), jnp.float32)
    for pth in range(2):
        r0 = pad1 if pth == 0 else 0
        cb = pth * C0x3
        src = out0[:, :, pth * C0:(pth + 1) * C0]                  # (H, W, C0)
        # kw = 0 block holds input column w-1
        z1_ref[r0:r0 + H, 0:1, cb:cb + C0] = jnp.zeros((H, 1, C0), jnp.float32)
        z1_ref[r0:r0 + H, 1:W, cb:cb + C0] = src[:, 0:W - 1, :]
        # kw = 1 block holds input column w
        z1_ref[r0:r0 + H, :, cb + C0:cb + 2 * C0] = src
        # kw = 2 block holds input column w+1
        z1_ref[r0:r0 + H, 0:W - 1, cb + 2 * C0:cb + C0x3] = src[:, 1:W, :]
        z1_ref[r0:r0 + H, W - 1:W, cb + 2 * C0:cb + C0x3] = jnp.zeros(
            (H, 1, C0), jnp.float32)

    # ---- level 1: 3 back-to-back MXU matmuls, K = 2*3*C0 = 192, N = 2*C1 = 128.
    #      The (H, W, 6*C0) -> (HW, 6*C0) reshape is a pure view (no width
    #      padding, slice only on the untiled outer dim), so no per-tap copies.
    acc1 = jnp.zeros((HW, C1x2), jnp.float32)
    for kh in range(kx):
        v = z1_ref[kh * d1:kh * d1 + H, :, :]                      # (H, W, 6*C0)
        acc1 = acc1 + jnp.dot(v.reshape(HW, C0x6), w1_ref[kh],
                              preferred_element_type=jnp.float32)
    h1 = jnp.maximum(acc1 + b1_ref[...], 0.0)                      # (HW, 2*C1)

    # ---- combine: prediction = (tanh(temp_enc + perm_enc) + 1) / 2.  The lane
    #      roll keeps the result 128 lanes wide (both halves hold the same
    #      prediction) so the final store is unmasked; wrapper takes [:, :C1].
    s = h1 + pltpu.roll(h1, C1, 1)
    o_ref[0] = (jnp.tanh(s) + 1.0) * 0.5


# ------------------------------ JAX wrappers ---------------------------------

def pack_params(params, kx=KX):
    """One-time repack of the 4 conv layers (torch (Cout,Cin,kh,kw) layout) into
    the fused kernel's layouts.  The perm-encoder weights are kh-reversed here
    so the kernel runs that branch anti-causally (no jnp.flip at runtime)."""
    def tapmat(w, reverse_kh):
        if reverse_kh:
            w = w[:, :, ::-1, :]
        cout, cin = w.shape[0], w.shape[1]
        # (Cout,Cin,kh,kw) -> (kh,kw,Cin,Cout) -> (kh*kw, Cin, Cout)
        return jnp.transpose(w, (2, 3, 1, 0)).reshape(kx * KW, cin, cout)

    # level 0: (kx*KW, 2*C0) — temp channels first, perm channels second.
    w0t = tapmat(params["temp0_w"], False)[:, 0, :]
    w0p = tapmat(params["perm0_w"], True)[:, 0, :]
    C0 = w0t.shape[-1]
    w0 = jnp.concatenate([w0t, w0p], axis=-1)                      # (9, 2*C0)
    b0 = jnp.concatenate([params["temp0_b"], params["perm0_b"]]
                         ).reshape(1, 1, 2 * C0)

    # level 1: block-diagonal kw-im2col weights (kx, 2*3*C0, 2*C1):
    # rows p*3*C0 + kw*C0 + c0, cols p*C1 + c1.
    w1t = tapmat(params["temp1_w"], False)                         # (9, C0, C1)
    w1p = tapmat(params["perm1_w"], True)
    C1 = w1t.shape[-1]
    w1t = w1t.reshape(kx, KW * C0, C1)
    w1p = w1p.reshape(kx, KW * C0, C1)
    zero = jnp.zeros((kx, KW * C0, C1), jnp.float32)
    w1 = jnp.concatenate([jnp.concatenate([w1t, zero], axis=-1),
                          jnp.concatenate([zero, w1p], axis=-1)], axis=1)
    b1 = jnp.concatenate([params["temp1_b"], params["perm1_b"]]).reshape(1, 2 * C1)

    return {"w0": w0.astype(jnp.float32), "b0": b0.astype(jnp.float32),
            "w1": w1.astype(jnp.float32), "b1": b1.astype(jnp.float32)}


def autoregressive_forward(packed, inputs, label, kx=KX):
    """inputs (permeability), label (temperature): NCHW (B, 1, L, W).
    Returns the prediction in NCHW (B, C1, L-1, W), matching the torch module."""
    assert inputs.shape[1] == 1, "Input (=Permeability) should have 1 channel"
    B, _, L, W = label.shape
    H = L - 1
    C0 = packed["b0"].shape[-1] // 2
    C1 = packed["b1"].shape[-1] // 2
    pad0, pad1 = (kx - 1), 2 * (kx - 1)

    # NCHW (B,1,L,W) -> (B,L,W): pure reshape (channel dim is 1), no copy.
    temp = label.reshape(B, L, W).astype(jnp.float32)
    perm = inputs.reshape(B, L, W).astype(jnp.float32)

    kern = functools.partial(_fused_kernel, H=H, W=W, C0=C0, C1=C1, kx=kx)
    out = pl.pallas_call(
        kern,
        out_shape=jax.ShapeDtypeStruct((B, H * W, 2 * C1), jnp.float32),
        grid=(B,),
        in_specs=[
            pl.BlockSpec((1, L, W), lambda b: (b, 0, 0)),
            pl.BlockSpec((1, L, W), lambda b: (b, 0, 0)),
            pl.BlockSpec((kx * KW, 2 * C0), lambda b: (0, 0)),
            pl.BlockSpec((1, 1, 2 * C0), lambda b: (0, 0, 0)),
            pl.BlockSpec((kx, 6 * C0, 2 * C1), lambda b: (0, 0, 0)),
            pl.BlockSpec((1, 2 * C1), lambda b: (0, 0)),
        ],
        out_specs=pl.BlockSpec((1, H * W, 2 * C1), lambda b: (b, 0, 0)),
        scratch_shapes=[
            pltpu.VMEM((H + pad0, W + 2, 2 * C0), jnp.float32),
            pltpu.VMEM((H + pad1, W, 6 * C0), jnp.float32),
        ],
        compiler_params=pltpu.CompilerParams(
            dimension_semantics=("parallel",)),
    )(temp, perm, packed["w0"], packed["b0"], packed["w1"], packed["b1"])

    # Both lane halves of `out` hold the prediction; take the first half and go
    # to NCHW (B, C1, H, W): cheap XLA slice + reshape + one small transpose.
    pred = out[:, :, :C1].reshape(B, H, W, C1)
    return jnp.transpose(pred, (0, 3, 1, 2))


def init_params(key, levels=LEVELS, kx=KX):
    """Deterministic synthetic parameters matching nn.Conv2d shapes."""
    def conv_init(k, cin, cout):
        kw_, kb_ = jax.random.split(k)
        bound = 1.0 / (cin * kx * 3) ** 0.5
        w = jax.random.uniform(kw_, (cout, cin, kx, 3), jnp.float32, -bound, bound)
        b = jax.random.uniform(kb_, (cout,), jnp.float32, -bound, bound)
        return w, b

    chans = [1] + [32 * 2 ** i for i in range(levels)]   # [1, 32, 64]
    keys = jax.random.split(key, 2 * levels)
    params, ki = {}, 0
    for name in ("temp", "perm"):
        for lvl in range(levels):
            w, b = conv_init(keys[ki], chans[lvl], chans[lvl + 1]); ki += 1
            params[f"{name}{lvl}_w"] = w
            params[f"{name}{lvl}_b"] = b
    # NOTE: the PyTorch module also builds a `decoder` CausalConv2d(128 -> 1),
    # but AutoRegressive.forward() never uses it, so it is omitted here.
    return params


# -------------------------- pure-JAX reference ------------------------------

def _ref_causal_conv(x, weight, bias, level, kx=KX):
    dilation = 2 ** level
    pad_h = (kx - 1) * dilation
    w_hwio = jnp.transpose(weight, (2, 3, 1, 0))
    out = jax.lax.conv_general_dilated(
        x, w_hwio, window_strides=(1, 1),
        padding=((pad_h, pad_h), (1, 1)), rhs_dilation=(dilation, 1),
        dimension_numbers=("NHWC", "HWIO", "NHWC"))
    out = jax.nn.relu(out + bias[None, None, None, :])
    return out[:, :-pad_h, :, :]


def ref_forward(params, inputs, label, levels=LEVELS):
    """Literal translation of the PyTorch forward (with the explicit flips)."""
    temp = jnp.transpose(label, (0, 2, 3, 1)).astype(jnp.float32)
    perm = jnp.transpose(inputs, (0, 2, 3, 1)).astype(jnp.float32)
    t = temp[:, :-1, :, :]
    for lvl in range(levels):
        t = _ref_causal_conv(t, params[f"temp{lvl}_w"], params[f"temp{lvl}_b"], lvl)
    p = jnp.flip(perm, axis=1)
    for lvl in range(levels):
        p = _ref_causal_conv(p, params[f"perm{lvl}_w"], params[f"perm{lvl}_b"], lvl)
    p = jnp.flip(p, axis=1)[:, 1:, :, :]
    pred = (jnp.tanh(t + p) + 1.0) / 2.0
    return jnp.transpose(pred, (0, 3, 1, 2))


if __name__ == "__main__":
    key = jax.random.PRNGKey(0)
    kp, kin, klab = jax.random.split(key, 3)
    params = init_params(kp)
    packed = pack_params(params)          # one-time weight repack

    B, L, W = 2, 16, 16
    inputs = jax.random.uniform(kin, (B, 1, L, W), jnp.float32)   # permeability
    label = jax.random.uniform(klab, (B, 1, L, W), jnp.float32)   # temperature

    fwd = jax.jit(autoregressive_forward)
    out = jax.block_until_ready(fwd(packed, inputs, label))

    assert out.shape == (B, 32 * 2 ** (LEVELS - 1), L - 1, W), out.shape
    ref = ref_forward(params, inputs, label)
    err = float(jnp.max(jnp.abs(out - ref)))
    assert jnp.allclose(out, ref, atol=1e-4, rtol=1e-4), err

    print("KERNEL_OK")
</pallas_src>

<mosaic_0001>
module attributes {stable_mosaic.version = 11 : i64} {
  func.func @_fused_kernel(%arg0: i32, %arg1: memref<1x16x16xf32, #tpu.memory_space<vmem>>, %arg2: memref<1x16x16xf32, #tpu.memory_space<vmem>>, %arg3: memref<9x64xf32, #tpu.memory_space<vmem>>, %arg4: memref<1x1x64xf32, #tpu.memory_space<vmem>>, %arg5: memref<3x192x128xf32, #tpu.memory_space<vmem>>, %arg6: memref<1x128xf32, #tpu.memory_space<vmem>>, %arg7: memref<1x240x128xf32, #tpu.memory_space<vmem>>, %arg8: memref<17x18x64xf32, #tpu.memory_space<vmem>>, %arg9: memref<19x16x192xf32, #tpu.memory_space<vmem>>) attributes {dimension_semantics = [#tpu.dimension_semantics<parallel>], iteration_bounds = array<i64: 2>, scalar_prefetch = 0 : i64, scratch_operands = 2 : i64, tpu.core_type = #tpu.core_type<tc>, window_params = [{transform_indices = @transform_0, window_bounds = array<i64: 1, 16, 16>}, {transform_indices = @transform_1, window_bounds = array<i64: 1, 16, 16>}, {pipeline_mode = #tpu.pipeline_mode<synchronous>, transform_indices = @transform_2, window_bounds = array<i64: 9, 64>}, {pipeline_mode = #tpu.pipeline_mode<synchronous>, transform_indices = @transform_3, window_bounds = array<i64: 1, 1, 64>}, {pipeline_mode = #tpu.pipeline_mode<synchronous>, transform_indices = @transform_4, window_bounds = array<i64: 3, 192, 128>}, {pipeline_mode = #tpu.pipeline_mode<synchronous>, transform_indices = @transform_5, window_bounds = array<i64: 1, 128>}, {transform_indices = @transform_6, window_bounds = array<i64: 1, 240, 128>}]} {
    %cst = arith.constant 0.000000e+00 : f32
    %0 = vector.broadcast %cst : f32 to vector<17x1x64xf32>
    %c0 = arith.constant 0 : index
    %c0_0 = arith.constant 0 : index
    %c0_1 = arith.constant 0 : index
    %1 = vector.load %arg8[%c0, %c0_0, %c0_1] : memref<17x18x64xf32, #tpu.memory_space<vmem>>, vector<17x1x64xf32>
    tpu.vector_store %arg8[%c0, %c0_0, %c0_1], %0 {strides = array<i32>} : memref<17x18x64xf32, #tpu.memory_space<vmem>>, vector<17x1x64xf32>,
    %cst_2 = arith.constant 0.000000e+00 : f32
    %2 = vector.broadcast %cst_2 : f32 to vector<17x1x64xf32>
    %c0_3 = arith.constant 0 : index
    %c17 = arith.constant 17 : index
    %c0_4 = arith.constant 0 : index
    %3 = vector.load %arg8[%c0_3, %c17, %c0_4] : memref<17x18x64xf32, #tpu.memory_space<vmem>>, vector<17x1x64xf32>
    tpu.vector_store %arg8[%c0_3, %c17, %c0_4], %2 {strides = array<i32>} : memref<17x18x64xf32, #tpu.memory_space<vmem>>, vector<17x1x64xf32>,
    %cst_5 = arith.constant 0.000000e+00 : f32
    %4 = vector.broadcast %cst_5 : f32 to vector<2x16x32xf32>
    %c0_6 = arith.constant 0 : index
    %c1 = arith.constant 1 : index
    %c0_7 = arith.constant 0 : index
    %5 = vector.load %arg8[%c0_6, %c1, %c0_7] : memref<17x18x64xf32, #tpu.memory_space<vmem>>, vector<2x16x32xf32>
    tpu.vector_store %arg8[%c0_6, %c1, %c0_7], %4 {strides = array<i32>} : memref<17x18x64xf32, #tpu.memory_space<vmem>>, vector<2x16x32xf32>,
    %cst_8 = arith.constant 0.000000e+00 : f32
    %6 = vector.broadcast %cst_8 : f32 to vector<2x16x32xf32>
    %c15 = arith.constant 15 : index
    %c1_9 = arith.constant 1 : index
    %c32 = arith.constant 32 : index
    %7 = vector.load %arg8[%c15, %c1_9, %c32] : memref<17x18x64xf32, #tpu.memory_space<vmem>>, vector<2x16x32xf32>
    tpu.vector_store %arg8[%c15, %c1_9, %c32], %6 {strides = array<i32>} : memref<17x18x64xf32, #tpu.memory_space<vmem>>, vector<2x16x32xf32>,
    %c0_10 = arith.constant 0 : index
    %c0_11 = arith.constant 0 : index
    %c0_12 = arith.constant 0 : index
    %8 = vector.load %arg1[%c0_10, %c0_11, %c0_12] : memref<1x16x16xf32, #tpu.memory_space<vmem>>, vector<1x15x16xf32>
    %9 = vector.shape_cast %8 : vector<1x15x16xf32> to vector<15x16xf32>
    %c0_13 = arith.constant 0 : index
    %c1_14 = arith.constant 1 : index
    %c0_15 = arith.constant 0 : index
    %10 = vector.load %arg2[%c0_13, %c1_14, %c0_15] : memref<1x16x16xf32, #tpu.memory_space<vmem>>, vector<1x15x16xf32>
    %11 = vector.shape_cast %10 : vector<1x15x16xf32> to vector<15x16xf32>
    %12 = vector.shape_cast %9 : vector<15x16xf32> to vector<15x16x1xf32>
    %13 = vector.shape_cast %12 : vector<15x16x1xf32> to vector<15x16x1xf32>
    %14 = vector.broadcast %13 : vector<15x16x1xf32> to vector<15x16x32xf32>
    %c2 = arith.constant 2 : index
    %c1_16 = arith.constant 1 : index
    %c0_17 = arith.constant 0 : index
    %15 = vector.load %arg8[%c2, %c1_16, %c0_17] : memref<17x18x64xf32, #tpu.memory_space<vmem>>, vector<15x16x32xf32>
    tpu.vector_store %arg8[%c2, %c1_16, %c0_17], %14 {strides = array<i32>} : memref<17x18x64xf32, #tpu.memory_space<vmem>>, vector<15x16x32xf32>,
    %16 = vector.shape_cast %11 : vector<15x16xf32> to vector<15x16x1xf32>
    %17 = vector.shape_cast %16 : vector<15x16x1xf32> to vector<15x16x1xf32>
    %18 = vector.broadcast %17 : vector<15x16x1xf32> to vector<15x16x32xf32>
    %c0_18 = arith.constant 0 : index
    %c1_19 = arith.constant 1 : index
    %c32_20 = arith.constant 32 : index
    %19 = vector.load %arg8[%c0_18, %c1_19, %c32_20] : memref<17x18x64xf32, #tpu.memory_space<vmem>>, vector<15x16x32xf32>
    tpu.vector_store %arg8[%c0_18, %c1_19, %c32_20], %18 {strides = array<i32>} : memref<17x18x64xf32, #tpu.memory_space<vmem>>, vector<15x16x32xf32>,
    %c0_21 = arith.constant 0 : index
    %c0_22 = arith.constant 0 : index
    %20 = vector.load %arg3[%c0_21, %c0_22] : memref<9x64xf32, #tpu.memory_space<vmem>>, vector<9x64xf32>
    %cst_23 = arith.constant 0.000000e+00 : f32
    %21 = vector.broadcast %cst_23 : f32 to vector<15x16x64xf32>
    %c0_24 = arith.constant 0 : index
    %c0_25 = arith.constant 0 : index
    %c0_26 = arith.constant 0 : index
    %22 = vector.load %arg8[%c0_24, %c0_25, %c0_26] : memref<17x18x64xf32, #tpu.memory_space<vmem>>, vector<15x16x64xf32>
    %23 = vector.extract_strided_slice %20 {offsets = [0, 0], sizes = [1, 64], strides = [1, 1]} : vector<9x64xf32> to vector<1x64xf32>
    %24 = vector.shape_cast %23 : vector<1x64xf32> to vector<64xf32>
    %25 = vector.shape_cast %24 : vector<64xf32> to vector<1x1x64xf32>
    %26 = vector.broadcast %25 : vector<1x1x64xf32> to vector<15x16x64xf32>
    %27 = arith.mulf %22, %26 : vector<15x16x64xf32>
    %28 = arith.addf %21, %27 : vector<15x16x64xf32>
    %c0_27 = arith.constant 0 : index
    %c1_28 = arith.constant 1 : index
    %c0_29 = arith.constant 0 : index
    %29 = vector.load %arg8[%c0_27, %c1_28, %c0_29] : memref<17x18x64xf32, #tpu.memory_space<vmem>>, vector<15x16x64xf32>
    %30 = vector.extract_strided_slice %20 {offsets = [1, 0], sizes = [1, 64], strides = [1, 1]} : vector<9x64xf32> to vector<1x64xf32>
    %31 = vector.shape_cast %30 : vector<1x64xf32> to vector<64xf32>
    %32 = vector.shape_cast %31 : vector<64xf32> to vector<1x1x64xf32>
    %33 = vector.broadcast %32 : vector<1x1x64xf32> to vector<15x16x64xf32>
    %34 = arith.mulf %29, %33 : vector<15x16x64xf32>
    %35 = arith.addf %28, %34 : vector<15x16x64xf32>
    %c0_30 = arith.constant 0 : index
    %c2_31 = arith.constant 2 : index
    %c0_32 = arith.constant 0 : index
    %36 = vector.load %arg8[%c0_30, %c2_31, %c0_32] : memref<17x18x64xf32, #tpu.memory_space<vmem>>, vector<15x16x64xf32>
    %37 = vector.extract_strided_slice %20 {offsets = [2, 0], sizes = [1, 64], strides = [1, 1]} : vector<9x64xf32> to vector<1x64xf32>
    %38 = vector.shape_cast %37 : vector<1x64xf32> to vector<64xf32>
    %39 = vector.shape_cast %38 : vector<64xf32> to vector<1x1x64xf32>
    %40 = vector.broadcast %39 : vector<1x1x64xf32> to vector<15x16x64xf32>
    %41 = arith.mulf %36, %40 : vector<15x16x64xf32>
    %42 = arith.addf %35, %41 : vector<15x16x64xf32>
    %c1_33 = arith.constant 1 : index
    %c0_34 = arith.constant 0 : index
    %c0_35 = arith.constant 0 : index
    %43 = vector.load %arg8[%c1_33, %c0_34, %c0_35] : memref<17x18x64xf32, #tpu.memory_space<vmem>>, vector<15x16x64xf32>
    %44 = vector.extract_strided_slice %20 {offsets = [3, 0], sizes = [1, 64], strides = [1, 1]} : vector<9x64xf32> to vector<1x64xf32>
    %45 = vector.shape_cast %44 : vector<1x64xf32> to vector<64xf32>
    %46 = vector.shape_cast %45 : vector<64xf32> to vector<1x1x64xf32>
    %47 = vector.broadcast %46 : vector<1x1x64xf32> to vector<15x16x64xf32>
    %48 = arith.mulf %43, %47 : vector<15x16x64xf32>
    %49 = arith.addf %42, %48 : vector<15x16x64xf32>
    %c1_36 = arith.constant 1 : index
    %c1_37 = arith.constant 1 : index
    %c0_38 = arith.constant 0 : index
    %50 = vector.load %arg8[%c1_36, %c1_37, %c0_38] : memref<17x18x64xf32, #tpu.memory_space<vmem>>, vector<15x16x64xf32>
    %51 = vector.extract_strided_slice %20 {offsets = [4, 0], sizes = [1, 64], strides = [1, 1]} : vector<9x64xf32> to vector<1x64xf32>
    %52 = vector.shape_cast %51 : vector<1x64xf32> to vector<64xf32>
    %53 = vector.shape_cast %52 : vector<64xf32> to vector<1x1x64xf32>
    %54 = vector.broadcast %53 : vector<1x1x64xf32> to vector<15x16x64xf32>
    %55 = arith.mulf %50, %54 : vector<15x16x64xf32>
    %56 = arith.addf %49, %55 : vector<15x16x64xf32>
    %c1_39 = arith.constant 1 : index
    %c2_40 = arith.constant 2 : index
    %c0_41 = arith.constant 0 : index
    %57 = vector.load %arg8[%c1_39, %c2_40, %c0_41] : memref<17x18x64xf32, #tpu.memory_space<vmem>>, vector<15x16x64xf32>
    %58 = vector.extract_strided_slice %20 {offsets = [5, 0], sizes = [1, 64], strides = [1, 1]} : vector<9x64xf32> to vector<1x64xf32>
    %59 = vector.shape_cast %58 : vector<1x64xf32> to vector<64xf32>
    %60 = vector.shape_cast %59 : vector<64xf32> to vector<1x1x64xf32>
    %61 = vector.broadcast %60 : vector<1x1x64xf32> to vector<15x16x64xf32>
    %62 = arith.mulf %57, %61 : vector<15x16x64xf32>
    %63 = arith.addf %56, %62 : vector<15x16x64xf32>
    %c2_42 = arith.constant 2 : index
    %c0_43 = arith.constant 0 : index
    %c0_44 = arith.constant 0 : index
    %64 = vector.load %arg8[%c2_42, %c0_43, %c0_44] : memref<17x18x64xf32, #tpu.memory_space<vmem>>, vector<15x16x64xf32>
    %65 = vector.extract_strided_slice %20 {offsets = [6, 0], sizes = [1, 64], strides = [1, 1]} : vector<9x64xf32> to vector<1x64xf32>
    %66 = vector.shape_cast %65 : vector<1x64xf32> to vector<64xf32>
    %67 = vector.shape_cast %66 : vector<64xf32> to vector<1x1x64xf32>
    %68 = vector.broadcast %67 : vector<1x1x64xf32> to vector<15x16x64xf32>
    %69 = arith.mulf %64, %68 : vector<15x16x64xf32>
    %70 = arith.addf %63, %69 : vector<15x16x64xf32>
    %c2_45 = arith.constant 2 : index
    %c1_46 = arith.constant 1 : index
    %c0_47 = arith.constant 0 : index
    %71 = vector.load %arg8[%c2_45, %c1_46, %c0_47] : memref<17x18x64xf32, #tpu.memory_space<vmem>>, vector<15x16x64xf32>
    %72 = vector.extract_strided_slice %20 {offsets = [7, 0], sizes = [1, 64], strides = [1, 1]} : vector<9x64xf32> to vector<1x64xf32>
    %73 = vector.shape_cast %72 : vector<1x64xf32> to vector<64xf32>
    %74 = vector.shape_cast %73 : vector<64xf32> to vector<1x1x64xf32>
    %75 = vector.broadcast %74 : vector<1x1x64xf32> to vector<15x16x64xf32>
    %76 = arith.mulf %71, %75 : vector<15x16x64xf32>
    %77 = arith.addf %70, %76 : vector<15x16x64xf32>
    %c2_48 = arith.constant 2 : index
    %c2_49 = arith.constant 2 : index
    %c0_50 = arith.constant 0 : index
    %78 = vector.load %arg8[%c2_48, %c2_49, %c0_50] : memref<17x18x64xf32, #tpu.memory_space<vmem>>, vector<15x16x64xf32>
    %79 = vector.extract_strided_slice %20 {offsets = [8, 0], sizes = [1, 64], strides = [1, 1]} : vector<9x64xf32> to vector<1x64xf32>
    %80 = vector.shape_cast %79 : vector<1x64xf32> to vector<64xf32>
    %81 = vector.shape_cast %80 : vector<64xf32> to vector<1x1x64xf32>
    %82 = vector.broadcast %81 : vector<1x1x64xf32> to vector<15x16x64xf32>
    %83 = arith.mulf %78, %82 : vector<15x16x64xf32>
    %84 = arith.addf %77, %83 : vector<15x16x64xf32>
    %c0_51 = arith.constant 0 : index
    %c0_52 = arith.constant 0 : index
    %c0_53 = arith.constant 0 : index
    %85 = vector.load %arg4[%c0_51, %c0_52, %c0_53] : memref<1x1x64xf32, #tpu.memory_space<vmem>>, vector<1x1x64xf32>
    %86 = vector.broadcast %85 : vector<1x1x64xf32> to vector<15x16x64xf32>
    %87 = arith.addf %84, %86 : vector<15x16x64xf32>
    %cst_54 = arith.constant 0.000000e+00 : f32
    %88 = vector.broadcast %cst_54 : f32 to vector<15x16x64xf32>
    %89 = arith.maximumf %87, %88 : vector<15x16x64xf32>
    %cst_55 = arith.constant 0.000000e+00 : f32
    %90 = vector.broadcast %cst_55 : f32 to vector<4x16x96xf32>
    %c0_56 = arith.constant 0 : index
    %c0_57 = arith.constant 0 : index
    %c0_58 = arith.constant 0 : index
    %91 = vector.load %arg9[%c0_56, %c0_57, %c0_58] : memref<19x16x192xf32, #tpu.memory_space<vmem>>, vector<4x16x96xf32>
    tpu.vector_store %arg9[%c0_56, %c0_57, %c0_58], %90 {strides = array<i32>} : memref<19x16x192xf32, #tpu.memory_space<vmem>>, vector<4x16x96xf32>,
    %cst_59 = arith.constant 0.000000e+00 : f32
    %92 = vector.broadcast %cst_59 : f32 to vector<4x16x96xf32>
    %c15_60 = arith.constant 15 : index
    %c0_61 = arith.constant 0 : index
    %c96 = arith.constant 96 : index
    %93 = vector.load %arg9[%c15_60, %c0_61, %c96] : memref<19x16x192xf32, #tpu.memory_space<vmem>>, vector<4x16x96xf32>
    tpu.vector_store %arg9[%c15_60, %c0_61, %c96], %92 {strides = array<i32>} : memref<19x16x192xf32, #tpu.memory_space<vmem>>, vector<4x16x96xf32>,
    %94 = vector.extract_strided_slice %89 {offsets = [0, 0, 0], sizes = [15, 16, 32], strides = [1, 1, 1]} : vector<15x16x64xf32> to vector<15x16x32xf32>
    %cst_62 = arith.constant 0.000000e+00 : f32
    %95 = vector.broadcast %cst_62 : f32 to vector<15x1x32xf32>
    %c4 = arith.constant 4 : index
    %c0_63 = arith.constant 0 : index
    %c0_64 = arith.constant 0 : index
    %96 = vector.load %arg9[%c4, %c0_63, %c0_64] : memref<19x16x192xf32, #tpu.memory_space<vmem>>, vector<15x1x32xf32>
    tpu.vector_store %arg9[%c4, %c0_63, %c0_64], %95 {strides = array<i32>} : memref<19x16x192xf32, #tpu.memory_space<vmem>>, vector<15x1x32xf32>,
    %97 = vector.extract_strided_slice %94 {offsets = [0, 0, 0], sizes = [15, 15, 32], strides = [1, 1, 1]} : vector<15x16x32xf32> to vector<15x15x32xf32>
    %c4_65 = arith.constant 4 : index
    %c1_66 = arith.constant 1 : index
    %c0_67 = arith.constant 0 : index
    %98 = vector.load %arg9[%c4_65, %c1_66, %c0_67] : memref<19x16x192xf32, #tpu.memory_space<vmem>>, vector<15x15x32xf32>
    tpu.vector_store %arg9[%c4_65, %c1_66, %c0_67], %97 {strides = array<i32>} : memref<19x16x192xf32, #tpu.memory_space<vmem>>, vector<15x15x32xf32>,
    %c4_68 = arith.constant 4 : index
    %c0_69 = arith.constant 0 : index
    %c32_70 = arith.constant 32 : index
    %99 = vector.load %arg9[%c4_68, %c0_69, %c32_70] : memref<19x16x192xf32, #tpu.memory_space<vmem>>, vector<15x16x32xf32>
    tpu.vector_store %arg9[%c4_68, %c0_69, %c32_70], %94 {strides = array<i32>} : memref<19x16x192xf32, #tpu.memory_space<vmem>>, vector<15x16x32xf32>,
    %100 = vector.extract_strided_slice %94 {offsets = [0, 1, 0], sizes = [15, 15, 32], strides = [1, 1, 1]} : vector<15x16x32xf32> to vector<15x15x32xf32>
    %c4_71 = arith.constant 4 : index
    %c0_72 = arith.constant 0 : index
    %c64 = arith.constant 64 : index
    %101 = vector.load %arg9[%c4_71, %c0_72, %c64] : memref<19x16x192xf32, #tpu.memory_space<vmem>>, vector<15x15x32xf32>
    tpu.vector_store %arg9[%c4_71, %c0_72, %c64], %100 {strides = array<i32>} : memref<19x16x192xf32, #tpu.memory_space<vmem>>, vector<15x15x32xf32>,
    %cst_73 = arith.constant 0.000000e+00 : f32
    %102 = vector.broadcast %cst_73 : f32 to vector<15x1x32xf32>
    %c4_74 = arith.constant 4 : index
    %c15_75 = arith.constant 15 : index
    %c64_76 = arith.constant 64 : index
    %103 = vector.load %arg9[%c4_74, %c15_75, %c64_76] : memref<19x16x192xf32, #tpu.memory_space<vmem>>, vector<15x1x32xf32>
    tpu.vector_store %arg9[%c4_74, %c15_75, %c64_76], %102 {strides = array<i32>} : memref<19x16x192xf32, #tpu.memory_space<vmem>>, vector<15x1x32xf32>,
    %104 = vector.extract_strided_slice %89 {offsets = [0, 0, 32], sizes = [15, 16, 32], strides = [1, 1, 1]} : vector<15x16x64xf32> to vector<15x16x32xf32>
    %cst_77 = arith.constant 0.000000e+00 : f32
    %105 = vector.broadcast %cst_77 : f32 to vector<15x1x32xf32>
    %c0_78 = arith.constant 0 : index
    %c0_79 = arith.constant 0 : index
    %c96_80 = arith.constant 96 : index
    %106 = vector.load %arg9[%c0_78, %c0_79, %c96_80] : memref<19x16x192xf32, #tpu.memory_space<vmem>>, vector<15x1x32xf32>
    tpu.vector_store %arg9[%c0_78, %c0_79, %c96_80], %105 {strides = array<i32>} : memref<19x16x192xf32, #tpu.memory_space<vmem>>, vector<15x1x32xf32>,
    %107 = vector.extract_strided_slice %104 {offsets = [0, 0, 0], sizes = [15, 15, 32], strides = [1, 1, 1]} : vector<15x16x32xf32> to vector<15x15x32xf32>
    %c0_81 = arith.constant 0 : index
    %c1_82 = arith.constant 1 : index
    %c96_83 = arith.constant 96 : index
    %108 = vector.load %arg9[%c0_81, %c1_82, %c96_83] : memref<19x16x192xf32, #tpu.memory_space<vmem>>, vector<15x15x32xf32>
    tpu.vector_store %arg9[%c0_81, %c1_82, %c96_83], %107 {strides = array<i32>} : memref<19x16x192xf32, #tpu.memory_space<vmem>>, vector<15x15x32xf32>,
    %c0_84 = arith.constant 0 : index
    %c0_85 = arith.constant 0 : index
    %c128 = arith.constant 128 : index
    %109 = vector.load %arg9[%c0_84, %c0_85, %c128] : memref<19x16x192xf32, #tpu.memory_space<vmem>>, vector<15x16x32xf32>
    tpu.vector_store %arg9[%c0_84, %c0_85, %c128], %104 {strides = array<i32>} : memref<19x16x192xf32, #tpu.memory_space<vmem>>, vector<15x16x32xf32>,
    %110 = vector.extract_strided_slice %104 {offsets = [0, 1, 0], sizes = [15, 15, 32], strides = [1, 1, 1]} : vector<15x16x32xf32> to vector<15x15x32xf32>
    %c0_86 = arith.constant 0 : index
    %c0_87 = arith.constant 0 : index
    %c160 = arith.constant 160 : index
    %111 = vector.load %arg9[%c0_86, %c0_87, %c160] : memref<19x16x192xf32, #tpu.memory_space<vmem>>, vector<15x15x32xf32>
    tpu.vector_store %arg9[%c0_86, %c0_87, %c160], %110 {strides = array<i32>} : memref<19x16x192xf32, #tpu.memory_space<vmem>>, vector<15x15x32xf32>,
    %cst_88 = arith.constant 0.000000e+00 : f32
    %112 = vector.broadcast %cst_88 : f32 to vector<15x1x32xf32>
    %c0_89 = arith.constant 0 : index
    %c15_90 = arith.constant 15 : index
    %c160_91 = arith.constant 160 : index
    %113 = vector.load %arg9[%c0_89, %c15_90, %c160_91] : memref<19x16x192xf32, #tpu.memory_space<vmem>>, vector<15x1x32xf32>
    tpu.vector_store %arg9[%c0_89, %c15_90, %c160_91], %112 {strides = array<i32>} : memref<19x16x192xf32, #tpu.memory_space<vmem>>, vector<15x1x32xf32>,
    %cst_92 = arith.constant 0.000000e+00 : f32
    %114 = vector.broadcast %cst_92 : f32 to vector<240x128xf32>
    %c0_93 = arith.constant 0 : index
    %c0_94 = arith.constant 0 : index
    %c0_95 = arith.constant 0 : index
    %115 = vector.load %arg9[%c0_93, %c0_94, %c0_95] : memref<19x16x192xf32, #tpu.memory_space<vmem>>, vector<15x16x192xf32>
    %116 = vector.shape_cast %115 : vector<15x16x192xf32> to vector<240x192xf32>
    %c0_96 = arith.constant 0 : index
    %c0_97 = arith.constant 0 : index
    %c0_98 = arith.constant 0 : index
    %117 = vector.load %arg5[%c0_96, %c0_97, %c0_98] : memref<3x192x128xf32, #tpu.memory_space<vmem>>, vector<1x192x128xf32>
    %118 = vector.shape_cast %117 : vector<1x192x128xf32> to vector<192x128xf32>
    %cst_99 = arith.constant dense<0.000000e+00> : vector<240x128xf32>
    %119 = tpu.matmul %116, %118, %cst_99 {dimension_numbers = #tpu.dot_dimension_numbers<[1], [0], [0], [1], [0, 0, 1, 1], [], []>} : vector<240x192xf32>, vector<192x128xf32>, vector<240x128xf32> -> vector<240x128xf32>
    %120 = arith.addf %114, %119 : vector<240x128xf32>
    %c2_100 = arith.constant 2 : index
    %c0_101 = arith.constant 0 : index
    %c0_102 = arith.constant 0 : index
    %121 = vector.load %arg9[%c2_100, %c0_101, %c0_102] : memref<19x16x192xf32, #tpu.memory_space<vmem>>, vector<15x16x192xf32>
    %122 = vector.shape_cast %121 : vector<15x16x192xf32> to vector<240x192xf32>
    %c1_103 = arith.constant 1 : index
    %c0_104 = arith.constant 0 : index
    %c0_105 = arith.constant 0 : index
    %123 = vector.load %arg5[%c1_103, %c0_104, %c0_105] : memref<3x192x128xf32, #tpu.memory_space<vmem>>, vector<1x192x128xf32>
    %124 = vector.shape_cast %123 : vector<1x192x128xf32> to vector<192x128xf32>
    %cst_106 = arith.constant dense<0.000000e+00> : vector<240x128xf32>
    %125 = tpu.matmul %122, %124, %cst_106 {dimension_numbers = #tpu.dot_dimension_numbers<[1], [0], [0], [1], [0, 0, 1, 1], [], []>} : vector<240x192xf32>, vector<192x128xf32>, vector<240x128xf32> -> vector<240x128xf32>
    %126 = arith.addf %120, %125 : vector<240x128xf32>
    %c4_107 = arith.constant 4 : index
    %c0_108 = arith.constant 0 : index
    %c0_109 = arith.constant 0 : index
    %127 = vector.load %arg9[%c4_107, %c0_108, %c0_109] : memref<19x16x192xf32, #tpu.memory_space<vmem>>, vector<15x16x192xf32>
    %128 = vector.shape_cast %127 : vector<15x16x192xf32> to vector<240x192xf32>
    %c2_110 = arith.constant 2 : index
    %c0_111 = arith.constant 0 : index
    %c0_112 = arith.constant 0 : index
    %129 = vector.load %arg5[%c2_110, %c0_111, %c0_112] : memref<3x192x128xf32, #tpu.memory_space<vmem>>, vector<1x192x128xf32>
    %130 = vector.shape_cast %129 : vector<1x192x128xf32> to vector<192x128xf32>
    %cst_113 = arith.constant dense<0.000000e+00> : vector<240x128xf32>
    %131 = tpu.matmul %128, %130, %cst_113 {dimension_numbers = #tpu.dot_dimension_numbers<[1], [0], [0], [1], [0, 0, 1, 1], [], []>} : vector<240x192xf32>, vector<192x128xf32>, vector<240x128xf32> -> vector<240x128xf32>
    %132 = arith.addf %126, %131 : vector<240x128xf32>
    %c0_114 = arith.constant 0 : index
    %c0_115 = arith.constant 0 : index
    %133 = vector.load %arg6[%c0_114, %c0_115] : memref<1x128xf32, #tpu.memory_space<vmem>>, vector<1x128xf32>
    %134 = vector.broadcast %133 : vector<1x128xf32> to vector<240x128xf32>
    %135 = arith.addf %132, %134 : vector<240x128xf32>
    %cst_116 = arith.constant 0.000000e+00 : f32
    %136 = vector.broadcast %cst_116 : f32 to vector<240x128xf32>
    %137 = arith.maximumf %135, %136 : vector<240x128xf32>
    %c64_i32 = arith.constant 64 : i32
    %138 = tpu.dynamic_rotate %137 by %c64_i32 dim 1 : vector<240x128xf32>, i32 -> vector<240x128xf32>
    %139 = arith.addf %137, %138 : vector<240x128xf32>
    %140 = math.tanh %139 : vector<240x128xf32>
    %cst_117 = arith.constant 1.000000e+00 : f32
    %141 = vector.broadcast %cst_117 : f32 to vector<240x128xf32>
    %142 = arith.addf %140, %141 : vector<240x128xf32>
    %cst_118 = arith.constant 5.000000e-01 : f32
    %143 = vector.broadcast %cst_118 : f32 to vector<240x128xf32>
    %144 = arith.mulf %142, %143 : vector<240x128xf32>
    %c0_119 = arith.constant 0 : index
    %c0_120 = arith.constant 0 : index
    %c0_121 = arith.constant 0 : index
    %145 = vector.load %arg7[%c0_119, %c0_120, %c0_121] : memref<1x240x128xf32, #tpu.memory_space<vmem>>, vector<1x240x128xf32>
    %146 = vector.shape_cast %145 : vector<1x240x128xf32> to vector<240x128xf32>
    %147 = vector.shape_cast %144 : vector<240x128xf32> to vector<1x240x128xf32>
    tpu.vector_store %arg7[%c0_119, %c0_120, %c0_121], %147 {strides = array<i32>} : memref<1x240x128xf32, #tpu.memory_space<vmem>>, vector<1x240x128xf32>,
    return
  }
  func.func @transform_0(%arg0: i32) -> (i32, i32, i32) {
    %c0_i32 = arith.constant 0 : i32
    %c0_i32_0 = arith.constant 0 : i32
    %c0_i32_1 = arith.constant 0 : i32
    return %arg0, %c0_i32, %c0_i32_0 : i32, i32, i32
  }
  func.func @transform_1(%arg0: i32) -> (i32, i32, i32) {
    %c0_i32 = arith.constant 0 : i32
    %c0_i32_0 = arith.constant 0 : i32
    %c0_i32_1 = arith.constant 0 : i32
    return %arg0, %c0_i32, %c0_i32_0 : i32, i32, i32
  }
  func.func @transform_2(%arg0: i32) -> (i32, i32) {
    %c0_i32 = arith.constant 0 : i32
    %c0_i32_0 = arith.constant 0 : i32
    %c0_i32_1 = arith.constant 0 : i32
    return %c0_i32, %c0_i32_0 : i32, i32
  }
  func.func @transform_3(%arg0: i32) -> (i32, i32, i32) {
    %c0_i32 = arith.constant 0 : i32
    %c0_i32_0 = arith.constant 0 : i32
    %c0_i32_1 = arith.constant 0 : i32
    %c0_i32_2 = arith.constant 0 : i32
    return %c0_i32, %c0_i32_0, %c0_i32_1 : i32, i32, i32
  }
  func.func @transform_4(%arg0: i32) -> (i32, i32, i32) {
    %c0_i32 = arith.constant 0 : i32
    %c0_i32_0 = arith.constant 0 : i32
    %c0_i32_1 = arith.constant 0 : i32
    %c0_i32_2 = arith.constant 0 : i32
    return %c0_i32, %c0_i32_0, %c0_i32_1 : i32, i32, i32
  }
  func.func @transform_5(%arg0: i32) -> (i32, i32) {
    %c0_i32 = arith.constant 0 : i32
    %c0_i32_0 = arith.constant 0 : i32
    %c0_i32_1 = arith.constant 0 : i32
    return %c0_i32, %c0_i32_0 : i32, i32
  }
  func.func @transform_6(%arg0: i32) -> (i32, i32, i32) {
    %c0_i32 = arith.constant 0 : i32
    %c0_i32_0 = arith.constant 0 : i32
    %c0_i32_1 = arith.constant 0 : i32
    return %arg0, %c0_i32, %c0_i32_0 : i32, i32, i32
  }
}

</mosaic_0001>

<bundles_post_ra>
// kernel: autoregressive_forward.1
= control target key start
LH: loop header
LB: loop body
LE: loop exit
PB: predicated region body
PF: predicated region fallthrough
CT: control target
= control target key end

     0   :  { %s7737_s0 = inlined_call_operand.hbm [shape: f32[2,16,16], index: 0, kind: input, shape index: {}]   ;;  %s7738_s1 = inlined_call_operand.hbm [shape: f32[2,16,16], index: 1, kind: input, shape index: {}]   ;;  %s7739_s2 = inlined_call_operand.hbm [shape: f32[9,64], index: 2, kind: input, shape index: {}]   ;;  %s7740_s3 = inlined_call_operand.vmem [shape: f32[1,1,64], index: 3, kind: input, shape index: {}]   ;;  %s7741_s4 = inlined_call_operand.hbm [shape: f32[3,192,128], index: 4, kind: input, shape index: {}]   ;;  %s7742_s5 = inlined_call_operand.vmem [shape: f32[1,128], index: 5, kind: input, shape index: {}]   ;;  %s7743_s6 = inlined_call_operand.hbm [shape: f32[2,240,128], index: 6, kind: output, shape index: {}]  }
   0x1   :  { %7798 = sst [smem:[#allocation78_spill]] %s7737_s0 }
   0x2   :  { %7799 = sst [smem:[#allocation79_spill]] %s7739_s2 }
   0x3   :  { %7800 = sst [smem:[#allocation80_spill]] %s7741_s4 }
   0x4   :  { %11 = vsyncpa [#allocation5], 0 }
   0x5   :  { %13 = vsyncpa [#allocation5 + $0x1], 0 }
   0x6   :  { %14 = vsyncpa [#allocation8], 0 }
   0x7   :  { %16 = vsyncpa [#allocation8 + $0x1], 0 }
   0x8   :  { %17 = vsyncpa [#allocation11], 0 }
   0x9   :  { %18 = vsyncpa [#allocation6], 0 }
   0xa   :  { %20 = vsyncpa [#allocation6 + $0x1], 0  ;;  %s4758_s21 = smov 0   ;;  %s4760_s22 = smov 0  }
   0xb   :  { %s4762_s23 = smov 0   ;;  %s4764_s24 = smov 0  }
   0xc LB: > { %s4779_s25 = sadd.s32 4294967295, %s4707_s24   ;;  %s4122_s26 = sadd.s32 4294967294, %s4707_s24   ;;  %s4707_s24 = sphi %s4764_s24, %s7967_s24   ;;  %s4703_s23 = sphi %s4762_s23, %s7966_s23   ;;  %s4699_s22 = sphi %s4760_s22, %s7965_s22   ;;  %s4695_s21 = sphi %s4758_s21, %s7964_s21  }
   0xd   : > { %p46_p0 = scmp.ne.s32.totalorder %s4699_s22, %s4695_s21  ;;  %p7744_p1 = scmp.eq.s32.totalorder %s4779_s25, 0 }
   0xe   : > { %p186_p3 = scmp.eq.s32.totalorder %s4122_s26, 1  ;;  %p4123_p5 = scmp.ge.s32.totalorder %s4707_s24, 1 }
   0xf   : > { %p4788_p4 = por %p7744_p1, %p46_p0  ;;  %p193_p7 = scmp.lt.s32.totalorder %s4707_s24, 3 }
  0x10   : > { %p4793_p6 = por %p186_p3, %p46_p0  ;;  %s4709_s30 = smov [#allocation9]  }
  0x11   : > { %s7801_s27 = scalar_select %p4788_p4, 1, 0 }
  0x12   : > { %s7802_s28 = scalar_select %p4793_p6, 1, 0 }
  0x13   : > { %p4798_p8 = pnand %p4123_p5, %p193_p7  ;;  %s205_s7 = sshll.u32 %s4709_s30, 4  ;;  %s4802_s7 = int_to_ptr.vmem [resolvable:$true] %s205_s7 }
  0x14   : > { %s4710_s9 = smov [#allocation10]   ;;  %s7805_s2 = sld [smem:[#allocation79_spill]] }
  0x15   : > { %p4384_p9 = pneg %p4798_p8  ;;  %s221_s10 = sshll.u32 %s4710_s9, 4  ;;  %s4813_s10 = int_to_ptr.vmem [resolvable:$true] %s221_s10 }
  0x17   : > { %p4809_p11 = pnand %p4384_p9, %p7744_p1 }
  0x19   : > { %p4515_p13 = pneg %p4809_p11 }
  0x1a   : > { %s4513_s13 = scalar_lea.hbm %s7805_s2, 256 }
  0x1b   : > { %p4514_p12 = scmp.ne.s32.totalorder %s7805_s2, %s4513_s13  ;;  %p4520_p5 = scmp.lt.u32.totalorder %s4513_s13, %s7805_s2 }
  0x1d   : > { %p4516_p0 = pnand %p4515_p13, %p4514_p12 }
  0x1f   : > { %p4517_p3 = pneg %p4516_p0 }
  0x21   : > { %p4522_p7 = pnand %p4520_p5, %p4517_p3 }
  0x23   : > { %4525 = shalt.err (!%p4522_p7)
}
  0x24   : > { %s4526_s18 = scalar_lea.vmem %s4802_s7, 256  ;;  %p4534_p2 = scmp.lt.s32.totalorder %s4802_s7, %s4802_s7 }
  0x25   : > { %p4527_p9 = scmp.ne.s32.totalorder %s4802_s7, %s4526_s18  ;;  %p4535_p12 = scmp.lt.s32.totalorder %s4526_s18, %s4526_s18 }
  0x27   : > { %p4529_p10 = pnand %p4527_p9, %p4515_p13  ;;  %p4536_p0 = por %p4535_p12, %p4534_p2 }
  0x29   : > { %p4530_p1 = pneg %p4529_p10 }
  0x2b   : > { %p4537_p6 = pnand %p4536_p0, %p4530_p1 }
  0x2d   : > { %4540 = shalt.err (!%p4537_p6)
}
  0x2e   : > { %s7745_s19 = smov 128   ;;  %s7747_s20 = smov 8  }
  0x2f   : > { %4387 = dma.hbm_to_vmem [thread:$0]  (!%p4809_p11), %s7805_s2, 256, %s4802_s7, [#allocation8], %s7745_s19, %s7745_s19, %s7747_s20  }
  0x30   : > { %s7806_s4 = sld [smem:[#allocation80_spill]] }
  0x36   : > { %s4541_s12 = scalar_lea.hbm %s7806_s4, 9216 }
  0x37   : > { %p4542_p1 = scmp.ne.s32.totalorder %s7806_s4, %s4541_s12  ;;  %p4548_p10 = scmp.lt.u32.totalorder %s4541_s12, %s7806_s4 }
  0x39   : > { %p4544_p2 = pnand %p4542_p1, %p4515_p13 }
  0x3b   : > { %p4545_p6 = pneg %p4544_p2 }
  0x3d   : > { %p4550_p3 = pnand %p4548_p10, %p4545_p6 }
  0x3f   : > { %4553 = shalt.err (!%p4550_p3)
}
  0x40   : > { %s4554_s7 = scalar_lea.vmem %s4813_s10, 9216  ;;  %p4562_p12 = scmp.lt.s32.totalorder %s4813_s10, %s4813_s10 }
  0x41   : > { %p4555_p5 = scmp.ne.s32.totalorder %s4813_s10, %s4554_s7  ;;  %p4563_p0 = scmp.lt.s32.totalorder %s4554_s7, %s4554_s7 }
  0x43   : > { %p4557_p7 = pnand %p4555_p5, %p4515_p13  ;;  %p4564_p1 = por %p4563_p0, %p4562_p12 }
  0x45   : > { %p4558_p9 = pneg %p4557_p7 }
  0x47   : > { %p4565_p2 = pnand %p4564_p1, %p4558_p9 }
  0x49   : > { %4568 = shalt.err (!%p4565_p2)
}
  0x4a   : > { %4390 = dma.hbm_to_vmem [thread:$0]  (!%p4809_p11), %s7806_s4, 9216, %s4813_s10, [#allocation11], %s7745_s19, %s7745_s19, %s7747_s20  }
  0x4b   : > { %s4874_s8 = sadd.s32 1, %s4707_s24   ;;  %s33_s26 = sadd.s32 1, %s4703_s23 }
  0x4c   : > { %s30_s30 = ssub.s32 %s4707_s24, %s4874_s8  ;;  %p40_p13 = scmp.ne.s32.totalorder %s4703_s23, %s4699_s22 }
  0x4d   : > { %p31_p6 = scmp.eq.s32.totalorder %s30_s30, 0  ;;  %p41_p10 = scmp.eq.s32.totalorder %s4707_s24, 0 }
  0x4e   : > { %p7807_p3 = scmp.eq.s32.totalorder %s4779_s25, 1  ;;  %p4404_p7 = scmp.lt.s32.totalorder %s4707_s24, 2 }
  0x4f   : > { %s4890_s11 = scalar_select %p31_p6, %s4703_s23, %s33_s26  }
  0x50   : > { %p4884_p5 = por %p7807_p3, %p40_p13  ;;  %p42_p9 = por %p41_p10, %p40_p13 }
  0x51   : > { %s238_s12 = sand.u32 1, %s4703_s23   ;;  %s4234_s10 = sshll.u32 %s4707_s24, 8 }
  0x52   : > { %s7808_s9 = scalar_select %p4884_p5, 1, 0 }
  0x53   : > { %s4127_s13 = sshll.u32 %s238_s12, 4  ;;  %s7809_s0 = sld [smem:[#allocation78_spill]] }
  0x54   : > { %s242_s7 = scalar_lea.vmem [#allocation4], %s4127_s13  ;;  %p4901_p11 = pnand %p4404_p7, %p42_p9 }
  0x55   : > { %s249_s17 = sshll.u32 %s242_s7, 4  ;;  %s4908_s14 = scalar_lea.hbm %s7738_s1, %s4234_s10  ;;  %s4899_s17 = int_to_ptr.vmem [resolvable:$true] %s249_s17 }
  0x56   : > { %s263_s15 = scalar_lea.vmem [#allocation7], %s4127_s13  ;;  %s4912_s20 = scalar_lea.sflag [#allocation5], %s238_s12 }
  0x57   : > { %s4910_s19 = sshll.u32 %s263_s15, 4  ;;  %p4571_p0 = pneg %p4901_p11  ;;  %s4944_s19 = int_to_ptr.vmem [resolvable:$true] %s4910_s19 }
  0x59   : > { %s4897_s16 = scalar_lea.hbm %s7809_s0, %s4234_s10  ;;  %s4574_s26 = scalar_lea.hbm %s7809_s0, 512 }
  0x5a   : > { %s4569_s7 = scalar_lea.hbm %s4897_s16, 256  ;;  %p4575_p13 = scmp.lt.u32.totalorder %s4897_s16, %s7809_s0 }
  0x5b   : > { %p4570_p12 = scmp.ne.s32.totalorder %s4897_s16, %s4569_s7  ;;  %p4576_p6 = scmp.lt.u32.totalorder %s4574_s26, %s4569_s7 }
  0x5c   : > { %p4578_p3 = scmp.lt.u32.totalorder %s4569_s7, %s4897_s16 }
  0x5d   : > { %p4572_p1 = pnand %p4571_p0, %p4570_p12  ;;  %p4577_p10 = por %p4576_p6, %p4575_p13 }
  0x5f   : > { %p4573_p2 = pneg %p4572_p1  ;;  %p4579_p7 = por %p4578_p3, %p4577_p10 }
  0x61   : > { %p4580_p9 = pnand %p4579_p7, %p4573_p2 }
  0x63   : > { %4583 = shalt.err (!%p4580_p9)
}
  0x64   : > { %s4584_s12 = scalar_lea.vmem %s4899_s17, 256  ;;  %s4713_s2 = smov [#allocation4]  }
  0x65   : > { %p4585_p12 = scmp.ne.s32.totalorder %s4899_s17, %s4584_s12  ;;  %s4589_s4 = sshll.u32 %s4713_s2, 4  ;;  %s4590_s4 = int_to_ptr.vmem [resolvable:$false] %s4589_s4 }
  0x66   : > { %s4591_s13 = scalar_lea.vmem %s4590_s4, 512  ;;  %p4592_p4 = scmp.lt.s32.totalorder %s4899_s17, %s4590_s4 }
  0x67   : > { %p4587_p1 = pnand %p4585_p12, %p4571_p0  ;;  %p4593_p13 = scmp.lt.s32.totalorder %s4591_s13, %s4584_s12 }
  0x69   : > { %p4588_p5 = pneg %p4587_p1  ;;  %p4594_p6 = por %p4593_p13, %p4592_p4 }
  0x6b   : > { %p4595_p10 = pnand %p4594_p6, %p4588_p5 }
  0x6d   : > { %4598 = shalt.err (!%p4595_p10)
}
  0x6e   : > { %s7811_s15 = smov 8   ;;  %s7812_s7 = smov 128  }
  0x6f   : > { %4394 = dma.hbm_to_vmem [thread:$0]  (!%p4901_p11), %s4897_s16, 256, %s4899_s17, %s4912_s20, %s7812_s7, %s7812_s7, %s7811_s15  }
  0x70   : > { %s259_s26 = sand.u32 1, %s4707_s24   ;;  %s4599_s10 = scalar_lea.hbm %s4908_s14, 256 }
  0x71   : > { %s4947_s30 = scalar_lea.sflag [#allocation8], %s259_s26  ;;  %p4600_p4 = scmp.ne.s32.totalorder %s4908_s14, %s4599_s10 }
  0x72   : > { %s4604_s4 = scalar_lea.hbm %s7738_s1, 512  ;;  %p4605_p3 = scmp.lt.u32.totalorder %s4908_s14, %s7738_s1 }
  0x73   : > { %p4602_p5 = pnand %p4600_p4, %p4571_p0  ;;  %p4606_p7 = scmp.lt.u32.totalorder %s4604_s4, %s4599_s10 }
  0x74   : > { %p4608_p12 = scmp.lt.u32.totalorder %s4599_s10, %s4908_s14 }
  0x75   : > { %p4603_p2 = pneg %p4602_p5  ;;  %p4607_p9 = por %p4606_p7, %p4605_p3 }
  0x77   : > { %p4609_p1 = por %p4608_p12, %p4607_p9 }
  0x79   : > { %p4610_p13 = pnand %p4609_p1, %p4603_p2 }
  0x7b   : > { %4613 = shalt.err (!%p4610_p13)
}
  0x7c   : > { %s4614_s20 = scalar_lea.vmem %s4944_s19, 256  ;;  %s4714_s16 = smov [#allocation7]  }
  0x7d   : > { %p4615_p6 = scmp.ne.s32.totalorder %s4944_s19, %s4614_s20  ;;  %s4619_s17 = sshll.u32 %s4714_s16, 4  ;;  %s4620_s17 = int_to_ptr.vmem [resolvable:$false] %s4619_s17 }
  0x7e   : > { %s4621_s0 = scalar_lea.vmem %s4620_s17, 512  ;;  %p4622_p5 = scmp.lt.s32.totalorder %s4944_s19, %s4620_s17 }
  0x7f   : > { %p4617_p10 = pnand %p4615_p6, %p4571_p0  ;;  %p4623_p3 = scmp.lt.s32.totalorder %s4621_s0, %s4614_s20 }
  0x81   : > { %p4618_p4 = pneg %p4617_p10  ;;  %p4624_p7 = por %p4623_p3, %p4622_p5 }
  0x83   : > { %p4625_p9 = pnand %p4624_p7, %p4618_p4 }
  0x85   : > { %4628 = shalt.err (!%p4625_p9)
}
  0x86   : > { %4397 = dma.hbm_to_vmem [thread:$0]  (!%p4901_p11), %s4908_s14, 256, %s4944_s19, %s4947_s30, %s7812_s7, %s7812_s7, %s7811_s15  }
  0x87   : > { %282 = sbr.rel (%p4798_p8) target bundleno = 1194 (0x4aa), region = 44 }
  0x8e   : > { %s4979_s26 = sand.u32 1, %s4699_s22   ;;  %p7813_p0 = scmp.ne.s32.totalorder %s7801_s27, 0 }
  0x8f   : > { %s4134_s10 = sshll.u32 %s4979_s26, 4  ;;  %s285_s12 = scalar_lea.sflag [#allocation5], %s4979_s26 }
  0x90   : > { %s4983_s2 = scalar_lea.vmem [#allocation4], %s4134_s10 }
  0x91   : > { %4674 = dma.done.wait (%p7813_p0), %s285_s12, 256  }
  0x92   : > { %4676 = vsyncadd (%p7813_p0), %s285_s12, 4294967040  ;;  %s293_s19 = sand.u32 1, %s4779_s25   ;;  %s4990_s18 = scalar_lea.vmem [#allocation7], %s4134_s10 }
  0x93   : > { %s294_s29 = scalar_lea.sflag [#allocation8], %s293_s19 }
  0x94   : > { %4678 = dma.done.wait (%p7813_p0), %s294_s29, 256  }
  0x95   : > { %4680 = vsyncadd (%p7813_p0), %s294_s29, 4294967040  ;;  %p7814_p8 = scmp.eq.s32.totalorder %s4779_s25, 0 }
  0x97   : > { %4682 = dma.done.wait (%p7814_p8), [#allocation8], 256   ;;  %p7815_p11 = pmov %p7814_p8 }
  0x98   : > { %p7816_p2 = pmov %p7814_p8 }
  0x99   : > { %4684 = vsyncadd (%p7815_p11), [#allocation8], 4294967040 }
  0x9a   : > { %4686 = dma.done.wait (%p7816_p2), [#allocation11], 9216   ;;  %p7817_p12 = pmov %p7816_p2 }
  0x9b   : > { %v389_v0 = vlaneseq  ;;  %vm374_vm0 = vcmask 261120   ;;  %vm380_vm1 = vcmask 523520   ;;  %vm339_vm2 = vcmask 516096   ;;  %v5013_v4 = vld [vmem:[%s4983_s2] sm:$0xff]  ;;  %v5115_v12 = vld [vmem:[%s4990_s18 + $0x9] sm:$0x7f] }
  0x9c   : > { %4688 = vsyncadd (%p7817_p12), [#allocation11], 4294958080  ;;  %v7751_v5 = vmov 0.0   ;;  %v5107_v9 = vld [vmem:[%s4990_s18 + $0x1] sm:$0xff]  ;;  %vm1706_vm3 = vcmask 1048320   ;;  %s4717_s15 = smov 32  }
  0x9d   : > { %v5004_v1 = vshrl.u32 %v389_v0, 7  ;;  %345 = vst.msk [vmem:[#allocation2 + $0x78] sm:$0x1] %vm339_vm2, %v7751_v5  ;;  %340 = vst.msk [vmem:[#allocation2] sm:$0x1] %vm339_vm2, %v7751_v5  ;;  %v780_v53 = vld [vmem:[#allocation9] sm:$0xff] }
  0x9e   : > { %341 = vst.msk [vmem:[#allocation2 + $0x18] sm:$0x1] %vm339_vm2, %v7751_v5  ;;  %342 = vst.msk [vmem:[#allocation2 + $0x30] sm:$0x1] %vm339_vm2, %v7751_v5  ;;  %v5124_v15 = vld [vmem:[%s4983_s2 + $0x8] sm:$0x7f] }
  0x9f   : > { %v5007_v2 = vsub.s32 7, %v5004_v1  ;;  %v5010_v3 = vsub.s32 3, %v5004_v1  ;;  %343 = vst.msk [vmem:[#allocation2 + $0x48] sm:$0x1] %vm339_vm2, %v7751_v5  ;;  %344 = vst.msk [vmem:[#allocation2 + $0x60] sm:$0x1] %vm339_vm2, %v7751_v5 }
  0xa0   : > { %346 = vst.msk [vmem:[#allocation2 + $0x90] sm:$0x1] %vm339_vm2, %v7751_v5  ;;  %347 = vst.msk [vmem:[#allocation2 + $0xa8] sm:$0x1] %vm339_vm2, %v7751_v5  ;;  %v5104_v8 = vsub.s32 5, %v5004_v1  ;;  %v5110_v10 = vsub.s32 4, %v5004_v1 }
  0xa1   : > { %348 = vst.msk [vmem:[#allocation2 + $0xc0] sm:$0x1] %vm339_vm2, %v7751_v5  ;;  %349 = vst.msk [vmem:[#allocation2 + $0xd8] sm:$0x1] %vm339_vm2, %v7751_v5  ;;  %v469_v6 = vrot.slane %v5013_v4, %v5007_v2  ;;  %v425_v7 = vrot.slane %v5013_v4, %v5010_v3  ;;  %v5118_v13 = vsub.s32 1, %v5004_v1  ;;  %v5121_v14 = vsub.s32 0, %v5004_v1 }
  0xa2   : > { %350 = vst.msk [vmem:[#allocation2 + $0xf0] sm:$0x1] %vm339_vm2, %v7751_v5  ;;  %351 = vst.msk [vmem:[#allocation2 + $0x108] sm:$0x1] %vm339_vm2, %v7751_v5  ;;  %v643_v11 = vrot.slane %v5107_v9, %v5104_v8  ;;  %v5127_v16 = vsub.s32 6, %v5004_v1  ;;  %v5131_v17 = vrot.slane %v5115_v12, %v5110_v10  ;;  %v5143_v20 = vrot.slane %v5124_v15, %v5010_v3  ;;  %s4718_s7 = smov 96  }
  0xa3   : > { %352 = vst.msk [vmem:[#allocation2 + $0x120] sm:$0x1] %vm339_vm2, %v7751_v5  ;;  %353 = vst.msk [vmem:[#allocation2 + $0x138] sm:$0x1] %vm339_vm2, %v7751_v5  ;;  %471 = vbcast.lane.b32.xlu1 %v469_v6, 256  ;;  %427 = vbcast.lane.b32.xlu0 %v425_v7, 256  ;;  %v5135_v18 = vrot.slane %v5107_v9, %v5121_v14  ;;  %v5139_v19 = vrot.slane %v5107_v9, %v5118_v13 }
  0xa4   : > { %354 = vst.msk [vmem:[#allocation2 + $0x150] sm:$0x1] %vm339_vm2, %v7751_v5  ;;  %355 = vst.msk [vmem:[#allocation2 + $0x168] sm:$0x1] %vm339_vm2, %v7751_v5  ;;  %v5147_v21 = vrot.slane %v5115_v12, %v5104_v8  ;;  %v5151_v22 = vrot.slane %v5124_v15, %v5110_v10  ;;  %v5155_v23 = vrot.slane %v5115_v12, %v5127_v16  ;;  %v5170_v29 = vsub.s32 2, %v5004_v1  ;;  %s4719_s30 = smov 64  }
  0xa5   : > { %356 = vst.msk [vmem:[#allocation2 + $0x180] sm:$0x1] %vm339_vm2, %v7751_v5  ;;  %357 = vst.msk [vmem:[#allocation2 + $0x11] sm:$0x1] %vm339_vm2, %v7751_v5  ;;  %v5159_v24 = vrot.slane %v5124_v15, %v5104_v8  ;;  %v687_v25 = vrot.slane %v5115_v12, %v5118_v13  ;;  %v436_v26 = vrot.slane %v5013_v4, %v5110_v10  ;;  %vm1847_vm4 = vcmask 261121   ;;  %s4368_s17 = smul.u32 240, %s4979_s26 }
  0xa6   : > { %358 = vst.msk [vmem:[#allocation2 + $0x29] sm:$0x1] %vm339_vm2, %v7751_v5  ;;  %359 = vst.msk [vmem:[#allocation2 + $0x41] sm:$0x1] %vm339_vm2, %v7751_v5  ;;  %v392_v27 = vrot.slane %v5013_v4, %v5121_v14  ;;  %v480_v28 = vrot.slane %v5124_v15, %v5121_v14  ;;  %v5174_v30 = vrot.slane %v5124_v15, %v5127_v16  ;;  %vm1771_vm5 = vcmask 1040384   ;;  %s4369_s10 = smul.u32 3840, %s4779_s25 }
  0xa7   : > { %360 = vst.msk [vmem:[#allocation2 + $0x59] sm:$0x1] %vm339_vm2, %v7751_v5  ;;  %361 = vst.msk [vmem:[#allocation2 + $0x71] sm:$0x1] %vm339_vm2, %v7751_v5  ;;  %475 = vbcast.lane.b32.xlu1 %v469_v6, 264  ;;  %431 = vbcast.lane.b32.xlu0 %v425_v7, 264  ;;  %v610_v31 = vrot.slane %v5107_v9, %v5170_v29  ;;  %v654_v32 = vrot.slane %v5107_v9, %v5127_v16 }
  0xa8   : > { %362 = vst.msk [vmem:[#allocation2 + $0x89] sm:$0x1] %vm339_vm2, %v7751_v5  ;;  %363 = vst.msk [vmem:[#allocation2 + $0xa1] sm:$0x1] %vm339_vm2, %v7751_v5  ;;  %v698_v33 = vrot.slane %v5115_v12, %v5170_v29  ;;  %v447_v34 = vrot.slane %v5013_v4, %v5104_v8  ;;  %v403_v35 = vrot.slane %v5013_v4, %v5118_v13  ;;  %vm1998_vm6 = vcmask 1046528   ;;  %s7604_s0 = scalar_lea.vmem [#allocation12], %s4368_s17  ;;  %s7690_s29 = scalar_lea.hbm %s7743_s6, %s4369_s10 }
  0xa9   : > { %364 = vst.msk [vmem:[#allocation2 + $0xb9] sm:$0x1] %vm339_vm2, %v7751_v5  ;;  %365 = vst.msk [vmem:[#allocation2 + $0xd1] sm:$0x1] %vm339_vm2, %v7751_v5  ;;  %v621_v36 = vrot.slane %v5107_v9, %v5010_v3  ;;  %v665_v37 = vrot.slane %v5107_v9, %v5007_v2  ;;  %v491_v38 = vrot.slane %v5124_v15, %v5118_v13  ;;  %vm1708_vm7 = vcmask 523264   ;;  %s4007_s12 = sshll.u32 %s7604_s0, 4  ;;  %s7692_s12 = int_to_ptr.vmem [resolvable:$true] %s4007_s12 }
  0xaa   : > { %366 = vst.msk [vmem:[#allocation2 + $0xe9] sm:$0x1] %vm339_vm2, %v7751_v5  ;;  %367 = vst.msk [vmem:[#allocation2 + $0x101] sm:$0x1] %vm339_vm2, %v7751_v5  ;;  %v709_v39 = vrot.slane %v5115_v12, %v5010_v3  ;;  %v458_v40 = vrot.slane %v5013_v4, %v5127_v16  ;;  %v414_v41 = vrot.slane %v5013_v4, %v5170_v29  ;;  %vm1725_vm8 = vcmask 253952   ;;  %s3994_s18 = scalar_lea.sflag [#allocation6], %s4979_s26 }
  0xab   : > { %368 = vst.msk [vmem:[#allocation2 + $0x119] sm:$0x1] %vm339_vm2, %v7751_v5  ;;  %369 = vst.msk [vmem:[#allocation2 + $0x131] sm:$0x1] %vm339_vm2, %v7751_v5  ;;  %649 = vbcast.lane.b32.xlu1 %v643_v11, 264  ;;  %645 = vbcast.lane.b32.xlu0 %v643_v11, 256  ;;  %v632_v42 = vrot.slane %v5107_v9, %v5110_v10  ;;  %v676_v43 = vrot.slane %v5115_v12, %v5121_v14 }
  0xac   : > { %370 = vst.msk [vmem:[#allocation2 + $0x149] sm:$0x1] %vm339_vm2, %v7751_v5  ;;  %371 = vst.msk [vmem:[#allocation2 + $0x161] sm:$0x1] %vm339_vm2, %v7751_v5  ;;  %v502_v44 = vrot.slane %v5124_v15, %v5170_v29  ;;  %v5249_v56 = vrot.slane %v780_v53, %v5118_v13  ;;  %v5252_v57 = vrot.slane %v780_v53, %v5121_v14  ;;  %vm1696_vm9 = vcmask 785408   ;;  %s4629_s27 = scalar_lea.vmem %s7692_s12, 3840 }
  0xad   : > { %372 = vst.msk [vmem:[#allocation2 + $0x179] sm:$0x1] %vm339_vm2, %v7751_v5  ;;  %373 = vst.msk [vmem:[#allocation2 + $0x191] sm:$0x1] %vm339_vm2, %v7751_v5  ;;  %v5261_v7 = vrot.slane %v780_v53, %v5170_v29  ;;  %v5266_v14 = vrot.slane %v780_v53, %v5007_v2  ;;  %v5269_v15 = vrot.slane %v780_v53, %v5127_v16  ;;  %v5281_v2 = vld [vmem:[#allocation9 + $0x8] ss:$0 sm:$0xff]  ;;  %p4630_p1 = scmp.ne.s32.totalorder %s7692_s12, %s4629_s27 }
  0xae   : > { %375 = vst.msk [vmem:[#allocation2 + $0x1] sm:$0xff] %vm374_vm0, %v7751_v5  ;;  %376 = vst.msk [vmem:[#allocation2 + $0x9] sm:$0xff] %vm374_vm0, %v7751_v5  ;;  %vm2182_vm10 = vcmask 1041152   ;;  %vm2166_vm11 = vcmask 778752   ;;  %vm2470_vm12 = vcmask 522496   ;;  %vm2500_vm13 = vcmask 516352  }
  0xaf   : > { %377 = vst.msk [vmem:[#allocation2 + $0x19] sm:$0xff] %vm374_vm0, %v7751_v5  ;;  %378 = vst.msk [vmem:[#allocation2 + $0x21] sm:$0xff] %vm374_vm0, %v7751_v5  ;;  %693 = vbcast.lane.b32.xlu1 %v687_v25, 264  ;;  %689 = vbcast.lane.b32.xlu0 %v687_v25, 256  ;;  %vm2136_vm14 = vcmask 784896   ;;  %vm2288_vm15 = vcmask 1048321  }
  0xb0   : > { %381 = vst.msk [vmem:[#allocation2 + $0x169] sm:$0xff] %vm380_vm1, %v7751_v5  ;;  %382 = vst.msk [vmem:[#allocation2 + $0x171] sm:$0xff] %vm380_vm1, %v7751_v5  ;;  %vm2134_vm2 = vcmask 785920   ;;  %p7961_p13 = scmp.ne.s32.totalorder %s7808_s9, 0  ;;  %s4720_s25 = smov [#allocation12]  }
  0xb1   : > { %383 = vst.msk [vmem:[#allocation2 + $0x181] sm:$0xff] %vm380_vm1, %v7751_v5  ;;  %384 = vst.msk [vmem:[#allocation2 + $0x189] sm:$0xff] %vm380_vm1, %v7751_v5  ;;  %s4633_s14 = sshll.u32 %s4720_s25, 4  ;;  %s4634_s14 = int_to_ptr.vmem [resolvable:$false] %s4633_s14 }
  0xb2   : > { %1710 = vst.msk [vmem:[#allocation3 + $0x1f0] sm:$0xff] %vm1706_vm3, %v7751_v5  ;;  %1707 = vst.msk [vmem:[#allocation3 + $0x1e0] sm:$0xff] %vm1706_vm3, %v7751_v5  ;;  %p4631_p6 = pnand %p4630_p1, %p7961_p13  ;;  %p4636_p4 = scmp.lt.s32.totalorder %s7692_s12, %s4634_s14 }
  0xb3   : > { %438 = vbcast.lane.b32.xlu1 %v436_v26, 256  ;;  %394 = vbcast.lane.b32.xlu0 %v392_v27, 256  ;;  %1712 = vst.msk [vmem:[#allocation3 + $0x200] sm:$0xff] %vm1706_vm3, %v7751_v5  ;;  %1714 = vst.msk [vmem:[#allocation3 + $0x210] sm:$0xff] %vm1706_vm3, %v7751_v5 }
  0xb4   : > { %1716 = vst.msk [vmem:[#allocation3 + $0x220] sm:$0xff] %vm1706_vm3, %v7751_v5  ;;  %1718 = vst.msk [vmem:[#allocation3 + $0x230] sm:$0xff] %vm1706_vm3, %v7751_v5  ;;  %p4632_p10 = pneg %p4631_p6 }
  0xb5   : > { %1720 = vst.msk [vmem:[#allocation3 + $0x240] sm:$0xff] %vm1706_vm3, %v7751_v5  ;;  %1722 = vst.msk [vmem:[#allocation3 + $0x250] sm:$0xff] %vm1706_vm3, %v7751_v5 }
  0xb7   : > { %482 = vbcast.lane.b32.xlu1 %v480_v28, 256  ;;  %442 = vbcast.lane.b32.xlu0 %v436_v26, 264 }
  0xbb   : > { %612 = vbcast.lane.b32.xlu1 %v610_v31, 256  ;;  %486 = vbcast.lane.b32.xlu0 %v480_v28, 264 }
  0xbf   : > { %660 = vbcast.lane.b32.xlu1 %v654_v32, 264  ;;  %656 = vbcast.lane.b32.xlu0 %v654_v32, 256 }
  0xc3   : > { %700 = vbcast.lane.b32.xlu1 %v698_v33, 256  ;;  %398 = vbcast.lane.b32.xlu0 %v392_v27, 264 }
  0xc7   : > { %616 = vbcast.lane.b32.xlu1 %v610_v31, 264  ;;  %704 = vbcast.lane.b32.xlu0 %v698_v33, 264 }
  0xcb   : > { %449 = vbcast.lane.b32.xlu1 %v447_v34, 256  ;;  %405 = vbcast.lane.b32.xlu0 %v403_v35, 256 }
  0xcf   : > { %623 = vbcast.lane.b32.xlu1 %v621_v36, 256  ;;  %453 = vbcast.lane.b32.xlu0 %v447_v34, 264 }
  0xd3   : > { %671 = vbcast.lane.b32.xlu1 %v665_v37, 264  ;;  %667 = vbcast.lane.b32.xlu0 %v665_v37, 256 }
  0xd7   : > { %409 = vbcast.lane.b32.xlu1 %v403_v35, 264  ;;  %493 = vbcast.lane.b32.xlu0 %v491_v38, 256 }
  0xdb   : > { %711 = vbcast.lane.b32.xlu1 %v709_v39, 256  ;;  %497 = vbcast.lane.b32.xlu0 %v491_v38, 264 }
  0xdf   : > { %715 = vbcast.lane.b32.xlu1 %v709_v39, 264  ;;  %627 = vbcast.lane.b32.xlu0 %v621_v36, 264 }
  0xe3   : > { %460 = vbcast.lane.b32.xlu1 %v458_v40, 256  ;;  %416 = vbcast.lane.b32.xlu0 %v414_v41, 256 }
  0xe7   : > { %634 = vbcast.lane.b32.xlu1 %v632_v42, 256  ;;  %464 = vbcast.lane.b32.xlu0 %v458_v40, 264 }
  0xeb   : > { %682 = vbcast.lane.b32.xlu1 %v676_v43, 264  ;;  %678 = vbcast.lane.b32.xlu0 %v676_v43, 256 }
  0xef   : > { %420 = vbcast.lane.b32.xlu1 %v414_v41, 264  ;;  %504 = vbcast.lane.b32.xlu0 %v502_v44, 256 }
  0xf3   : > { %638 = vbcast.lane.b32.xlu1 %v632_v42, 264  ;;  %722 = vbcast.lane.b32.xlu0 %v5131_v17, 256 }
  0xf7   : > { %590 = vbcast.lane.b32.xlu1 %v5135_v18, 256  ;;  %508 = vbcast.lane.b32.xlu0 %v502_v44, 264 }
  0xfb   : > { %726 = vbcast.lane.b32.xlu1 %v5131_v17, 264  ;;  %594 = vbcast.lane.b32.xlu0 %v5135_v18, 264 }
  0xff   : > { %605 = vbcast.lane.b32.xlu1 %v5139_v19, 264  ;;  %601 = vbcast.lane.b32.xlu0 %v5139_v19, 256 }
 0x103   : > { %515 = vbcast.lane.b32.xlu0 %v5143_v20, 256  ;;  %733 = vbcast.lane.b32.xlu1 %v5147_v21, 256 }
 0x107   : > { %519 = vbcast.lane.b32.xlu0 %v5143_v20, 264  ;;  %737 = vbcast.lane.b32.xlu1 %v5147_v21, 264  ;;  %v5276_v21 = vrot.slane %v780_v53, %v5010_v3 }
 0x10b   : > { %526 = vbcast.lane.b32.xlu0 %v5151_v22, 256  ;;  %744 = vbcast.lane.b32.xlu1 %v5155_v23, 256 }
 0x10f   : > { %530 = vbcast.lane.b32.xlu0 %v5151_v22, 264  ;;  %748 = vbcast.lane.b32.xlu1 %v5155_v23, 264  ;;  %v5279_v22 = vrot.slane %v780_v53, %v5104_v8 }
 0x113   : > { %537 = vbcast.lane.b32.xlu0 %v5159_v24, 256  ;;  %541 = vbcast.lane.b32.xlu1 %v5159_v24, 264  ;;  %v5287_v24 = vrot.slane %v780_v53, %v5110_v10 }
 0x115   : > { %v472_v45 = vpop.permute.xlu1 %471  ;;  %v428_v46 = vpop.permute.xlu0 %427 }
 0x116   : > { %569 = vst.msk [vmem:[#allocation2 + $0xd9] sm:$0xff] %vm374_vm0, %v472_v45  ;;  %561 = vst.msk [vmem:[#allocation2 + $0x79] sm:$0xff] %vm374_vm0, %v428_v46 }
 0x117   : > { %552 = vbcast.lane.b32.xlu1 %v5174_v30, 264  ;;  %548 = vbcast.lane.b32.xlu0 %v5174_v30, 256 }
 0x119   : > { %v476_v47 = vpop.permute.xlu1 %475  ;;  %v432_v48 = vpop.permute.xlu0 %431 }
 0x11a   : > { %570 = vst.msk [vmem:[#allocation2 + $0xe1] sm:$0xff] %vm374_vm0, %v476_v47  ;;  %562 = vst.msk [vmem:[#allocation2 + $0x81] sm:$0xff] %vm374_vm0, %v432_v48 }
 0x11d   : > { %v650_v49 = vpop.permute.xlu1 %649  ;;  %v646_v50 = vpop.permute.xlu0 %645 }
 0x11e   : > { %761 = vst.msk [vmem:[#allocation2 + $0x81] sm:$0xff] %vm380_vm1, %v650_v49  ;;  %760 = vst.msk [vmem:[#allocation2 + $0x79] sm:$0xff] %vm380_vm1, %v646_v50 }
 0x121   : > { %v694_v51 = vpop.permute.xlu1 %693  ;;  %v690_v52 = vpop.permute.xlu0 %689 }
 0x122   : > { %769 = vst.msk [vmem:[#allocation2 + $0xe1] sm:$0xff] %vm380_vm1, %v694_v51  ;;  %768 = vst.msk [vmem:[#allocation2 + $0xd9] sm:$0xff] %vm380_vm1, %v690_v52 }
 0x125   : > { %v439_v54 = vpop.permute.xlu1 %438  ;;  %v395_v55 = vpop.permute.xlu0 %394  ;;  %v793_v60 = vld [vmem:[#allocation2 + $0x80] sm:$0xff]  ;;  %v792_v62 = vld [vmem:[#allocation2 + $0x78] sm:$0xff] }
 0x126   : > { %563 = vst.msk [vmem:[#allocation2 + $0x91] sm:$0xff] %vm374_vm0, %v439_v54  ;;  %555 = vst.msk [vmem:[#allocation2 + $0x31] sm:$0xff] %vm374_vm0, %v395_v55  ;;  %v887_v61 = vld [vmem:[#allocation2 + $0x81] sm:$0xff]  ;;  %v886_v63 = vld [vmem:[#allocation2 + $0x79] sm:$0xff]  ;;  %v827_v0 = vmul.f32 %v5252_v57, %v793_v60  ;;  %v826_v17 = vmul.f32 %v5252_v57, %v792_v62  ;;  %v5297_v33 = vmul.f32 %v5269_v15, %v792_v62 }
 0x127   : > { %v921_v1 = vmul.f32 %v5249_v56, %v887_v61  ;;  %v920_v18 = vmul.f32 %v5249_v56, %v886_v63  ;;  %v980_v19 = vld [vmem:[#allocation2 + $0x7a] sm:$0xff]  ;;  %v981_v20 = vld [vmem:[#allocation2 + $0x82] sm:$0xff]  ;;  %v5300_v10 = vmul.f32 %v5266_v14, %v886_v63  ;;  %v5308_v37 = vmul.f32 %v5269_v15, %v793_v60 }
 0x128   : > { %v1073_v27 = vld [vmem:[#allocation2 + $0x78] sm:$0xff]  ;;  %v5293_v8 = vmul.f32 %v5261_v7, %v980_v19  ;;  %v1015_v31 = vmul.f32 %v5261_v7, %v981_v20  ;;  %v5305_v35 = vmul.f32 %v5281_v2, %v980_v19  ;;  %v5311_v38 = vmul.f32 %v5266_v14, %v887_v61  ;;  %v1074_v49 = vld [vmem:[#allocation2 + $0x80] sm:$0xff] }
 0x129   : > { %v483_v58 = vpop.permute.xlu1 %482  ;;  %v443_v59 = vpop.permute.xlu0 %442  ;;  %v801_v4 = vld [vmem:[#allocation2 + $0xe0] sm:$0xff]  ;;  %v1361_v12 = vld [vmem:[#allocation2 + $0xd8] sm:$0xff]  ;;  %v951_v25 = vadd.f32 %v921_v1, %v827_v0  ;;  %v950_v34 = vadd.f32 %v920_v18, %v826_v17  ;;  %v5314_v40 = vmul.f32 %v5281_v2, %v981_v20  ;;  %v5317_v41 = vmul.f32 %v5276_v21, %v1073_v27 }
 0x12a   : > { %571 = vst.msk [vmem:[#allocation2 + $0xf1] sm:$0xff] %vm374_vm0, %v483_v58  ;;  %564 = vst.msk [vmem:[#allocation2 + $0x99] sm:$0xff] %vm374_vm0, %v443_v59  ;;  %v5258_v6 = vld [vmem:[#allocation2 + $0xe1] sm:$0xff]  ;;  %v5263_v13 = vld [vmem:[#allocation2 + $0xd9] sm:$0xff]  ;;  %v835_v16 = vmul.f32 %v5252_v57, %v801_v4  ;;  %v834_v26 = vmul.f32 %v1361_v12, %v5252_v57  ;;  %v5324_v47 = vmul.f32 %v5269_v15, %v801_v4 }
 0x12b   : > { %v929_v23 = vmul.f32 %v5249_v56, %v5258_v6  ;;  %v928_v3 = vmul.f32 %v5263_v13, %v5249_v56  ;;  %v1167_v28 = vld [vmem:[#allocation2 + $0x79] sm:$0xff]  ;;  %v989_v32 = vld [vmem:[#allocation2 + $0xe2] sm:$0xff]  ;;  %v1045_v44 = vadd.f32 %v1015_v31, %v951_v25  ;;  %v5327_v52 = vmul.f32 %v5269_v15, %v1361_v12 }
 0x12c   : > { %v1549_v36 = vld [vmem:[#allocation2 + $0xda] sm:$0xff]  ;;  %v5320_v42 = vmul.f32 %v5287_v24, %v1167_v28  ;;  %v1023_v45 = vmul.f32 %v5261_v7, %v989_v32  ;;  %v5331_v53 = vmul.f32 %v5266_v14, %v5263_v13  ;;  %v1270_v59 = vld [vmem:[#allocation2 + $0xe2] sm:$0xff]  ;;  %v5341_v63 = vmul.f32 %v5266_v14, %v5258_v6 }
 0x12d   : > { %v613_v9 = vpop.permute.xlu1 %612  ;;  %v487_v11 = vpop.permute.xlu0 %486  ;;  %v959_v39 = vadd.f32 %v929_v23, %v835_v16  ;;  %v1261_v43 = vld [vmem:[#allocation2 + $0x7a] sm:$0xff]  ;;  %v958_v46 = vadd.f32 %v928_v3, %v834_v26  ;;  %v5334_v54 = vmul.f32 %v5281_v2, %v1549_v36  ;;  %v1022_v55 = vmul.f32 %v1549_v36, %v5261_v7 }
 0x12e   : > { %754 = vst.msk [vmem:[#allocation2 + $0x31] sm:$0xff] %vm380_vm1, %v613_v9  ;;  %7818 = vst [vmem:[#allocation18_spill] sm:$0xff] %v5320_v42  ;;  %v1082_v48 = vld [vmem:[#allocation2 + $0xe0] sm:$0xff]  ;;  %v5344_v0 = vmul.f32 %v5281_v2, %v989_v32  ;;  %v5347_v1 = vmul.f32 %v5279_v22, %v1261_v43  ;;  %v5350_v4 = vmul.f32 %v1361_v12, %v5276_v21 }
 0x12f   : > { %572 = vst.msk [vmem:[#allocation2 + $0xf9] sm:$0xff] %vm374_vm0, %v487_v11  ;;  %v1176_v58 = vld [vmem:[#allocation2 + $0xe1] sm:$0xff]  ;;  %v5352_v11 = vadd.f32 %v1023_v45, %v959_v39  ;;  %v5356_v17 = vmul.f32 %v5263_v13, %v5287_v24  ;;  %v5359_v18 = vmul.f32 %v1549_v36, %v5279_v22  ;;  %v5362_v6 = vmul.f32 %v5276_v21, %v1082_v48 }
 0x130   : > { %v1168_v60 = vld [vmem:[#allocation2 + $0x81] sm:$0xff]  ;;  %7819 = vst [vmem:[#allocation19_spill] sm:$0xff] %v5347_v1  ;;  %7820 = vst [vmem:[#allocation20_spill] sm:$0xff] %v5350_v4  ;;  %v5364_v19 = vadd.f32 %v1022_v55, %v958_v46  ;;  %v5367_v20 = vmul.f32 %v5287_v24, %v1176_v58  ;;  %v5370_v12 = vmul.f32 %v5279_v22, %v1270_v59 }
 0x131   : > { %v661_v29 = vpop.permute.xlu1 %660  ;;  %v657_v30 = vpop.permute.xlu0 %656  ;;  %v1262_v9 = vld [vmem:[#allocation2 + $0x82] sm:$0xff]  ;;  %7821 = vst [vmem:[#allocation21_spill] sm:$0xff] %v5356_v17  ;;  %7822 = vst [vmem:[#allocation22_spill] sm:$0xff] %v5359_v18  ;;  %v5373_v16 = vmul.f32 %v5276_v21, %v1074_v49  ;;  %v5392_v48 = vadd.f32 %v5293_v8, %v950_v34 }
 0x132   : > { %763 = vst.msk [vmem:[#allocation2 + $0x99] sm:$0xff] %vm380_vm1, %v661_v29  ;;  %762 = vst.msk [vmem:[#allocation2 + $0x91] sm:$0xff] %vm380_vm1, %v657_v30  ;;  %v5380_v30 = vmul.f32 %v5287_v24, %v1168_v60  ;;  %v5383_v31 = vmul.f32 %v5279_v22, %v1262_v9 }
 0x133   : > { %7823 = vst [vmem:[#allocation23_spill] sm:$0xff] %v5362_v6  ;;  %7824 = vst [vmem:[#allocation24_spill] sm:$0xff] %v5367_v20 }
 0x134   : > { %7825 = vst [vmem:[#allocation25_spill] sm:$0xff] %v5370_v12  ;;  %7826 = vst [vmem:[#allocation26_spill] sm:$0xff] %v5373_v16 }
 0x135   : > { %v701_v50 = vpop.permute.xlu1 %700  ;;  %v399_v51 = vpop.permute.xlu0 %398  ;;  %v786_v61 = vld [vmem:[#allocation2 + $0x30] sm:$0xff]  ;;  %7827 = vst [vmem:[#allocation27_spill] sm:$0xff] %v5380_v30  ;;  %7828 = vst [vmem:[#allocation28_spill] sm:$0xff] %v5383_v31 }
 0x136   : > { %770 = vst.msk [vmem:[#allocation2 + $0xf1] sm:$0xff] %vm380_vm1, %v701_v50  ;;  %v880_v62 = vld [vmem:[#allocation2 + $0x31] sm:$0xff]  ;;  %v820_v28 = vmul.f32 %v5252_v57, %v786_v61 }
 0x137   : > { %556 = vst.msk [vmem:[#allocation2 + $0x39] sm:$0xff] %vm374_vm0, %v399_v51  ;;  %v1067_v23 = vld [vmem:[#allocation2 + $0x30] sm:$0xff]  ;;  %v914_v29 = vmul.f32 %v5249_v56, %v880_v62  ;;  %v5396_v51 = vmul.f32 %v5269_v15, %v786_v61  ;;  %v5399_v55 = vmul.f32 %v5266_v14, %v880_v62 }
 0x138   : > { %v1161_v46 = vld [vmem:[#allocation2 + $0x31] sm:$0xff]  ;;  %v5402_v58 = vmul.f32 %v5276_v21, %v1067_v23 }
 0x139   : > { %v1075_v13 = vld [vmem:[#allocation2 + $0x90] sm:$0xff]  ;;  %v617_v26 = vpop.permute.xlu1 %616  ;;  %v705_v3 = vpop.permute.xlu0 %704  ;;  %v1076_v27 = vld [vmem:[#allocation2 + $0x98] sm:$0xff]  ;;  %7829 = vst [vmem:[#allocation29_spill] sm:$0xff] %v5396_v51  ;;  %7830 = vst [vmem:[#allocation30_spill] sm:$0xff] %v5399_v55  ;;  %v944_v62 = vadd.f32 %v914_v29, %v820_v28 }
 0x13a   : > { %v5375_v25 = vld [vmem:[#allocation2 + $0x91] sm:$0xff]  ;;  %755 = vst.msk [vmem:[#allocation2 + $0x39] sm:$0xff] %vm380_vm1, %v617_v26  ;;  %771 = vst.msk [vmem:[#allocation2 + $0xf9] sm:$0xff] %vm380_vm1, %v705_v3  ;;  %v1110_v32 = vmul.f32 %v5276_v21, %v1076_v27  ;;  %v1170_v36 = vld [vmem:[#allocation2 + $0x99] sm:$0xff]  ;;  %v828_v43 = vmul.f32 %v1075_v13, %v5252_v57  ;;  %v829_v9 = vmul.f32 %v1076_v27, %v5252_v57 }
 0x13b   : > { %v1264_v39 = vld [vmem:[#allocation2 + $0x9a] sm:$0xff]  ;;  %v922_v45 = vmul.f32 %v5375_v25, %v5249_v56  ;;  %v1204_v49 = vmul.f32 %v5287_v24, %v1170_v36  ;;  %v982_v50 = vld [vmem:[#allocation2 + $0x92] sm:$0xff]  ;;  %7831 = vst [vmem:[#allocation31_spill] sm:$0xff] %v5402_v58  ;;  %v923_v26 = vmul.f32 %v1170_v36, %v5249_v56  ;;  %v5407_v3 = vmul.f32 %v5276_v21, %v1075_v13 }
 0x13c   : > { %v1140_v59 = vadd.f32 %v1110_v32, %v1045_v44  ;;  %v1355_v8 = vld [vmem:[#allocation2 + $0x90] sm:$0xff]  ;;  %v1298_v31 = vmul.f32 %v5279_v22, %v1264_v39  ;;  %v1356_v23 = vld [vmem:[#allocation2 + $0x98] sm:$0xff]  ;;  %v5411_v44 = vmul.f32 %v5287_v24, %v1161_v46  ;;  %v1016_v32 = vmul.f32 %v5261_v7, %v982_v50 }
 0x13d   : > { %v952_v60 = vadd.f32 %v922_v45, %v828_v43  ;;  %v1449_v34 = vld [vmem:[#allocation2 + $0x91] sm:$0xff]  ;;  %v450_v5 = vpop.permute.xlu1 %449  ;;  %v406_v61 = vpop.permute.xlu0 %405  ;;  %v1017_v43 = vmul.f32 %v1264_v39, %v5261_v7  ;;  %v5421_v29 = vmul.f32 %v5269_v15, %v1355_v8  ;;  %v953_v46 = vadd.f32 %v923_v26, %v829_v9  ;;  %v1450_v6 = vld [vmem:[#allocation2 + $0x99] sm:$0xff] }
 0x13e   : > { %v802_v30 = vld [vmem:[#allocation2 + $0xf0] sm:$0xff]  ;;  %7832 = vst [vmem:[#allocation32_spill] sm:$0xff] %v5411_v44  ;;  %565 = vst.msk [vmem:[#allocation2 + $0xa9] sm:$0xff] %vm374_vm0, %v450_v5  ;;  %v1234_v27 = vadd.f32 %v1204_v49, %v1140_v59  ;;  %v5424_v45 = vmul.f32 %v5266_v14, %v1449_v34  ;;  %v5429_v49 = vmul.f32 %v5281_v2, %v982_v50 }
 0x13f   : > { %v896_v16 = vld [vmem:[#allocation2 + $0xf1] sm:$0xff]  ;;  %557 = vst.msk [vmem:[#allocation2 + $0x49] sm:$0xff] %vm374_vm0, %v406_v61  ;;  %v836_v13 = vmul.f32 %v5252_v57, %v802_v30  ;;  %v1117_v28 = vmul.f32 %v5276_v21, %v802_v30  ;;  %7833 = vst [vmem:[#allocation33_spill] sm:$0xff] %v5421_v29  ;;  %v5426_v5 = vadd.f32 %v1016_v32, %v952_v60 }
 0x140   : > { %v930_v36 = vmul.f32 %v5249_v56, %v896_v16  ;;  %7834 = vst [vmem:[#allocation34_spill] sm:$0xff] %v5424_v45  ;;  %7835 = vst [vmem:[#allocation35_spill] sm:$0xff] %v5429_v49  ;;  %v5432_v59 = vmul.f32 %v5269_v15, %v1356_v23  ;;  %v5434_v39 = vadd.f32 %v1298_v31, %v1234_v27 }
 0x141   : > { %v624_v61 = vpop.permute.xlu1 %623  ;;  %v454_v44 = vpop.permute.xlu0 %453  ;;  %v1084_v58 = vld [vmem:[#allocation2 + $0xf8] sm:$0xff]  ;;  %v1147_v20 = vadd.f32 %v1117_v28, %v5364_v19  ;;  %v1211_v34 = vmul.f32 %v5287_v24, %v896_v16  ;;  %v5439_v60 = vmul.f32 %v5269_v15, %v802_v30  ;;  %v5464_v1 = vadd.f32 %v1017_v43, %v953_v46 }
 0x142   : > { %7836 = vst [vmem:[#allocation36_spill] sm:$0xff] %v5432_v59  ;;  %v1178_v12 = vld [vmem:[#allocation2 + $0xf9] sm:$0xff]  ;;  %756 = vst.msk [vmem:[#allocation2 + $0x49] sm:$0xff] %vm380_vm1, %v624_v61  ;;  %v1118_v50 = vmul.f32 %v5276_v21, %v1084_v58  ;;  %v960_v27 = vadd.f32 %v930_v36, %v836_v13  ;;  %v837_v32 = vmul.f32 %v1084_v58, %v5252_v57 }
 0x143   : > { %v1272_v8 = vld [vmem:[#allocation2 + $0xfa] sm:$0xff]  ;;  %7837 = vst [vmem:[#allocation37_spill] sm:$0xff] %v5439_v60  ;;  %566 = vst.msk [vmem:[#allocation2 + $0xb1] sm:$0xff] %vm374_vm0, %v454_v44  ;;  %v1212_v9 = vmul.f32 %v5287_v24, %v1178_v12  ;;  %v974_v31 = vld [vmem:[#allocation2 + $0x32] sm:$0xff]  ;;  %v931_v44 = vmul.f32 %v1178_v12, %v5249_v56  ;;  %v5454_v13 = vmul.f32 %v5266_v14, %v896_v16 }
 0x144   : > { %v787_v26 = vld [vmem:[#allocation2 + $0x38] sm:$0xff]  ;;  %v1008_v19 = vmul.f32 %v5261_v7, %v974_v31  ;;  %v1148_v60 = vadd.f32 %v1118_v50, %v5352_v11  ;;  %v1025_v17 = vmul.f32 %v1272_v8, %v5261_v7  ;;  %v1306_v4 = vmul.f32 %v5279_v22, %v1272_v8 }
 0x145   : > { %v881_v23 = vld [vmem:[#allocation2 + $0x39] sm:$0xff]  ;;  %v821_v28 = vmul.f32 %v5252_v57, %v787_v26  ;;  %7838 = vst [vmem:[#allocation38_spill] sm:$0xff] %v5454_v13  ;;  %v672_v36 = vpop.permute.xlu1 %671  ;;  %v668_v49 = vpop.permute.xlu0 %667  ;;  %v961_v29 = vadd.f32 %v931_v44, %v837_v32  ;;  %v1241_v55 = vadd.f32 %v1211_v34, %v1147_v20  ;;  %v5462_v16 = vmul.f32 %v5266_v14, %v1450_v6 }
 0x146   : > { %v915_v30 = vmul.f32 %v5249_v56, %v881_v23  ;;  %v975_v59 = vld [vmem:[#allocation2 + $0x3a] sm:$0xff]  ;;  %v990_v61 = vld [vmem:[#allocation2 + $0xf2] sm:$0xff]  ;;  %765 = vst.msk [vmem:[#allocation2 + $0xb1] sm:$0xff] %vm380_vm1, %v672_v36  ;;  %764 = vst.msk [vmem:[#allocation2 + $0xa9] sm:$0xff] %vm380_vm1, %v668_v49  ;;  %v1242_v11 = vadd.f32 %v1212_v9, %v1148_v60  ;;  %v1038_v13 = vadd.f32 %v1008_v19, %v944_v62 }
 0x147   : > { %v1024_v18 = vmul.f32 %v5261_v7, %v990_v61  ;;  %v1544_v58 = vld [vmem:[#allocation2 + $0x9a] sm:$0xff]  ;;  %v1009_v12 = vmul.f32 %v5261_v7, %v975_v59  ;;  %v1305_v50 = vmul.f32 %v5279_v22, %v990_v61  ;;  %7839 = vst [vmem:[#allocation39_spill] sm:$0xff] %v5462_v16  ;;  %v5471_v20 = vmul.f32 %v5287_v24, %v5375_v25  ;;  %v1255_v46 = vld [vmem:[#allocation2 + $0x32] sm:$0xff] }
 0x148   : > { %v945_v45 = vadd.f32 %v915_v30, %v821_v28  ;;  %v1364_v51 = vld [vmem:[#allocation2 + $0xf8] sm:$0xff]  ;;  %v5467_v8 = vmul.f32 %v5281_v2, %v1544_v58  ;;  %v5477_v60 = vadd.f32 %v1025_v17, %v961_v29  ;;  %v5480_v6 = vmul.f32 %v5281_v2, %v974_v31 }
 0x149   : > { %v5475_v34 = vadd.f32 %v1024_v18, %v960_v27  ;;  %v1458_v62 = vld [vmem:[#allocation2 + $0xf9] sm:$0xff]  ;;  %v410_v9 = vpop.permute.xlu1 %409  ;;  %v494_v32 = vpop.permute.xlu0 %493  ;;  %v5482_v19 = vadd.f32 %v1306_v4, %v1242_v11  ;;  %v1069_v28 = vld [vmem:[#allocation2 + $0x48] sm:$0xff]  ;;  %v5484_v25 = vadd.f32 %v1305_v50, %v1241_v55  ;;  %v5490_v17 = vmul.f32 %v5266_v14, %v881_v23 }
 0x14a   : > { %7840 = vst [vmem:[#allocation40_spill] sm:$0xff] %v5467_v8  ;;  %v5473_v49 = vadd.f32 %v1009_v12, %v945_v45  ;;  %7841 = vst [vmem:[#allocation41_spill] sm:$0xff] %v5480_v6  ;;  %v1552_v43 = vld [vmem:[#allocation2 + $0xfa] sm:$0xff]  ;;  %v1163_v30 = vld [vmem:[#allocation2 + $0x49] sm:$0xff]  ;;  %v5487_v45 = vmul.f32 %v5269_v15, %v787_v26  ;;  %v1103_v29 = vmul.f32 %v5276_v21, %v1069_v28 }
 0x14b   : > { %7843 = vst [vmem:[#allocation43_spill] sm:$0xff] %v5490_v17  ;;  %v1349_v18 = vld [vmem:[#allocation2 + $0x48] sm:$0xff]  ;;  %558 = vst.msk [vmem:[#allocation2 + $0x51] sm:$0xff] %vm374_vm0, %v410_v9  ;;  %v822_v4 = vmul.f32 %v1069_v28, %v5252_v57  ;;  %v916_v31 = vmul.f32 %v1163_v30, %v5249_v56  ;;  %v5498_v55 = vmul.f32 %v5281_v2, %v975_v59  ;;  %v1263_v26 = vld [vmem:[#allocation2 + $0x92] sm:$0xff] }
 0x14c   : > { %7842 = vst [vmem:[#allocation42_spill] sm:$0xff] %v5487_v45  ;;  %573 = vst.msk [vmem:[#allocation2 + $0x109] sm:$0xff] %vm374_vm0, %v494_v32  ;;  %v1443_v27 = vld [vmem:[#allocation2 + $0x49] sm:$0xff]  ;;  %v5501_v44 = vmul.f32 %v5281_v2, %v990_v61  ;;  %v5504_v23 = vmul.f32 %v5269_v15, %v1364_v51  ;;  %v5507_v58 = vmul.f32 %v5266_v14, %v1458_v62  ;;  %v1068_v11 = vld [vmem:[#allocation2 + $0x38] sm:$0xff] }
 0x14d   : > { %7844 = vst [vmem:[#allocation44_spill] sm:$0xff] %v5498_v55  ;;  %v5510_v36 = vmul.f32 %v5281_v2, %v1552_v43  ;;  %v1162_v12 = vld [vmem:[#allocation2 + $0x39] sm:$0xff]  ;;  %v1133_v9 = vadd.f32 %v1103_v29, %v1038_v13  ;;  %v1197_v59 = vmul.f32 %v5287_v24, %v1163_v30  ;;  %v5514_v32 = vmul.f32 %v5279_v22, %v1255_v46  ;;  %v712_v51 = vpop.permute.xlu1 %711  ;;  %v498_v28 = vpop.permute.xlu0 %497  ;;  %v1358_v8 = vld [vmem:[#allocation2 + $0xb0] sm:$0xff] }
 0x14e   : > { %7845 = vst [vmem:[#allocation45_spill] sm:$0xff] %v5501_v44  ;;  %7846 = vst [vmem:[#allocation46_spill] sm:$0xff] %v5504_v23  ;;  %v1256_v50 = vld [vmem:[#allocation2 + $0x3a] sm:$0xff]  ;;  %v5517_v61 = vmul.f32 %v5269_v15, %v1349_v18  ;;  %v1452_v62 = vld [vmem:[#allocation2 + $0xb1] sm:$0xff]  ;;  %v5522_v43 = vmul.f32 %v5266_v14, %v1443_v27  ;;  %v5525_v13 = vmul.f32 %v5279_v22, %v1263_v26 }
 0x14f   : > { %7847 = vst [vmem:[#allocation47_spill] sm:$0xff] %v5507_v58  ;;  %7848 = vst [vmem:[#allocation48_spill] sm:$0xff] %v5510_v36  ;;  %v1546_v16 = vld [vmem:[#allocation2 + $0xb2] sm:$0xff]  ;;  %v5519_v58 = vadd.f32 %v916_v31, %v822_v4  ;;  %v1139_v46 = vadd.f32 %v5407_v3, %v5392_v48  ;;  %v1392_v30 = vmul.f32 %v5269_v15, %v1358_v8  ;;  %v1077_v18 = vld [vmem:[#allocation2 + $0xa8] sm:$0xff] }
 0x150   : > { %7849 = vst [vmem:[#allocation49_spill] sm:$0xff] %v5514_v32  ;;  %7850 = vst [vmem:[#allocation50_spill] sm:$0xff] %v5517_v61  ;;  %v1171_v29 = vld [vmem:[#allocation2 + $0xa9] sm:$0xff]  ;;  %v5533_v4 = vmul.f32 %v5276_v21, %v1068_v11  ;;  %v5536_v31 = vmul.f32 %v5287_v24, %v1162_v12  ;;  %v5539_v27 = vmul.f32 %v5279_v22, %v1256_v50 }
 0x151   : > { %7851 = vst [vmem:[#allocation51_spill] sm:$0xff] %v5522_v43  ;;  %7852 = vst [vmem:[#allocation52_spill] sm:$0xff] %v5525_v13  ;;  %v1486_v26 = vmul.f32 %v5266_v14, %v1452_v62  ;;  %v1111_v48 = vmul.f32 %v5276_v21, %v1077_v18  ;;  %v1205_v3 = vmul.f32 %v5287_v24, %v1171_v29  ;;  %v628_v50 = vpop.permute.xlu0 %627  ;;  %v1545_v23 = vld [vmem:[#allocation2 + $0xaa] sm:$0xff] }
 0x152   : > { %772 = vst.msk [vmem:[#allocation2 + $0x109] sm:$0xff] %vm380_vm1, %v712_v51  ;;  %7853 = vst [vmem:[#allocation53_spill] sm:$0xff] %v5533_v4  ;;  %v1265_v51 = vld [vmem:[#allocation2 + $0xaa] sm:$0xff]  ;;  %v1422_v43 = vadd.f32 %v1392_v30, %v5434_v39  ;;  %v1580_v11 = vmul.f32 %v5281_v2, %v1546_v16  ;;  %v5547_v61 = vadd.f32 %v1197_v59, %v1133_v9 }
 0x153   : > { %574 = vst.msk [vmem:[#allocation2 + $0x111] sm:$0xff] %vm374_vm0, %v498_v28  ;;  %7854 = vst [vmem:[#allocation54_spill] sm:$0xff] %v5536_v31  ;;  %v1112_v28 = vmul.f32 %v1358_v8, %v5276_v21  ;;  %v830_v12 = vmul.f32 %v1077_v18, %v5252_v57  ;;  %v716_v31 = vpop.permute.xlu1 %715  ;;  %v1206_v4 = vmul.f32 %v1452_v62, %v5287_v24  ;;  %v1451_v18 = vld [vmem:[#allocation2 + $0xa9] sm:$0xff] }
 0x154   : > { %7855 = vst [vmem:[#allocation55_spill] sm:$0xff] %v5539_v27  ;;  %v1141_v27 = vadd.f32 %v1111_v48, %v5426_v5  ;;  %v924_v36 = vmul.f32 %v1171_v29, %v5249_v56  ;;  %773 = vst.msk [vmem:[#allocation2 + $0x111] sm:$0xff] %vm380_vm1, %v716_v31  ;;  %v1516_v39 = vadd.f32 %v1486_v26, %v1422_v43 }
 0x155   : > { %v1142_v32 = vadd.f32 %v1112_v28, %v5464_v1  ;;  %757 = vst.msk [vmem:[#allocation2 + $0x51] sm:$0xff] %vm380_vm1, %v628_v50  ;;  %v1299_v9 = vmul.f32 %v5279_v22, %v1265_v51  ;;  %v831_v59 = vmul.f32 %v1358_v8, %v5252_v57  ;;  %v925_v30 = vmul.f32 %v1452_v62, %v5249_v56  ;;  %v5562_v1 = vld [vmem:[%s7740_s3] ss:$0 sm:$0xff]  ;;  %v1357_v62 = vld [vmem:[#allocation2 + $0xa8] sm:$0xff]  ;;  %v417_v44 = vpop.permute.xlu0 %416 }
 0x156   : > { %v1235_v5 = vadd.f32 %v1205_v3, %v1141_v27  ;;  %v1300_v31 = vmul.f32 %v1546_v16, %v5279_v22  ;;  %v954_v48 = vadd.f32 %v924_v36, %v830_v12  ;;  %v1610_v28 = vadd.f32 %v1580_v11, %v1516_v39  ;;  %559 = vst.msk [vmem:[#allocation2 + $0x61] sm:$0xff] %vm374_vm0, %v417_v44  ;;  %v2662_v3 = vld [vmem:[#allocation10 + $0xc0] sm:$0xff]  ;;  %v2664_v44 = vld [vmem:[#allocation10 + $0xd0] sm:$0xff] }
 0x157   : > { %v1236_v29 = vadd.f32 %v1206_v4, %v1142_v32  ;;  %v1018_v43 = vmul.f32 %v1265_v51, %v5261_v7  ;;  %v1019_v26 = vmul.f32 %v1546_v16, %v5261_v7  ;;  %v5568_v8 = vadd.f32 %v5471_v20, %v1139_v46  ;;  %v461_v50 = vpop.permute.xlu1 %460  ;;  %v2663_v51 = vld [vmem:[#allocation10 + $0xc8] sm:$0xff] }
 0x158   : > { %v5570_v55 = vadd.f32 %v1299_v9, %v1235_v5  ;;  %v955_v27 = vadd.f32 %v925_v30, %v831_v59  ;;  %v5573_v32 = vmul.f32 %v5266_v14, %v1451_v18  ;;  %v5576_v36 = vmul.f32 %v5281_v2, %v1545_v23  ;;  %567 = vst.msk [vmem:[#allocation2 + $0xc1] sm:$0xff] %vm374_vm0, %v461_v50  ;;  %v2665_v9 = vld [vmem:[#allocation10 + $0xd8] sm:$0xff] }
 0x159   : > { %7856 = vst [vmem:[#allocation56_spill] sm:$0xff] %v5568_v8  ;;  %v1085_v17 = vld [vmem:[#allocation2 + $0x108] sm:$0xff]  ;;  %v1647_v16 = vadd.f32 %v5562_v1, %v1610_v28  ;;  %v5582_v46 = vadd.f32 %v1300_v31, %v1236_v29  ;;  %v5585_v11 = vadd.f32 %v1018_v43, %v954_v48  ;;  %v5590_v39 = vmul.f32 %v5269_v15, %v1357_v62  ;;  %v465_v29 = vpop.permute.xlu0 %464 }
 0x15a   : > { %v1179_v45 = vld [vmem:[#allocation2 + $0x109] sm:$0xff]  ;;  %7857 = vst [vmem:[#allocation57_spill] sm:$0xff] %v5573_v32  ;;  %7858 = vst [vmem:[#allocation58_spill] sm:$0xff] %v5576_v36  ;;  %v1119_v20 = vmul.f32 %v5276_v21, %v1085_v17  ;;  %v838_v4 = vmul.f32 %v1085_v17, %v5252_v57  ;;  %v1399_v23 = vmul.f32 %v5269_v15, %v1085_v17  ;;  %v7753_v50 = vmov 0.0|0.0  }
 0x15b   : > { %v932_v12 = vmul.f32 %v1179_v45, %v5249_v56  ;;  %7859 = vst [vmem:[#allocation59_spill] sm:$0xff] %v5590_v39  ;;  %v5592_v59 = vmax.f32 %v1647_v16, 0.0  ;;  %v1213_v18 = vmul.f32 %v5287_v24, %v1179_v45  ;;  %v635_v5 = vpop.permute.xlu1 %634  ;;  %v5596_v31 = vld [vmem:[#allocation2 + $0x110] sm:$0xff]  ;;  %v1493_v43 = vmul.f32 %v5266_v14, %v1179_v45  ;;  %4236 = vmatprep.subr.bf16.mxu0 %v7753_v50 }
 0x15c   : > { %v1149_v30 = vadd.f32 %v1119_v20, %v5475_v34  ;;  %v5598_v48 = vld [vmem:[#allocation2 + $0x111] sm:$0xff]  ;;  %v5605_v62 = vadd.f32 %v1019_v26, %v955_v27  ;;  %v4237_v34 = vpack.c.bf16 %v2663_v51, %v2662_v3  ;;  %758 = vst.msk [vmem:[#allocation2 + $0x61] sm:$0xff] %vm380_vm1, %v635_v5  ;;  %v1400_v16 = vmul.f32 %v5269_v15, %v5596_v31 }
 0x15d   : > { %7860 = vst [vmem:[#allocation60_spill] sm:$0xff] %v5592_v59  ;;  %v5600_v28 = vld [vmem:[#allocation2 + $0x112] sm:$0xff]  ;;  %v5602_v17 = vadd.f32 %v932_v12, %v838_v4  ;;  %568 = vst.msk [vmem:[#allocation2 + $0xc9] sm:$0xff] %vm374_vm0, %v465_v29  ;;  %1900 = vrot.lane.b32.xlu0 %v5592_v59, %s4717_s15  ;;  %v1494_v45 = vmul.f32 %v5266_v14, %v5598_v48  ;;  %v1257_v26 = vld [vmem:[#allocation2 + $0x4a] sm:$0xff]  ;;  %v1429_v4 = vadd.f32 %v1399_v23, %v5484_v25  ;;  %v7861_v8 = vmov 0.0|0.0   ;;  %v679_v23 = vpop.permute.xlu0 %678 }
 0x15e   : > { %v1070_v27 = vld [vmem:[#allocation2 + $0x50] sm:$0xff]  ;;  %v4240_v3 = vpack.c.bf16 %v2665_v9, %v2664_v44  ;;  %v1588_v51 = vmul.f32 %v5281_v2, %v5600_v28  ;;  %v1291_v12 = vmul.f32 %v5279_v22, %v1257_v26  ;;  %4238 = vmatpush1.bf16.msra.mxu0 %v4237_v34  ;;  %v1430_v32 = vadd.f32 %v1400_v16, %v5482_v19 }
 0x15f   : > { %v1164_v20 = vld [vmem:[#allocation2 + $0x51] sm:$0xff]  ;;  %v1104_v5 = vmul.f32 %v5276_v21, %v1070_v27  ;;  %v1243_v39 = vadd.f32 %v1213_v18, %v1149_v30  ;;  %v1010_v13 = vmul.f32 %v1257_v26, %v5261_v7  ;;  %4239 = vmatprep.subr.bf16.mxu0 %v7861_v8  ;;  %4344 = vmatprep.subr.bf16.mxu1 %v7861_v8  ;;  %v683_v25 = vpop.permute.xlu1 %682  ;;  %v5635_v18 = vrot.slane %v5592_v59, 1 }
 0x160   : > { %v1198_v29 = vmul.f32 %v5287_v24, %v1164_v20  ;;  %v1258_v50 = vld [vmem:[#allocation2 + $0x52] sm:$0xff]  ;;  %v1273_v36 = vld [vmem:[#allocation2 + $0x10a] sm:$0xff]  ;;  %v1120_v42 = vmul.f32 %v5596_v31, %v5276_v21  ;;  %4356 = vmatpush1.bf16.msra.mxu1 %v4237_v34  ;;  %767 = vst.msk [vmem:[#allocation2 + $0xc9] sm:$0xff] %vm380_vm1, %v683_v25  ;;  %766 = vst.msk [vmem:[#allocation2 + $0xc1] sm:$0xff] %vm380_vm1, %v679_v23  ;;  %v1524_v19 = vadd.f32 %v1494_v45, %v1430_v32 }
 0x161   : > { %v1134_v44 = vadd.f32 %v1104_v5, %v5473_v49  ;;  %v1292_v9 = vmul.f32 %v5279_v22, %v1258_v50  ;;  %v1307_v6 = vmul.f32 %v5279_v22, %v1273_v36  ;;  %v1321_v30 = vadd.f32 %v1291_v12, %v5547_v61  ;;  %7862 = vst [vmem:[#allocation61_spill] sm:$0xff] %v5635_v18  ;;  %v505_v23 = vpop.permute.xlu0 %504 }
 0x162   : > { %v1214_v49 = vmul.f32 %v5598_v48, %v5287_v24  ;;  %4345 = vmatprep.subr.bf16.mxu1 %v7861_v8  ;;  %v1150_v26 = vadd.f32 %v1120_v42, %v5477_v60  ;;  %v1026_v34 = vmul.f32 %v1273_v36, %v5261_v7  ;;  %v1523_v5 = vadd.f32 %v1493_v43, %v1429_v4 }
 0x163   : > { %v1228_v16 = vadd.f32 %v1198_v29, %v1134_v44  ;;  %4241 = vmatpush1.bf16.msra.mxu0 %v4240_v3  ;;  %v1618_v25 = vadd.f32 %v1588_v51, %v1524_v19  ;;  %v1587_v32 = vmul.f32 %v5281_v2, %v1273_v36  ;;  %v823_v61 = vmul.f32 %v1070_v27, %v5252_v57  ;;  %v421_v12 = vpop.permute.xlu1 %420  ;;  %v5646_v59 = vld [vmem:[#allocation2 + $0x60] sm:$0xff] }
 0x164   : > { %v917_v45 = vmul.f32 %v1164_v20, %v5249_v56  ;;  %4242 = vmatprep.subr.bf16.mxu0 %v7861_v8  ;;  %v5648_v29 = vld [vmem:[#allocation2 + $0x61] sm:$0xff]  ;;  %v5650_v42 = vadd.f32 %v1307_v6, %v1243_v39  ;;  %v1040_v60 = vadd.f32 %v1010_v13, %v5519_v58  ;;  %v1244_v43 = vadd.f32 %v1214_v49, %v1150_v26 }
 0x165   : > { %v1308_v36 = vmul.f32 %v5600_v28, %v5279_v22  ;;  %4357 = vmatpush1.bf16.msra.mxu1 %v4240_v3  ;;  %560 = vst.msk [vmem:[#allocation2 + $0x69] sm:$0xff] %vm374_vm0, %v421_v12  ;;  %575 = vst.msk [vmem:[#allocation2 + $0x121] sm:$0xff] %vm374_vm0, %v505_v23  ;;  %v1655_v27 = vadd.f32 %v5562_v1, %v1618_v25  ;;  %v1385_v20 = vmul.f32 %v5269_v15, %v5646_v59  ;;  %v723_v26 = vpop.permute.xlu0 %722 }
 0x166   : > { %v1105_v6 = vmul.f32 %v5646_v59, %v5276_v21  ;;  %v1011_v39 = vmul.f32 %v1258_v50, %v5261_v7  ;;  %4346 = vmatprep.subr.bf16.mxu1 %v7861_v8  ;;  %v5664_v58 = vadd.f32 %v1292_v9, %v1228_v16  ;;  %v5667_v13 = vadd.f32 %v1026_v34, %v5602_v17 }
 0x167   : > { %v1617_v4 = vadd.f32 %v1587_v32, %v1523_v5  ;;  %v947_v3 = vadd.f32 %v917_v45, %v823_v61  ;;  %v5669_v51 = vmax.f32 %v1655_v27, 0.0  ;;  %v1415_v44 = vadd.f32 %v1385_v20, %v1321_v30  ;;  %v639_v50 = vpop.permute.xlu1 %638  ;;  %v1359_v9 = vld [vmem:[#allocation2 + $0xc0] sm:$0xff]  ;;  %774 = vst.msk [vmem:[#allocation2 + $0x121] sm:$0xff] %vm380_vm1, %v723_v26  ;;  %v5686_v45 = vld [vmem:[#allocation2 + $0xc8] sm:$0xff] }
 0x168   : > { %v1479_v19 = vmul.f32 %v5266_v14, %v5648_v29  ;;  %v1199_v49 = vmul.f32 %v5648_v29, %v5287_v24  ;;  %v1453_v16 = vld [vmem:[#allocation2 + $0xc1] sm:$0xff]  ;;  %v1135_v17 = vadd.f32 %v1105_v6, %v1040_v60  ;;  %v5675_v34 = vadd.f32 %v1308_v36, %v1244_v43  ;;  %759 = vst.msk [vmem:[#allocation2 + $0x69] sm:$0xff] %vm380_vm1, %v639_v50  ;;  %v5688_v12 = vld [vmem:[#allocation2 + $0xc9] sm:$0xff] }
 0x169   : > { %7863 = vst [vmem:[#allocation62_spill] sm:$0xff] %v5669_v51  ;;  %v1547_v25 = vld [vmem:[#allocation2 + $0xc2] sm:$0xff]  ;;  %v1654_v5 = vadd.f32 %v5562_v1, %v1617_v4  ;;  %v839_v30 = vmul.f32 %v5596_v31, %v5252_v57  ;;  %2357 = vrot.lane.b32.xlu1 %v5669_v51, %s4718_s7  ;;  %v1393_v32 = vmul.f32 %v5269_v15, %v1359_v9  ;;  %7864 = vst [vmem:[#allocation63_spill] sm:$0xff] %v5686_v45  ;;  %v5697_v27 = vld [vmem:[#allocation2 + $0xca] sm:$0xff] }
 0x16a   : > { %v1487_v61 = vmul.f32 %v5266_v14, %v1453_v16  ;;  %7865 = vst [vmem:[#allocation64_spill] sm:$0xff] %v5688_v12  ;;  %v5690_v23 = vadd.f32 %v1011_v39, %v947_v3  ;;  %v933_v31 = vmul.f32 %v5598_v48, %v5249_v56  ;;  %v1581_v60 = vmul.f32 %v5281_v2, %v1547_v25 }
 0x16b   : > { %v1509_v43 = vadd.f32 %v1479_v19, %v1415_v44  ;;  %v1394_v36 = vmul.f32 %v5269_v15, %v5686_v45  ;;  %7866 = vst [vmem:[#allocation65_spill] sm:$0xff] %v5697_v27  ;;  %v5701_v20 = vmul.f32 %v5600_v28, %v5261_v7  ;;  %v1423_v6 = vadd.f32 %v1393_v32, %v5570_v55  ;;  %v591_v3 = vpop.permute.xlu1 %590  ;;  %v509_v44 = vpop.permute.xlu0 %508 }
 0x16c   : > { %v1488_v39 = vmul.f32 %v5266_v14, %v5688_v12  ;;  %v1113_v4 = vmul.f32 %v1359_v9, %v5276_v21  ;;  %v1207_v48 = vmul.f32 %v1453_v16, %v5287_v24  ;;  %v5709_v50 = vmax.f32 %v1654_v5, 0.0  ;;  %750 = vst.msk [vmem:[#allocation2 + $0x1] sm:$0xff] %vm380_vm1, %v591_v3 }
 0x16d   : > { %v1424_v19 = vadd.f32 %v1394_v36, %v5582_v46  ;;  %v1800_v26 = vrot.slane %v5669_v51, 7  ;;  %v1114_v28 = vmul.f32 %v5686_v45, %v5276_v21  ;;  %576 = vst.msk [vmem:[#allocation2 + $0x129] sm:$0xff] %vm374_vm0, %v509_v44  ;;  %v1517_v55 = vadd.f32 %v1487_v61, %v1423_v6 }
 0x16e   : > { %7867 = vst [vmem:[#allocation66_spill] sm:$0xff] %v5709_v50  ;;  %v1229_v32 = vadd.f32 %v1199_v49, %v1135_v17  ;;  %v1582_v9 = vmul.f32 %v5281_v2, %v5697_v27  ;;  %v1143_v16 = vadd.f32 %v1113_v4, %v5585_v11  ;;  %v1301_v46 = vmul.f32 %v1547_v25, %v5279_v22 }
 0x16f   : > { %v1518_v8 = vadd.f32 %v1488_v39, %v1424_v19  ;;  %v5721_v5 = vrot.slane %v5709_v50, 7  ;;  %v1144_v36 = vadd.f32 %v1114_v28, %v5605_v62  ;;  %v1611_v51 = vadd.f32 %v1581_v60, %v1517_v55  ;;  %v727_v61 = vpop.permute.xlu1 %726  ;;  %v595_v6 = vpop.permute.xlu0 %594  ;;  %v5728_v44 = vld [vmem:[#allocation2 + $0x62] sm:$0xff]  ;;  %v5759_v28 = vld [vmem:[#allocation2 + $0x6a] sm:$0xff] }
 0x170   : > { %v1208_v3 = vmul.f32 %v5688_v12, %v5287_v24  ;;  %v1302_v49 = vmul.f32 %v5697_v27, %v5279_v22  ;;  %v963_v17 = vadd.f32 %v933_v31, %v839_v30  ;;  %v5730_v11 = vld [vmem:[#allocation2 + $0x68] sm:$0xff]  ;;  %v1237_v4 = vadd.f32 %v1207_v48, %v1143_v16  ;;  %775 = vst.msk [vmem:[#allocation2 + $0x129] sm:$0xff] %vm380_vm1, %v727_v61  ;;  %v5751_v48 = vld [vmem:[#allocation2 + $0x120] sm:$0xff] }
 0x171   : > { %7868 = vst [vmem:[#allocation67_spill] sm:$0xff] %v5721_v5  ;;  %v5732_v25 = vld [vmem:[#allocation2 + $0x69] sm:$0xff]  ;;  %v1612_v39 = vadd.f32 %v1582_v9, %v1518_v8  ;;  %v5736_v62 = vsel %vm1771_vm5, %v5721_v5, %v1800_v26  ;;  %1866 = vst.msk [vmem:[#allocation3 + $0x1a0] sm:$0xfe] %vm1847_vm4, %v5721_v5  ;;  %v5742_v30 = vmul.f32 %v5646_v59, %v5252_v57  ;;  %v5753_v19 = vld [vmem:[#allocation2 + $0x121] sm:$0xff] }
 0x172   : > { %751 = vst.msk [vmem:[#allocation2 + $0x9] sm:$0xff] %vm380_vm1, %v595_v6  ;;  %v1648_v31 = vadd.f32 %v5562_v1, %v1611_v51  ;;  %v1573_v8 = vmul.f32 %v5281_v2, %v5728_v44  ;;  %v1386_v60 = vmul.f32 %v5269_v15, %v5730_v11  ;;  %v1238_v59 = vadd.f32 %v1208_v3, %v1144_v36 }
 0x173   : > { %1867 = vst.msk [vmem:[#allocation3 + $0x1b0] sm:$0xff] %vm374_vm0, %v5736_v62  ;;  %v1480_v26 = vmul.f32 %v5266_v14, %v5732_v25  ;;  %v1401_v51 = vmul.f32 %v5269_v15, %v5751_v48  ;;  %v1495_v55 = vmul.f32 %v5266_v14, %v5753_v19  ;;  %v1293_v9 = vmul.f32 %v5728_v44, %v5279_v22  ;;  %v606_v3 = vpop.permute.xlu1 %605  ;;  %v602_v5 = vpop.permute.xlu0 %601 }
 0x174   : > { %v5767_v16 = vmax.f32 %v1648_v31, 0.0  ;;  %v1603_v61 = vadd.f32 %v1573_v8, %v1509_v43  ;;  %v1416_v6 = vadd.f32 %v1386_v60, %v5664_v58  ;;  %v1649_v36 = vadd.f32 %v5562_v1, %v1612_v39  ;;  %753 = vst.msk [vmem:[#allocation2 + $0x21] sm:$0xff] %vm380_vm1, %v606_v3  ;;  %752 = vst.msk [vmem:[#allocation2 + $0x19] sm:$0xff] %vm380_vm1, %v602_v5 }
 0x175   : > { %v1431_v50 = vadd.f32 %v1401_v51, %v5650_v42  ;;  %v1323_v27 = vadd.f32 %v1293_v9, %v1229_v32  ;;  %v1331_v12 = vadd.f32 %v1301_v46, %v1237_v4  ;;  %v1121_v45 = vmul.f32 %v5751_v48, %v5276_v21 }
 0x176   : > { %1902 = vrot.lane.b32.xlu1 %v5767_v16, %s4717_s15  ;;  %v1640_v58 = vadd.f32 %v5562_v1, %v1603_v61  ;;  %v1510_v43 = vadd.f32 %v1480_v26, %v1416_v6  ;;  %v1574_v39 = vmul.f32 %v5281_v2, %v5759_v28  ;;  %v5781_v31 = vmax.f32 %v1649_v36, 0.0 }
 0x177   : > { %v1417_v42 = vadd.f32 %v5297_v33, %v1323_v27  ;;  %v1425_v32 = vadd.f32 %v5327_v52, %v1331_v12  ;;  %v5786_v46 = vadd.f32 %v5701_v20, %v963_v17  ;;  %v5790_v5 = vmul.f32 %v5648_v29, %v5249_v56  ;;  %v516_v51 = vpop.permute.xlu0 %515  ;;  %v734_v9 = vpop.permute.xlu1 %733  ;;  %v5796_v33 = vld [vmem:[#allocation2 + $0x122] sm:$0xff]  ;;  %v5813_v61 = vld [vmem:[#allocation2 + $0x12a] sm:$0xff] }
 0x178   : > { %v5792_v4 = vmax.f32 %v1640_v58, 0.0  ;;  %v1604_v8 = vadd.f32 %v1574_v39, %v1510_v43  ;;  %v1525_v60 = vadd.f32 %v1495_v55, %v1431_v50  ;;  %v1215_v26 = vmul.f32 %v5753_v19, %v5287_v24  ;;  %v5799_v12 = vld [vmem:[#allocation2 + $0x128] sm:$0xff]  ;;  %577 = vst.msk [vmem:[#allocation2 + $0x139] sm:$0xff] %vm374_vm0, %v516_v51 }
 0x179   : > { %v1511_v52 = vadd.f32 %v5300_v10, %v1417_v42  ;;  %v5801_v27 = vld [vmem:[#allocation2 + $0x129] sm:$0xff]  ;;  %v1519_v29 = vadd.f32 %v5331_v53, %v1425_v32  ;;  %v1151_v20 = vadd.f32 %v1121_v45, %v5667_v13  ;;  %v1332_v17 = vadd.f32 %v1302_v49, %v1238_v59  ;;  %776 = vst.msk [vmem:[#allocation2 + $0x139] sm:$0xff] %vm380_vm1, %v734_v9 }
 0x17a   : > { %7869 = vst [vmem:[#allocation68_spill] sm:$0xff] %v5792_v4  ;;  %2327 = vrot.lane.b32.xlu0 %v5792_v4, %s4718_s7  ;;  %v1641_v50 = vadd.f32 %v5562_v1, %v1604_v8  ;;  %v1589_v55 = vmul.f32 %v5281_v2, %v5796_v33  ;;  %v1402_v10 = vmul.f32 %v5269_v15, %v5799_v12  ;;  %v5816_v53 = vrot.slane %v5781_v31, 1 }
 0x17b   : > { %v1605_v13 = vadd.f32 %v5305_v35, %v1511_v52  ;;  %v5821_v45 = vrot.slane %v5792_v4, 7  ;;  %v1613_v49 = vadd.f32 %v5334_v54, %v1519_v29  ;;  %v2017_v59 = vrot.slane %v5767_v16, 1  ;;  %v520_v43 = vpop.permute.xlu0 %519  ;;  %v738_v39 = vpop.permute.xlu1 %737 }
 0x17c   : > { %7870 = vst [vmem:[#allocation69_spill] sm:$0xff] %v5816_v53  ;;  %v5825_v6 = vmax.f32 %v1641_v50, 0.0  ;;  %v1619_v36 = vadd.f32 %v1589_v55, %v1525_v60  ;;  %v1432_v3 = vadd.f32 %v1402_v10, %v5675_v34  ;;  %v1496_v58 = vmul.f32 %v5266_v14, %v5801_v27  ;;  %578 = vst.msk [vmem:[#allocation2 + $0x141] sm:$0xff] %vm374_vm0, %v520_v43 }
 0x17d   : > { %v1642_v42 = vadd.f32 %v5562_v1, %v1605_v13  ;;  %v1590_v35 = vmul.f32 %v5281_v2, %v5813_v61  ;;  %1852 = vst.msk [vmem:[#allocation3 + $0xc0] sm:$0xfe] %vm1847_vm4, %v5821_v45  ;;  %v1245_v54 = vadd.f32 %v1215_v26, %v1151_v20  ;;  %v1426_v32 = vadd.f32 %v5324_v47, %v1332_v17 }
 0x17e   : > { %7871 = vst [vmem:[#allocation70_spill] sm:$0xff] %v5825_v6  ;;  %2329 = vrot.lane.b32.xlu0 %v5825_v6, %s4718_s7  ;;  %v1656_v34 = vadd.f32 %v5562_v1, %v1619_v36  ;;  %v1526_v8 = vadd.f32 %v1496_v58, %v1432_v3  ;;  %v1309_v60 = vmul.f32 %v5796_v33, %v5279_v22  ;;  %v1779_v51 = vrot.slane %v5825_v6, 7  ;;  %v5973_v6 = vld [vmem:[#allocation2 + $0x20] sm:$0xff] }
 0x17f   : > { %777 = vst.msk [vmem:[#allocation2 + $0x141] sm:$0xff] %vm380_vm1, %v738_v39  ;;  %v5844_v2 = vmax.f32 %v1642_v42, 0.0  ;;  %v1650_v26 = vadd.f32 %v5562_v1, %v1613_v49  ;;  %v1520_v47 = vadd.f32 %v5341_v63, %v1426_v32  ;;  %v1106_v9 = vmul.f32 %v5730_v11, %v5276_v21  ;;  %v527_v50 = vpop.permute.xlu0 %526  ;;  %v745_v55 = vpop.permute.xlu1 %744  ;;  %v782_v42 = vld [vmem:[#allocation2] sm:$0xff] }
 0x180   : > { %v5850_v52 = vmax.f32 %v1656_v34, 0.0  ;;  %v1620_v29 = vadd.f32 %v1590_v35, %v1526_v8  ;;  %v5854_v20 = vsel %vm1998_vm6, %v2017_v59, %v5816_v53  ;;  %v5858_v17 = vsel %vm1771_vm5, %v5821_v45, %v1779_v51  ;;  %579 = vst.msk [vmem:[#allocation2 + $0x151] sm:$0xff] %vm374_vm0, %v527_v50  ;;  %v5875_v36 = vld [vmem:[#allocation2 + $0x138] sm:$0xff]  ;;  %v876_v35 = vld [vmem:[#allocation2 + $0x1] sm:$0xff] }
 0x181   : > { %7872 = vst [vmem:[#allocation71_spill] sm:$0xff] %v5844_v2  ;;  %7874 = vst [vmem:[#allocation73_spill] sm:$0xff] %v5854_v20  ;;  %v5861_v10 = vrot.slane %v5844_v2, 7  ;;  %v1614_v63 = vadd.f32 %v5344_v0, %v1520_v47  ;;  %v1136_v11 = vadd.f32 %v1106_v9, %v5690_v23  ;;  %v1200_v13 = vmul.f32 %v5732_v25, %v5287_v24  ;;  %v5877_v3 = vld [vmem:[#allocation2 + $0x139] sm:$0xff] }
 0x182   : > { %7873 = vst [vmem:[#allocation72_spill] sm:$0xff] %v5850_v52  ;;  %1853 = vst.msk [vmem:[#allocation3 + $0xd0] sm:$0xff] %vm374_vm0, %v5858_v17  ;;  %2359 = vrot.lane.b32.xlu1 %v5850_v52, %s4718_s7  ;;  %2331 = vrot.lane.b32.xlu0 %v5844_v2, %s4718_s7  ;;  %v1657_v49 = vadd.f32 %v5562_v1, %v1620_v29  ;;  %v1339_v59 = vadd.f32 %v1309_v60, %v1245_v54  ;;  %v5880_v0 = vrot.slane %v5850_v52, 7  ;;  %v970_v60 = vld [vmem:[#allocation2 + $0x2] sm:$0xff] }
 0x183   : > { %v1122_v23 = vmul.f32 %v5799_v12, %v5276_v21  ;;  %778 = vst.msk [vmem:[#allocation2 + $0x151] sm:$0xff] %vm380_vm1, %v745_v55  ;;  %v1403_v25 = vmul.f32 %v5269_v15, %v5875_v36  ;;  %v1497_v58 = vmul.f32 %v5266_v14, %v5877_v3  ;;  %v1230_v43 = vadd.f32 %v1200_v13, %v1136_v11  ;;  %v531_v51 = vpop.permute.xlu0 %530  ;;  %v749_v47 = vpop.permute.xlu1 %748 }
 0x184   : > { %1854 = vst.msk [vmem:[#allocation3 + $0xe0] sm:$0xfe] %vm1847_vm4, %v5861_v10  ;;  %v1294_v39 = vmul.f32 %v5759_v28, %v5279_v22  ;;  %v5893_v54 = vmax.f32 %v1657_v49, 0.0  ;;  %v5895_v32 = vmax.f32 %v1650_v26, 0.0  ;;  %1868 = vst.msk [vmem:[#allocation3 + $0x1c0] sm:$0xfe] %vm1847_vm4, %v5880_v0  ;;  %v1216_v8 = vmul.f32 %v5801_v27, %v5287_v24 }
 0x185   : > { %v1152_v34 = vadd.f32 %v1122_v23, %v5786_v46  ;;  %v1433_v9 = vadd.f32 %v1403_v25, %v1339_v59  ;;  %v1651_v28 = vadd.f32 %v5562_v1, %v1614_v63  ;;  %v1310_v50 = vmul.f32 %v5813_v61, %v5279_v22  ;;  %580 = vst.msk [vmem:[#allocation2 + $0x159] sm:$0xff] %vm374_vm0, %v531_v51  ;;  %v5918_v59 = vld [vmem:[#allocation9 + $0x8] ss:$0 sm:$0xff] }
 0x186   : > { %7875 = vst [vmem:[#allocation74_spill] sm:$0xff] %v5893_v54  ;;  %v1324_v29 = vadd.f32 %v1294_v39, %v1230_v43  ;;  %1904 = vrot.lane.b32.xlu1 %v5781_v31, %s4717_s15  ;;  %2066 = vrot.lane.b32.xlu0 %v5635_v18, %s4719_s30  ;;  %v5910_v46 = vld [vmem:[#allocation2 + $0x13a] sm:$0xff]  ;;  %v1803_v26 = vrot.slane %v5893_v54, 7  ;;  %v816_v63 = vmul.f32 %v5252_v57, %v782_v42  ;;  %779 = vst.msk [vmem:[#allocation2 + $0x159] sm:$0xff] %vm380_vm1, %v749_v47  ;;  %v5925_v39 = vld [vmem:[#allocation2 + $0x142] sm:$0xff] }
 0x187   : > { %v1246_v55 = vadd.f32 %v1216_v8, %v1152_v34  ;;  %v5913_v11 = vld [vmem:[#allocation2 + $0x140] sm:$0xff]  ;;  %v910_v13 = vmul.f32 %v5249_v56, %v876_v35  ;;  %v1527_v49 = vadd.f32 %v1497_v58, %v1433_v9  ;;  %v1591_v23 = vmul.f32 %v5918_v59, %v5910_v46  ;;  %v5928_v8 = vld [vmem:[#allocation2 + $0x18] sm:$0xff]  ;;  %v538_v47 = vpop.permute.xlu0 %537  ;;  %v542_v9 = vpop.permute.xlu1 %541  ;;  %v877_v18 = vld [vmem:[#allocation2 + $0x9] sm:$0xff] }
 0x188   : > { %v1418_v25 = vadd.f32 %v5308_v37, %v1324_v29  ;;  %v5923_v43 = vld [vmem:[#allocation2 + $0x141] sm:$0xff]  ;;  %v1004_v34 = vmul.f32 %v5261_v7, %v970_v60  ;;  %v5932_v42 = vsel %vm1771_vm5, %v5880_v0, %v1803_v26  ;;  %v1404_v35 = vmul.f32 %v5269_v15, %v5913_v11  ;;  %581 = vst.msk [vmem:[#allocation2 + $0x169] sm:$0xff] %vm374_vm0, %v538_v47 }
 0x189   : > { %v1340_v58 = vadd.f32 %v1310_v50, %v1246_v55  ;;  %v1498_v51 = vmul.f32 %v5266_v14, %v5923_v43  ;;  %v5938_v37 = vld [vmem:[#allocation2 + $0x1a] sm:$0xff]  ;;  %v1621_v29 = vadd.f32 %v1591_v23, %v1527_v49  ;;  %1869 = vst.msk [vmem:[#allocation3 + $0x1d0] sm:$0xff] %vm374_vm0, %v5932_v42  ;;  %v1592_v50 = vmul.f32 %v5918_v59, %v5925_v39  ;;  %v783_v60 = vld [vmem:[#allocation2 + $0x8] sm:$0xff] }
 0x18a   : > { %v1512_v26 = vadd.f32 %v5311_v38, %v1418_v25  ;;  %2361 = vrot.lane.b32.xlu1 %v5893_v54, %s4718_s7  ;;  %2206 = vrot.lane.b32.xlu0 %v5821_v45, %s4719_s30  ;;  %582 = vst.msk [vmem:[#allocation2 + $0x171] sm:$0xff] %vm374_vm0, %v542_v9  ;;  %v5952_v55 = vmax.f32 %v1651_v28, 0.0  ;;  %v940_v23 = vadd.f32 %v910_v13, %v816_v63  ;;  %v5956_v25 = vld [vmem:[#allocation2 + $0x19] sm:$0xff] }
 0x18b   : > { %v1434_v49 = vadd.f32 %v1404_v35, %v1340_v58  ;;  %v1099_v38 = vmul.f32 %v5276_v21, %v5928_v8  ;;  %v1658_v47 = vadd.f32 %v5562_v1, %v1621_v29  ;;  %v1193_v45 = vmul.f32 %v5287_v24, %v5956_v25  ;;  %v971_v35 = vld [vmem:[#allocation2 + $0xa] sm:$0xff] }
 0x18c   : > { %v1606_v2 = vadd.f32 %v5314_v40, %v1512_v26  ;;  %v1287_v28 = vmul.f32 %v5279_v22, %v5938_v37  ;;  %v1034_v58 = vadd.f32 %v1004_v34, %v940_v23  ;;  %v948_v63 = vadd.f32 %v5790_v5, %v5742_v30  ;;  %v553_v40 = vpop.permute.xlu1 %552  ;;  %v549_v26 = vpop.permute.xlu0 %548  ;;  %v892_v23 = vld [vmem:[#allocation2 + $0xc1] sm:$0xff] }
 0x18d   : > { %v1528_v9 = vadd.f32 %v1498_v51, %v1434_v49  ;;  %v1012_v13 = vmul.f32 %v5728_v44, %v5261_v7  ;;  %v5968_v52 = vmax.f32 %v1658_v47, 0.0  ;;  %v817_v54 = vmul.f32 %v5252_v57, %v783_v60  ;;  %584 = vst.msk [vmem:[#allocation2 + $0x189] sm:$0xff] %vm374_vm0, %v553_v40  ;;  %583 = vst.msk [vmem:[#allocation2 + $0x181] sm:$0xff] %vm374_vm0, %v549_v26  ;;  %v798_v49 = vld [vmem:[#allocation2 + $0xc0] sm:$0xff] }
 0x18e   : > { %v1643_v29 = vadd.f32 %v5562_v1, %v1606_v2  ;;  %v911_v4 = vmul.f32 %v5249_v56, %v877_v18  ;;  %1906 = vrot.lane.b32.xlu1 %v5895_v32, %s4717_s15  ;;  %2070 = vrot.lane.b32.xlu0 %v5816_v53, %s4719_s30  ;;  %v5980_v44 = vrot.slane %v5952_v55, 1  ;;  %v1129_v5 = vadd.f32 %v1099_v38, %v1034_v58  ;;  %v5994_v38 = vld [vmem:[#allocation2 + $0x21] sm:$0xff] }
 0x18f   : > { %7876 = vst [vmem:[#allocation75_spill] sm:$0xff] %v5968_v52  ;;  %v1622_v30 = vadd.f32 %v1592_v50, %v1528_v9  ;;  %v1042_v2 = vadd.f32 %v1012_v13, %v948_v63  ;;  %v5985_v18 = vrot.slane %v5968_v52, 7  ;;  %v1005_v60 = vmul.f32 %v5261_v7, %v971_v35  ;;  %v5996_v58 = vld [vmem:[#allocation2 + $0x22] sm:$0xff] }
 0x190   : > { %7877 = vst [vmem:[#allocation76_spill] sm:$0xff] %v5980_v44  ;;  %v5987_v34 = vmax.f32 %v1643_v29, 0.0  ;;  %v941_v51 = vadd.f32 %v911_v4, %v817_v54  ;;  %v1223_v53 = vadd.f32 %v1193_v45, %v1129_v5  ;;  %v1100_v9 = vmul.f32 %v5276_v21, %v5973_v6  ;;  %v986_v63 = vld [vmem:[#allocation2 + $0xc2] sm:$0xff] }
 0x191   : > { %v1659_v47 = vadd.f32 %v5562_v1, %v1622_v30  ;;  %v1137_v50 = vadd.f32 %v5317_v41, %v1042_v2  ;;  %1870 = vst.msk [vmem:[#allocation3 + $0x1e0] sm:$0xfe] %vm1847_vm4, %v5985_v18  ;;  %v1194_v54 = vmul.f32 %v5287_v24, %v5994_v38  ;;  %v1288_v41 = vmul.f32 %v5279_v22, %v5996_v58  ;;  %v7879_v29 = vld [vmem:[#allocation18_spill] sm:$0xff] }
 0x192   : > { %v1782_v13 = vrot.slane %v5987_v34, 7  ;;  %v1035_v4 = vadd.f32 %v1005_v60, %v941_v51  ;;  %2363 = vrot.lane.b32.xlu1 %v5968_v52, %s4718_s7  ;;  %2210 = vrot.lane.b32.xlu0 %v5861_v10, %s4719_s30  ;;  %v1317_v35 = vadd.f32 %v1287_v28, %v1223_v53  ;;  %v832_v26 = vmul.f32 %v5252_v57, %v798_v49  ;;  %v7881_v28 = vld [vmem:[#allocation19_spill] sm:$0xff] }
 0x193   : > { %v6009_v45 = vmax.f32 %v1659_v47, 0.0  ;;  %v1231_v40 = vadd.f32 %v7879_v29, %v1137_v50  ;;  %v926_v2 = vmul.f32 %v5249_v56, %v892_v23  ;;  %v1020_v51 = vmul.f32 %v5261_v7, %v986_v63  ;;  %v7880_v47 = vld [vmem:[#allocation29_spill] sm:$0xff] }
 0x194   : > { %v6015_v30 = vsel %vm1771_vm5, %v5861_v10, %v1782_v13  ;;  %v1130_v5 = vadd.f32 %v1100_v9, %v1035_v4  ;;  %v1411_v53 = vadd.f32 %v7880_v47, %v1317_v35  ;;  %v840_v49 = vmul.f32 %v5751_v48, %v5252_v57  ;;  %v7882_v13 = vld [vmem:[#allocation30_spill] sm:$0xff]  ;;  %v7883_v4 = vld [vmem:[#allocation33_spill] sm:$0xff] }
 0x195   : > { %7878 = vst [vmem:[#allocation77_spill] sm:$0xff] %v6009_v45  ;;  %1855 = vst.msk [vmem:[#allocation3 + $0xf0] sm:$0xff] %vm374_vm0, %v6015_v30  ;;  %v1806_v60 = vrot.slane %v6009_v45, 7  ;;  %v1325_v50 = vadd.f32 %v7881_v28, %v1231_v40  ;;  %v956_v10 = vadd.f32 %v926_v2, %v832_v26  ;;  %v934_v9 = vmul.f32 %v5753_v19, %v5249_v56  ;;  %v7888_v28 = vld [vmem:[#allocation56_spill] sm:$0xff] }
 0x196   : > { %v1224_v29 = vadd.f32 %v1194_v54, %v1130_v5  ;;  %v1028_v23 = vmul.f32 %v5796_v33, %v5261_v7  ;;  %2238 = vrot.lane.b32.xlu1 %v5880_v0, %s4719_s30  ;;  %2068 = vrot.lane.b32.xlu0 %v5854_v20, %s4719_s30  ;;  %v1505_v48 = vadd.f32 %v7882_v13, %v1411_v53  ;;  %v7884_v40 = vrot.slane %v5895_v32, 1  ;;  %v7886_v5 = vld [vmem:[#allocation41_spill] sm:$0xff]  ;;  %v6052_v53 = vld [vmem:[#allocation2 + $0x150] sm:$0xff] }
 0x197   : > { %v6036_v63 = vsel %vm1771_vm5, %v5985_v18, %v1806_v60  ;;  %v1419_v54 = vadd.f32 %v7883_v4, %v1325_v50  ;;  %v1050_v35 = vadd.f32 %v1020_v51, %v956_v10  ;;  %v964_v33 = vadd.f32 %v934_v9, %v840_v49  ;;  %v7887_v60 = vld [vmem:[#allocation34_spill] sm:$0xff]  ;;  %v7889_v50 = vld [vmem:[#allocation52_spill] sm:$0xff] }
 0x198   : > { %1871 = vst.msk [vmem:[#allocation3 + $0x1f0] sm:$0xff] %vm374_vm0, %v6036_v63  ;;  %v1318_v19 = vadd.f32 %v1288_v41, %v1224_v29  ;;  %v1123_v0 = vmul.f32 %v5875_v36, %v5276_v21  ;;  %v6048_v26 = vsel %vm1998_vm6, %v7884_v40, %v5980_v44  ;;  %v1599_v2 = vadd.f32 %v7886_v5, %v1505_v48  ;;  %v7890_v51 = vld [vmem:[#allocation42_spill] sm:$0xff]  ;;  %v7891_v29 = vld [vmem:[#allocation20_spill] sm:$0xff]  ;;  %v7892_v48 = vld [vmem:[#allocation35_spill] sm:$0xff] }
 0x199   : > { %7885 = vst [vmem:[#allocation18_spill] sm:$0xff] %v6048_v26  ;;  %v1513_v47 = vadd.f32 %v7887_v60, %v1419_v54  ;;  %v6056_v41 = vadd.f32 %v7889_v50, %v7888_v28  ;;  %v1145_v36 = vadd.f32 %v7891_v29, %v1050_v35  ;;  %v1058_v10 = vadd.f32 %v1028_v23, %v964_v33  ;;  %v7893_v35 = vld [vmem:[#allocation43_spill] sm:$0xff]  ;;  %v7894_v33 = vld [vmem:[#allocation21_spill] sm:$0xff]  ;;  %v791_v28 = vld [vmem:[#allocation2 + $0x68] sm:$0xff] }
 0x19a   : > { %v1412_v49 = vadd.f32 %v7890_v51, %v1318_v19  ;;  %v1217_v9 = vmul.f32 %v5877_v3, %v5287_v24  ;;  %2236 = vrot.lane.b32.xlu1 %v5736_v62, %s4719_s30  ;;  %2208 = vrot.lane.b32.xlu0 %v5858_v17, %s4719_s30  ;;  %v1636_v13 = vadd.f32 %v5562_v1, %v1599_v2  ;;  %v6070_v19 = vld [vmem:[#allocation2 + $0x151] sm:$0xff] }
 0x19b   : > { %v1607_v4 = vadd.f32 %v7892_v48, %v1513_v47  ;;  %v1311_v54 = vmul.f32 %v5910_v46, %v5279_v22  ;;  %v1239_v40 = vadd.f32 %v7894_v33, %v1145_v36  ;;  %v1153_v3 = vadd.f32 %v1123_v0, %v1058_v10  ;;  %v7896_v2 = vld [vmem:[#allocation63_spill] sm:$0xff]  ;;  %v7897_v47 = vld [vmem:[#allocation64_spill] sm:$0xff] }
 0x19c   : > { %v1506_v23 = vadd.f32 %v7893_v35, %v1412_v49  ;;  %v1405_v62 = vmul.f32 %v5269_v15, %v6052_v53  ;;  %v6076_v5 = vmax.f32 %v1636_v13, 0.0  ;;  %v833_v60 = vmul.f32 %v7896_v2, %v5252_v57  ;;  %v7898_v50 = vld [vmem:[#allocation44_spill] sm:$0xff]  ;;  %v7899_v49 = vld [vmem:[#allocation22_spill] sm:$0xff] }
 0x19d   : > { %v1644_v17 = vadd.f32 %v5562_v1, %v1607_v4  ;;  %v927_v46 = vmul.f32 %v7897_v47, %v5249_v56  ;;  %v1333_v29 = vadd.f32 %v7899_v49, %v1239_v40  ;;  %v1247_v36 = vadd.f32 %v1217_v9, %v1153_v3  ;;  %v6087_v10 = vld [vmem:[#allocation2 + $0x152] sm:$0xff]  ;;  %v885_v13 = vld [vmem:[#allocation2 + $0x69] sm:$0xff]  ;;  %v7900_v9 = vld [vmem:[#allocation65_spill] sm:$0xff] }
 0x19e   : > { %7895 = vst [vmem:[#allocation29_spill] sm:$0xff] %v6076_v5  ;;  %v1600_v51 = vadd.f32 %v7898_v50, %v1506_v23  ;;  %v1499_v0 = vmul.f32 %v5266_v14, %v6070_v19  ;;  %2240 = vrot.lane.b32.xlu1 %v5932_v42, %s4719_s30  ;;  %2072 = vrot.lane.b32.xlu0 %v6048_v26, %s4719_s30  ;;  %v6094_v48 = vrot.slane %v6076_v5, 7  ;;  %v979_v33 = vld [vmem:[#allocation2 + $0x6a] sm:$0xff]  ;;  %v7901_v3 = vld [vmem:[#allocation37_spill] sm:$0xff] }
 0x19f   : > { %v6096_v4 = vmax.f32 %v1644_v17, 0.0  ;;  %v957_v35 = vadd.f32 %v927_v46, %v833_v60  ;;  %v1021_v23 = vmul.f32 %v7900_v9, %v5261_v7  ;;  %v1427_v2 = vadd.f32 %v7901_v3, %v1333_v29  ;;  %v7902_v49 = vld [vmem:[#allocation38_spill] sm:$0xff]  ;;  %v7905_v3 = vld [vmem:[#allocation24_spill] sm:$0xff] }
 0x1a0   : > { %v1637_v40 = vadd.f32 %v5562_v1, %v1600_v51  ;;  %v1341_v47 = vadd.f32 %v1311_v54, %v1247_v36  ;;  %v825_v42 = vmul.f32 %v5252_v57, %v791_v28  ;;  %1848 = vst.msk [vmem:[#allocation3 + $0x80] sm:$0xfe] %vm1847_vm4, %v6094_v48  ;;  %v1593_v17 = vmul.f32 %v5918_v59, %v6087_v10  ;;  %v7903_v28 = vld [vmem:[#allocation23_spill] sm:$0xff] }
 0x1a1   : > { %v6106_v50 = vrot.slane %v6096_v4, 7  ;;  %v1051_v60 = vadd.f32 %v1021_v23, %v957_v35  ;;  %v919_v46 = vmul.f32 %v5249_v56, %v885_v13  ;;  %v1521_v9 = vadd.f32 %v7902_v49, %v1427_v2  ;;  %v7904_v23 = vld [vmem:[#allocation45_spill] sm:$0xff] }
 0x1a2   : > { %v1435_v51 = vadd.f32 %v1405_v62, %v1341_v47  ;;  %v1013_v29 = vmul.f32 %v5261_v7, %v979_v33  ;;  %v841_v54 = vmul.f32 %v5799_v12, %v5252_v57  ;;  %2242 = vrot.lane.b32.xlu1 %v5985_v18, %s4719_s30  ;;  %2333 = vrot.lane.b32.xlu0 %v5987_v34, %s4718_s7  ;;  %v6124_v35 = vmax.f32 %v1637_v40, 0.0  ;;  %v7906_v40 = vld [vmem:[#allocation60_spill] sm:$0xff] }
 0x1a3   : > { %1856 = vst.msk [vmem:[#allocation3 + $0x100] sm:$0xfe] %vm1847_vm4, %v6106_v50  ;;  %v1146_v36 = vadd.f32 %v7903_v28, %v1051_v60  ;;  %v949_v13 = vadd.f32 %v919_v46, %v825_v42  ;;  %v935_v62 = vmul.f32 %v5801_v27, %v5249_v56  ;;  %v1615_v33 = vadd.f32 %v7904_v23, %v1521_v9  ;;  %v7908_v9 = vld [vmem:[#allocation26_spill] sm:$0xff]  ;;  %v6144_v28 = vld [vmem:[#allocation2 + $0x159] sm:$0xff] }
 0x1a4   : > { %v1529_v12 = vadd.f32 %v1499_v0, %v1435_v51  ;;  %v1029_v18 = vmul.f32 %v5813_v61, %v5261_v7  ;;  %v1124_v26 = vmul.f32 %v5913_v11, %v5276_v21  ;;  %v1218_v27 = vmul.f32 %v5923_v43, %v5287_v24  ;;  %v7907_v61 = vld [vmem:[#allocation25_spill] sm:$0xff] }
 0x1a5   : > { %v1240_v2 = vadd.f32 %v7905_v3, %v1146_v36  ;;  %v1043_v47 = vadd.f32 %v1013_v29, %v949_v13  ;;  %v965_v49 = vadd.f32 %v935_v62, %v841_v54  ;;  %v1652_v42 = vadd.f32 %v5562_v1, %v1615_v33  ;;  %v6142_v54 = vld [vmem:[#allocation2 + $0x158] sm:$0xff]  ;;  %v7911_v33 = vld [vmem:[#allocation27_spill] sm:$0xff] }
 0x1a6   : > { %v1623_v60 = vadd.f32 %v1593_v17, %v1529_v12  ;;  %1908 = vrot.lane.b32.xlu1 %v5952_v55, %s4717_s15  ;;  %2212 = vrot.lane.b32.xlu0 %v6015_v30, %s4719_s30  ;;  %v6148_v36 = vrot.slane %v6124_v35, 1  ;;  %v7909_v30 = vmov 0.0   ;;  %v1312_v3 = vmul.f32 %v5925_v39, %v5279_v22 }
 0x1a7   : > { %v1334_v0 = vadd.f32 %v7907_v61, %v1240_v2  ;;  %v1138_v51 = vadd.f32 %v7908_v9, %v1043_v47  ;;  %v1059_v29 = vadd.f32 %v1029_v18, %v965_v49  ;;  %v6150_v13 = vmax.f32 %v1652_v42, 0.0  ;;  %1709 = vst.msk [vmem:[#allocation3 + $0x1e8] sm:$0xff] %vm1708_vm7, %v7909_v30  ;;  %1711 = vst.msk [vmem:[#allocation3 + $0x1f8] sm:$0xff] %vm1708_vm7, %v7909_v30  ;;  %v6173_v2 = vld [vmem:[#allocation2 + $0x15a] sm:$0xff] }
 0x1a8   : > { %v1660_v62 = vadd.f32 %v5562_v1, %v1623_v60  ;;  %1713 = vst.msk [vmem:[#allocation3 + $0x208] sm:$0xff] %vm1708_vm7, %v7909_v30  ;;  %1715 = vst.msk [vmem:[#allocation3 + $0x218] sm:$0xff] %vm1708_vm7, %v7909_v30  ;;  %v7910_v1 = vld [vmem:[#allocation46_spill] sm:$0xff]  ;;  %v1406_v49 = vmul.f32 %v5269_v15, %v6142_v54  ;;  %v1500_v42 = vmul.f32 %v5266_v14, %v6144_v28 }
 0x1a9   : > { %1717 = vst.msk [vmem:[#allocation3 + $0x228] sm:$0xff] %vm1708_vm7, %v7909_v30  ;;  %1719 = vst.msk [vmem:[#allocation3 + $0x238] sm:$0xff] %vm1708_vm7, %v7909_v30  ;;  %v1428_v23 = vadd.f32 %v7910_v1, %v1334_v0  ;;  %v1232_v12 = vadd.f32 %v7911_v33, %v1138_v51  ;;  %v1154_v18 = vadd.f32 %v1124_v26, %v1059_v29  ;;  %v7913_v26 = vld [vmem:[#allocation47_spill] sm:$0xff]  ;;  %v7914_v0 = vld [vmem:[#allocation28_spill] sm:$0xff] }
 0x1aa   : > { %1721 = vst.msk [vmem:[#allocation3 + $0x248] sm:$0xff] %vm1708_vm7, %v7909_v30  ;;  %1723 = vst.msk [vmem:[#allocation3 + $0x258] sm:$0xff] %vm1708_vm7, %v7909_v30  ;;  %v6175_v47 = vmax.f32 %v1660_v62, 0.0  ;;  %v818_v60 = vmul.f32 %v5928_v8, %v5252_v57  ;;  %2365 = vrot.lane.b32.xlu1 %v6009_v45, %s4718_s7  ;;  %2074 = vrot.lane.b32.xlu0 %v5980_v44, %s4719_s30  ;;  %v1594_v62 = vmul.f32 %v5918_v59, %v6173_v2  ;;  %v808_v44 = vld [vmem:[#allocation2 + $0x138] sm:$0xff] }
 0x1ab   : > { %v1522_v61 = vadd.f32 %v7913_v26, %v1428_v23  ;;  %v1326_v9 = vadd.f32 %v7914_v0, %v1232_v12  ;;  %v1248_v51 = vadd.f32 %v1218_v27, %v1154_v18  ;;  %v912_v8 = vmul.f32 %v5956_v25, %v5249_v56  ;;  %1732 = vst.msk [vmem:[#allocation3 + $0x140] sm:$0x1] %vm1725_vm8, %v7909_v30  ;;  %v7916_v27 = vld [vmem:[#allocation36_spill] sm:$0xff]  ;;  %v7917_v12 = vld [vmem:[#allocation59_spill] sm:$0xff] }
 0x1ac   : > { %7912 = vst [vmem:[#allocation19_spill] sm:$0xff] %v6175_v47  ;;  %v6190_v29 = vrot.slane %v6175_v47, 7  ;;  %v1006_v1 = vmul.f32 %v5938_v37, %v5261_v7  ;;  %1726 = vst.msk [vmem:[#allocation3 + $0x80] sm:$0x1] %vm1725_vm8, %v7909_v30  ;;  %v7915_v37 = vld [vmem:[#allocation48_spill] sm:$0xff]  ;;  %v1421_v18 = vadd.f32 %v7917_v12, %v6056_v41  ;;  %v1537_v0 = vld [vmem:[#allocation2 + $0x4a] sm:$0xff]  ;;  %v819_v46 = vmul.f32 %v5973_v6, %v5252_v57 }
 0x1ad   : > { %1727 = vst.msk [vmem:[#allocation3 + $0xa0] sm:$0x1] %vm1725_vm8, %v7909_v30  ;;  %1728 = vst.msk [vmem:[#allocation3 + $0xc0] sm:$0x1] %vm1725_vm8, %v7909_v30  ;;  %v1616_v25 = vadd.f32 %v7915_v37, %v1522_v61  ;;  %v1420_v23 = vadd.f32 %v7916_v27, %v1326_v9  ;;  %v1342_v33 = vadd.f32 %v1312_v3, %v1248_v51  ;;  %v6247_v41 = vld [vmem:[%s7740_s3] ss:$0 sm:$0xff] }
 0x1ae   : > { %1729 = vst.msk [vmem:[#allocation3 + $0xe0] sm:$0x1] %vm1725_vm8, %v7909_v30  ;;  %1730 = vst.msk [vmem:[#allocation3 + $0x100] sm:$0x1] %vm1725_vm8, %v7909_v30  ;;  %v942_v26 = vadd.f32 %v912_v8, %v818_v60  ;;  %v913_v17 = vmul.f32 %v5994_v38, %v5249_v56  ;;  %v1007_v61 = vmul.f32 %v5996_v58, %v5261_v7  ;;  %2244 = vrot.lane.b32.xlu0 %v6036_v63, %s4719_s30  ;;  %v7918_v6 = vld [vmem:[#allocation39_spill] sm:$0xff]  ;;  %v7921_v37 = vld [vmem:[#allocation57_spill] sm:$0xff] }
 0x1af   : > { %1731 = vst.msk [vmem:[#allocation3 + $0x120] sm:$0x1] %vm1725_vm8, %v7909_v30  ;;  %1733 = vst.msk [vmem:[#allocation3 + $0x160] sm:$0x1] %vm1725_vm8, %v7909_v30  ;;  %1878 = vrot.lane.b32.xlu1 %v6076_v5, %s4717_s15  ;;  %v1653_v3 = vadd.f32 %v6247_v41, %v1616_v25  ;;  %v1514_v60 = vadd.f32 %v7918_v6, %v1420_v23  ;;  %v1436_v9 = vadd.f32 %v1406_v49, %v1342_v33  ;;  %v1350_v38 = vld [vmem:[#allocation2 + $0x50] sm:$0xff]  ;;  %v7922_v25 = vld [vmem:[#allocation40_spill] sm:$0xff] }
 0x1b0   : > { %1734 = vst.msk [vmem:[#allocation3 + $0x180] sm:$0x1] %vm1725_vm8, %v7909_v30  ;;  %1735 = vst.msk [vmem:[#allocation3 + $0x1a0] sm:$0x1] %vm1725_vm8, %v7909_v30  ;;  %v6252_v51 = vrot.slane %v5767_v16, 7  ;;  %v7919_v58 = vrot.slane %v6076_v5, 1  ;;  %v1036_v8 = vadd.f32 %v1006_v1, %v942_v26  ;;  %v1515_v27 = vadd.f32 %v7921_v37, %v1421_v18 }
 0x1b1   : > { %1736 = vst.msk [vmem:[#allocation3 + $0x1c0] sm:$0x1] %vm1725_vm8, %v7909_v30  ;;  %1737 = vst.msk [vmem:[#allocation3 + $0x1e0] sm:$0x1] %vm1725_vm8, %v7909_v30  ;;  %v943_v12 = vadd.f32 %v913_v17, %v819_v46  ;;  %v6261_v20 = vmax.f32 %v1653_v3, 0.0  ;;  %v1608_v23 = vadd.f32 %v7922_v25, %v1514_v60  ;;  %v1530_v49 = vadd.f32 %v1500_v42, %v1436_v9  ;;  %v902_v6 = vld [vmem:[#allocation2 + $0x139] sm:$0xff] }
 0x1b2   : > { %1738 = vst.msk [vmem:[#allocation3 + $0x200] sm:$0x1] %vm1725_vm8, %v7909_v30  ;;  %1739 = vst.msk [vmem:[#allocation3 + $0x220] sm:$0x1] %vm1725_vm8, %v7909_v30  ;;  %v6258_v63 = vsel %vm1998_vm6, %v7919_v58, %v6148_v36  ;;  %v1571_v33 = vmul.f32 %v5918_v59, %v1537_v0  ;;  %v7923_v5 = vld [vmem:[#allocation31_spill] sm:$0xff]  ;;  %v7924_v58 = vld [vmem:[#allocation58_spill] sm:$0xff]  ;;  %v1384_v18 = vmul.f32 %v5269_v15, %v1350_v38 }
 0x1b3   : > { %1740 = vst.msk [vmem:[#allocation3 + $0x240] sm:$0x1] %vm1725_vm8, %v7909_v30  ;;  %7920 = vst [vmem:[#allocation30_spill] sm:$0xff] %v6258_v63  ;;  %v1131_v52 = vadd.f32 %v7923_v5, %v1036_v8  ;;  %v1609_v45 = vadd.f32 %v7924_v58, %v1515_v27  ;;  %v1037_v1 = vadd.f32 %v1007_v61, %v943_v12  ;;  %v996_v46 = vld [vmem:[#allocation2 + $0x13a] sm:$0xff]  ;;  %2335 = vrot.lane.b32.xlu1 %v6096_v4, %s4718_s7 }
 0x1b4   : > { %1872 = vst.msk [vmem:[#allocation3 + $0x200] sm:$0xfe] %vm1847_vm4, %v6190_v29  ;;  %1860 = vst.msk [vmem:[#allocation3 + $0x140] sm:$0xfe] %vm1847_vm4, %v6252_v51  ;;  %2044 = vrot.lane.b32.xlu0 %v6258_v63, %s4719_s30  ;;  %v2023_v17 = vrot.slane %v6150_v13, 1  ;;  %v1645_v42 = vadd.f32 %v6247_v41, %v1608_v23  ;;  %v1624_v26 = vadd.f32 %v1594_v62, %v1530_v49  ;;  %v7925_v5 = vld [vmem:[#allocation32_spill] sm:$0xff] }
 0x1b5   : > { %v842_v0 = vmul.f32 %v5252_v57, %v808_v44  ;;  %v1225_v3 = vadd.f32 %v7925_v5, %v1131_v52  ;;  %v1646_v61 = vadd.f32 %v6247_v41, %v1609_v45  ;;  %v7926_v60 = vld [vmem:[#allocation53_spill] sm:$0xff]  ;;  %v936_v38 = vmul.f32 %v5249_v56, %v902_v6  ;;  %v7928_v52 = vld [vmem:[#allocation54_spill] sm:$0xff]  ;;  %v2668_v63 = vld [vmem:[#allocation10 + $0xf0] sm:$0xff]  ;;  %1701 = vst.msk [vmem:[#allocation3 + $0x40] sm:$0xff] %vm1696_vm9, %v7909_v30 }
 0x1b6   : > { %v1132_v9 = vadd.f32 %v7926_v60, %v1037_v1  ;;  %v6282_v8 = vrot.slane %v6261_v20, 1  ;;  %v6284_v37 = vmax.f32 %v1645_v42, 0.0  ;;  %v1661_v27 = vadd.f32 %v6247_v41, %v1624_v26  ;;  %v7927_v62 = vld [vmem:[#allocation49_spill] sm:$0xff]  ;;  %1697 = vst.msk [vmem:[#allocation3] sm:$0xff] %vm1696_vm9, %v7909_v30  ;;  %1698 = vst.msk [vmem:[#allocation3 + $0x10] sm:$0xff] %vm1696_vm9, %v7909_v30 }
 0x1b7   : > { %v1030_v12 = vmul.f32 %v5261_v7, %v996_v46  ;;  %v1319_v25 = vadd.f32 %v7927_v62, %v1225_v3  ;;  %v6289_v44 = vmax.f32 %v1646_v61, 0.0  ;;  %v966_v45 = vadd.f32 %v936_v38, %v842_v0  ;;  %1910 = vrot.lane.b32.xlu1 %v6150_v13, %s4717_s15  ;;  %v7929_v46 = vld [vmem:[#allocation50_spill] sm:$0xff]  ;;  %v7930_v0 = vld [vmem:[#allocation55_spill] sm:$0xff]  ;;  %1699 = vst.msk [vmem:[#allocation3 + $0x20] sm:$0xff] %vm1696_vm9, %v7909_v30 }
 0x1b8   : > { %v1226_v23 = vadd.f32 %v7928_v52, %v1132_v9  ;;  %2214 = vrot.lane.b32.xlu0 %v6106_v50, %s4719_s30  ;;  %v1785_v49 = vrot.slane %v6284_v37, 7  ;;  %v6297_v6 = vmax.f32 %v1661_v27, 0.0  ;;  %v1125_v58 = vmul.f32 %v6052_v53, %v5276_v21  ;;  %v1444_v38 = vld [vmem:[#allocation2 + $0x51] sm:$0xff]  ;;  %v6319_v62 = vld [vmem:[#allocation2 + $0x168] sm:$0xff]  ;;  %1700 = vst.msk [vmem:[#allocation3 + $0x30] sm:$0xff] %vm1696_vm9, %v7909_v30  ;;  %1702 = vst.msk [vmem:[#allocation3 + $0x50] sm:$0xff] %vm1696_vm9, %v7909_v30 }
 0x1b9   : > { %v1219_v1 = vmul.f32 %v6070_v19, %v5287_v24  ;;  %v1413_v42 = vadd.f32 %v7929_v46, %v1319_v25  ;;  %v6305_v26 = vrot.slane %v6289_v44, 7  ;;  %v1060_v3 = vadd.f32 %v1030_v12, %v966_v45  ;;  %v7932_v12 = vld [vmem:[#allocation51_spill] sm:$0xff]  ;;  %1703 = vst.msk [vmem:[#allocation3 + $0x60] sm:$0xff] %vm1696_vm9, %v7909_v30  ;;  %1704 = vst.msk [vmem:[#allocation3 + $0x70] sm:$0xff] %vm1696_vm9, %v7909_v30 }
 0x1ba   : > { %v1320_v5 = vadd.f32 %v7930_v0, %v1226_v23  ;;  %v6310_v61 = vsel %vm1998_vm6, %v2023_v17, %v6282_v8  ;;  %v6314_v60 = vsel %vm1771_vm5, %v6106_v50, %v1785_v49  ;;  %v1809_v9 = vrot.slane %v6297_v6, 7  ;;  %v6332_v45 = vld [vmem:[#allocation2 + $0x169] sm:$0xff]  ;;  %2185 = vst.msk [vmem:[#allocation3 + $0x40] sm:$0x1] %vm2182_vm10, %v7909_v30  ;;  %2183 = vst.msk [vmem:[#allocation3] sm:$0x1] %vm2182_vm10, %v7909_v30 }
 0x1bb   : > { %7931 = vst [vmem:[#allocation33_spill] sm:$0xff] %v6310_v61  ;;  %v1313_v27 = vmul.f32 %v6087_v10, %v5279_v22  ;;  %1857 = vst.msk [vmem:[#allocation3 + $0x110] sm:$0xff] %vm374_vm0, %v6314_v60  ;;  %v1507_v25 = vadd.f32 %v7932_v12, %v1413_v42  ;;  %v7933_v17 = vrot.slane %v7906_v40, 7  ;;  %v1155_v23 = vadd.f32 %v1125_v58, %v1060_v3  ;;  %v2666_v49 = vld [vmem:[#allocation10 + $0xe0] sm:$0xff]  ;;  %v2667_v46 = vld [vmem:[#allocation10 + $0xe8] sm:$0xff] }
 0x1bc   : > { %1858 = vst.msk [vmem:[#allocation3 + $0x120] sm:$0xfe] %vm1847_vm4, %v6305_v26  ;;  %v1414_v50 = vadd.f32 %v1384_v18, %v1320_v5  ;;  %2367 = vrot.lane.b32.xlu1 %v6175_v47, %s4718_s7  ;;  %2076 = vrot.lane.b32.xlu0 %v6310_v61, %s4719_s30  ;;  %v6340_v42 = vsel %vm1771_vm5, %v6190_v29, %v1809_v9  ;;  %v1538_v58 = vld [vmem:[#allocation2 + $0x52] sm:$0xff]  ;;  %v2669_v61 = vld [vmem:[#allocation10 + $0xf8] sm:$0xff] }
 0x1bd   : > { %v6328_v52 = vsel %vm1771_vm5, %v6305_v26, %v7933_v17  ;;  %v1601_v0 = vadd.f32 %v1571_v33, %v1507_v25  ;;  %1873 = vst.msk [vmem:[#allocation3 + $0x210] sm:$0xff] %vm374_vm0, %v6340_v42  ;;  %v1478_v18 = vmul.f32 %v5266_v14, %v1444_v38  ;;  %v1249_v5 = vadd.f32 %v1219_v1, %v1155_v23  ;;  %v6351_v17 = vld [vmem:[#allocation2 + $0x16a] sm:$0xff] }
 0x1be   : > { %1859 = vst.msk [vmem:[#allocation3 + $0x130] sm:$0xff] %vm374_vm0, %v6328_v52  ;;  %v1407_v3 = vmul.f32 %v5269_v15, %v6319_v62  ;;  %v1501_v12 = vmul.f32 %v5266_v14, %v6332_v45  ;;  %v4243_v9 = vpack.c.bf16 %v2667_v46, %v2666_v49  ;;  %v843_v38 = vmul.f32 %v5913_v11, %v5252_v57 }
 0x1bf   : > { %v1638_v33 = vadd.f32 %v6247_v41, %v1601_v0  ;;  %v1508_v25 = vadd.f32 %v1478_v18, %v1414_v50  ;;  %v1343_v47 = vadd.f32 %v1313_v27, %v1249_v5  ;;  %v1572_v1 = vmul.f32 %v5918_v59, %v1538_v58  ;;  %v2671_v18 = vld [vmem:[#allocation10 + $0x108] sm:$0xff]  ;;  %2184 = vst.msk [vmem:[#allocation3 + $0x20] sm:$0x1] %vm2182_vm10, %v7909_v30 }
 0x1c0   : > { %1880 = vrot.lane.b32.xlu1 %v6124_v35, %s4717_s15  ;;  %2246 = vrot.lane.b32.xlu0 %v6190_v29, %s4719_s30  ;;  %v937_v23 = vmul.f32 %v5923_v43, %v5249_v56  ;;  %v1031_v49 = vmul.f32 %v5925_v39, %v5261_v7  ;;  %v1595_v11 = vmul.f32 %v5918_v59, %v6351_v17  ;;  %v7934_v0 = vmov 0.0|0.0   ;;  %v2670_v29 = vld [vmem:[#allocation10 + $0x100] sm:$0xff] }
 0x1c1   : > { %v6365_v46 = vmax.f32 %v1638_v33, 0.0  ;;  %v1437_v27 = vadd.f32 %v1407_v3, %v1343_v47  ;;  %4244 = vmatpush1.bf16.msra.mxu0 %v4243_v9  ;;  %v4246_v50 = vpack.c.bf16 %v2669_v61, %v2668_v63  ;;  %4358 = vmatpush1.bf16.msra.mxu1 %v4243_v9  ;;  %v1126_v43 = vmul.f32 %v6142_v54, %v5276_v21  ;;  %v6382_v61 = vld [vmem:[#allocation2 + $0x170] sm:$0xff] }
 0x1c2   : > { %4245 = vmatprep.subr.bf16.mxu0 %v7934_v0  ;;  %v967_v58 = vadd.f32 %v937_v23, %v843_v38  ;;  %v1602_v39 = vadd.f32 %v1572_v1, %v1508_v25  ;;  %4347 = vmatprep.subr.bf16.mxu1 %v7934_v0  ;;  %v1220_v63 = vmul.f32 %v6144_v28, %v5287_v24  ;;  %v1791_v3 = vrot.slane %v5781_v31, 7  ;;  %v2672_v25 = vld [vmem:[#allocation10 + $0x110] sm:$0xff]  ;;  %v2673_v38 = vld [vmem:[#allocation10 + $0x118] sm:$0xff] }
 0x1c3   : > { %v6373_v5 = vrot.slane %v6365_v46, 7  ;;  %v1531_v33 = vadd.f32 %v1501_v12, %v1437_v27  ;;  %v4249_v9 = vpack.c.bf16 %v2671_v18, %v2670_v29  ;;  %v1314_v23 = vmul.f32 %v6173_v2, %v5279_v22  ;;  %2186 = vst.msk [vmem:[#allocation3 + $0x60] sm:$0x1] %vm2182_vm10, %v7909_v30 }
 0x1c4   : > { %2337 = vrot.lane.b32.xlu1 %v6284_v37, %s4718_s7  ;;  %2046 = vrot.lane.b32.xlu0 %v6148_v36, %s4719_s30  ;;  %v1061_v47 = vadd.f32 %v1031_v49, %v967_v58  ;;  %v6390_v49 = vld [vmem:[#allocation2 + $0x171] sm:$0xff]  ;;  %v6395_v27 = vsel %vm1771_vm5, %v6252_v51, %v1791_v3  ;;  %v1408_v29 = vmul.f32 %v5269_v15, %v6382_v61 }
 0x1c5   : > { %1850 = vst.msk [vmem:[#allocation3 + $0xa0] sm:$0xfe] %vm1847_vm4, %v6373_v5  ;;  %v1625_v12 = vadd.f32 %v1595_v11, %v1531_v33  ;;  %4247 = vmatpush1.bf16.msra.mxu0 %v4246_v50  ;;  %4359 = vmatpush1.bf16.msra.mxu1 %v4246_v50  ;;  %v1639_v11 = vadd.f32 %v6247_v41, %v1602_v39 }
 0x1c6   : > { %4248 = vmatprep.subr.bf16.mxu0 %v7934_v0  ;;  %v1156_v1 = vadd.f32 %v1126_v43, %v1061_v47  ;;  %4348 = vmatprep.subr.bf16.mxu1 %v7934_v0  ;;  %1861 = vst.msk [vmem:[#allocation3 + $0x150] sm:$0xff] %vm374_vm0, %v6395_v27  ;;  %v844_v18 = vmul.f32 %v6052_v53, %v5252_v57  ;;  %v6409_v43 = vld [vmem:[#allocation2 + $0x172] sm:$0xff] }
 0x1c7   : > { %v1662_v50 = vadd.f32 %v6247_v41, %v1625_v12  ;;  %v938_v39 = vmul.f32 %v6070_v19, %v5249_v56  ;;  %v1032_v33 = vmul.f32 %v6087_v10, %v5261_v7  ;;  %v4252_v3 = vpack.c.bf16 %v2673_v38, %v2672_v25  ;;  %v2675_v12 = vld [vmem:[#allocation10 + $0x128] sm:$0xff] }
 0x1c8   : > { %1912 = vrot.lane.b32.xlu1 %v6261_v20, %s4717_s15  ;;  %2216 = vrot.lane.b32.xlu0 %v6314_v60, %s4719_s30  ;;  %v1250_v58 = vadd.f32 %v1220_v63, %v1156_v1  ;;  %v1502_v53 = vmul.f32 %v5266_v14, %v6390_v49  ;;  %v2674_v63 = vld [vmem:[#allocation10 + $0x120] sm:$0xff]  ;;  %v1127_v19 = vmul.f32 %v6319_v62, %v5276_v21  ;;  %v6423_v10 = vmax.f32 %v1639_v11, 0.0  ;;  %v1375_v11 = vld [vmem:[#allocation2 + $0x180] sm:$0xff] }
 0x1c9   : > { %v6415_v47 = vmax.f32 %v1662_v50, 0.0  ;;  %4250 = vmatpush1.bf16.msra.mxu0 %v4249_v9  ;;  %4360 = vmatpush1.bf16.msra.mxu1 %v4249_v9  ;;  %v968_v1 = vadd.f32 %v938_v39, %v844_v18  ;;  %v1596_v25 = vmul.f32 %v5918_v59, %v6409_v43  ;;  %v1221_v62 = vmul.f32 %v6332_v45, %v5287_v24 }
 0x1ca   : > { %4251 = vmatprep.subr.bf16.mxu0 %v7934_v0  ;;  %v1344_v60 = vadd.f32 %v1314_v23, %v1250_v58  ;;  %4349 = vmatprep.subr.bf16.mxu1 %v7934_v0  ;;  %v4255_v45 = vpack.c.bf16 %v2675_v12, %v2674_v63  ;;  %v1315_v23 = vmul.f32 %v6351_v17, %v5279_v22  ;;  %v2676_v17 = vld [vmem:[#allocation10 + $0x130] sm:$0xff]  ;;  %v2677_v58 = vld [vmem:[#allocation10 + $0x138] sm:$0xff] }
 0x1cb   : > { %v6426_v50 = vrot.slane %v6415_v47, 7  ;;  %v1062_v38 = vadd.f32 %v1032_v33, %v968_v1  ;;  %v845_v33 = vmul.f32 %v6142_v54, %v5252_v57  ;;  %v1469_v63 = vld [vmem:[#allocation2 + $0x181] sm:$0xff]  ;;  %v1033_v12 = vmul.f32 %v6173_v2, %v5261_v7 }
 0x1cc   : > { %2369 = vrot.lane.b32.xlu1 %v6297_v6, %s4718_s7  ;;  %2078 = vrot.lane.b32.xlu0 %v6282_v8, %s4719_s30  ;;  %v1438_v9 = vadd.f32 %v1408_v29, %v1344_v60  ;;  %v6457_v29 = vrot.slane %v5895_v32, 7  ;;  %v6465_v60 = vrot.slane %v6423_v10, 1  ;;  %v1409_v1 = vmul.f32 %v5269_v15, %v1375_v11  ;;  %v2678_v2 = vld [vmem:[#allocation10 + $0x140] sm:$0xff] }
 0x1cd   : > { %1874 = vst.msk [vmem:[#allocation3 + $0x220] sm:$0xfe] %vm1847_vm4, %v6426_v50  ;;  %4253 = vmatpush1.bf16.msra.mxu0 %v4252_v3  ;;  %4361 = vmatpush1.bf16.msra.mxu1 %v4252_v3  ;;  %v1157_v39 = vadd.f32 %v1127_v19, %v1062_v38  ;;  %v2002_v3 = vrot.slane %v6365_v46, 1  ;;  %v1563_v19 = vld [vmem:[#allocation2 + $0x182] sm:$0xff]  ;;  %v1794_v11 = vrot.slane %v5952_v55, 7 }
 0x1ce   : > { %v1532_v18 = vadd.f32 %v1502_v53, %v1438_v9  ;;  %4254 = vmatprep.subr.bf16.mxu0 %v7934_v0  ;;  %4350 = vmatprep.subr.bf16.mxu1 %v7934_v0  ;;  %1862 = vst.msk [vmem:[#allocation3 + $0x160] sm:$0xfe] %vm1847_vm4, %v6457_v29  ;;  %v939_v53 = vmul.f32 %v6144_v28, %v5249_v56 }
 0x1cf   : > { %v1251_v54 = vadd.f32 %v1221_v62, %v1157_v39  ;;  %v4258_v9 = vpack.c.bf16 %v2677_v58, %v2676_v17  ;;  %v1128_v56 = vmul.f32 %v6382_v61, %v5276_v21  ;;  %v1901_v7 = vpop.permute.xlu0 %1900  ;;  %v1503_v62 = vmul.f32 %v5266_v14, %v1469_v63  ;;  %v2680_v17 = vld [vmem:[#allocation10 + $0x150] sm:$0xff]  ;;  %v2681_v58 = vld [vmem:[#allocation10 + $0x158] sm:$0xff] }
 0x1d0   : > { %1882 = vrot.lane.b32.xlu1 %v6365_v46, %s4717_s15  ;;  %2248 = vrot.lane.b32.xlu0 %v6340_v42, %s4719_s30  ;;  %v1626_v57 = vadd.f32 %v1596_v25, %v1532_v18  ;;  %v969_v38 = vadd.f32 %v939_v53, %v845_v33  ;;  %v2679_v42 = vld [vmem:[#allocation10 + $0x148] sm:$0xff]  ;;  %1979 = vst.msk [vmem:[#allocation3 + $0x130] sm:$0xff] %vm380_vm1, %v1901_v7  ;;  %v1376_v33 = vld [vmem:[#allocation2 + $0x188] sm:$0xff] }
 0x1d1   : > { %4256 = vmatpush1.bf16.msra.mxu0 %v4255_v45  ;;  %4362 = vmatpush1.bf16.msra.mxu1 %v4255_v45  ;;  %v1345_v25 = vadd.f32 %v1315_v23, %v1251_v54  ;;  %v6488_v45 = vsel %vm1998_vm6, %v2002_v3, %v6465_v60  ;;  %v1597_v21 = vmul.f32 %v5918_v59, %v1563_v19  ;;  %v1470_v19 = vld [vmem:[#allocation2 + $0x189] sm:$0xff] }
 0x1d2   : > { %v1663_v28 = vadd.f32 %v6247_v41, %v1626_v57  ;;  %4257 = vmatprep.subr.bf16.mxu0 %v7934_v0  ;;  %4351 = vmatprep.subr.bf16.mxu1 %v7934_v0  ;;  %v1063_v61 = vadd.f32 %v1033_v12, %v969_v38  ;;  %v1222_v18 = vmul.f32 %v6390_v49, %v5287_v24  ;;  %v6506_v24 = vrot.slane %v6150_v13, 7  ;;  %v7935_v12 = vld [vmem:[#allocation62_spill] sm:$0xff] }
 0x1d3   : > { %2172 = vst.msk [vmem:[#allocation3 + $0x137] sm:$0x1] %vm2166_vm11, %v7909_v30  ;;  %v1439_v39 = vadd.f32 %v1409_v1, %v1345_v25  ;;  %v6503_v3 = vsel %vm1771_vm5, %v6457_v29, %v1794_v11  ;;  %v4261_v49 = vpack.c.bf16 %v2679_v42, %v2678_v2  ;;  %v1316_v53 = vmul.f32 %v6409_v43, %v5279_v22  ;;  %v7936_v7 = vld [vmem:[#allocation66_spill] sm:$0xff] }
 0x1d4   : > { %2339 = vrot.lane.b32.xlu1 %v6289_v44, %s4718_s7  ;;  %2048 = vrot.lane.b32.xlu0 %v6488_v45, %s4719_s30  ;;  %v6499_v23 = vmax.f32 %v1663_v28, 0.0  ;;  %v1158_v63 = vadd.f32 %v1128_v56, %v1063_v61  ;;  %1863 = vst.msk [vmem:[#allocation3 + $0x170] sm:$0xff] %vm374_vm0, %v6503_v3  ;;  %v6513_v57 = vrot.slane %v7935_v12, 1  ;;  %v4264_v22 = vpack.c.bf16 %v2681_v58, %v2680_v17  ;;  %v1564_v42 = vld [vmem:[#allocation2 + $0x18a] sm:$0xff] }
 0x1d5   : > { %4259 = vmatpush1.bf16.msra.mxu0 %v4258_v9  ;;  %4363 = vmatpush1.bf16.msra.mxu1 %v4258_v9  ;;  %v1533_v1 = vadd.f32 %v1503_v62, %v1439_v39  ;;  %1864 = vst.msk [vmem:[#allocation3 + $0x180] sm:$0xfe] %vm1847_vm4, %v6506_v24  ;;  %v1773_v9 = vrot.slane %v6124_v35, 7  ;;  %v1410_v38 = vmul.f32 %v5269_v15, %v1376_v33  ;;  %v1797_v56 = vrot.slane %v6261_v20, 7  ;;  %v2682_v61 = vld [vmem:[#allocation10 + $0x160] sm:$0xff] }
 0x1d6   : > { %v1812_v54 = vrot.slane %v6499_v23, 7  ;;  %4260 = vmatprep.subr.bf16.mxu0 %v7934_v0  ;;  %4352 = vmatprep.subr.bf16.mxu1 %v7934_v0  ;;  %v1252_v43 = vadd.f32 %v1222_v18, %v1158_v63  ;;  %v2026_v15 = vrot.slane %v7936_v7, 1  ;;  %v2683_v18 = vld [vmem:[#allocation10 + $0x168] sm:$0xff]  ;;  %v1598_v39 = vmul.f32 %v5918_v59, %v1564_v42 }
 0x1d7   : > { %v1627_v2 = vadd.f32 %v1597_v21, %v1533_v1  ;;  %v6533_v25 = vsel %vm1771_vm5, %v6094_v48, %v1773_v9  ;;  %v6543_v11 = vsel %vm1771_vm5, %v6506_v24, %v1797_v56  ;;  %v4267_v63 = vpack.c.bf16 %v2683_v18, %v2682_v61  ;;  %v2684_v1 = vld [vmem:[#allocation10 + $0x170] sm:$0xff] }
 0x1d8   : > { %1914 = vrot.lane.b32.xlu1 %v7936_v7, %s4717_s15  ;;  %2218 = vrot.lane.b32.xlu0 %v6305_v26, %s4719_s30  ;;  %v6529_v28 = vsel %vm1771_vm5, %v6426_v50, %v1812_v54  ;;  %v1346_v62 = vadd.f32 %v1316_v53, %v1252_v43  ;;  %v1504_v26 = vmul.f32 %v5266_v14, %v1470_v19  ;;  %v1776_v14 = vrot.slane %v6423_v10, 7  ;;  %v2685_v19 = vld [vmem:[#allocation10 + $0x178] sm:$0xff] }
 0x1d9   : > { %1875 = vst.msk [vmem:[#allocation3 + $0x230] sm:$0xff] %vm374_vm0, %v6529_v28  ;;  %4262 = vmatpush1.bf16.msra.mxu0 %v4261_v49  ;;  %4364 = vmatpush1.bf16.msra.mxu1 %v4261_v49  ;;  %1849 = vst.msk [vmem:[#allocation3 + $0x90] sm:$0xff] %vm374_vm0, %v6533_v25  ;;  %v1664_v21 = vadd.f32 %v6247_v41, %v1627_v2  ;;  %v6553_v17 = vsel %vm1998_vm6, %v2026_v15, %v6513_v57  ;;  %v7937_v2 = vld [vmem:[#allocation70_spill] sm:$0xff]  ;;  %v7938_v15 = vld [vmem:[#allocation68_spill] sm:$0xff]  ;;  %v6626_v61 = vrot.slane %v5987_v34, 1 }
 0x1da   : > { %4263 = vmatprep.subr.bf16.mxu0 %v7934_v0  ;;  %4353 = vmatprep.subr.bf16.mxu1 %v7934_v0  ;;  %1865 = vst.msk [vmem:[#allocation3 + $0x190] sm:$0xff] %vm374_vm0, %v6543_v11  ;;  %v1440_v58 = vadd.f32 %v1410_v38, %v1346_v62  ;;  %v6564_v49 = vsel %vm1771_vm5, %v6373_v5, %v1776_v14  ;;  %v2006_v42 = vrot.slane %v7937_v2, 1  ;;  %v2005_v62 = vrot.slane %v7938_v15, 1  ;;  %v7941_v14 = vld [vmem:[#allocation71_spill] sm:$0xff] }
 0x1db   : > { %v6560_v33 = vmax.f32 %v1664_v21, 0.0  ;;  %1851 = vst.msk [vmem:[#allocation3 + $0xb0] sm:$0xff] %vm374_vm0, %v6564_v49  ;;  %v2358_v59 = vpop.permute.xlu1 %2357  ;;  %v7939_v21 = vld [vmem:[#allocation74_spill] sm:$0xff] }
 0x1dc   : > { %2371 = vrot.lane.b32.xlu1 %v6415_v47, %s4718_s7  ;;  %2080 = vrot.lane.b32.xlu0 %v6553_v17, %s4719_s30  ;;  %v1534_v53 = vadd.f32 %v1504_v26, %v1440_v58  ;;  %2428 = vst.msk [vmem:[#allocation3 + $0x138] sm:$0xff] %vm374_vm0, %v2358_v59  ;;  %v2007_v26 = vsel %vm1998_vm6, %v2005_v62, %v2006_v42  ;;  %v2008_v58 = vrot.slane %v7941_v14, 1 }
 0x1dd   : > { %4265 = vmatpush1.bf16.msra.mxu0 %v4264_v22  ;;  %4365 = vmatpush1.bf16.msra.mxu1 %v4264_v22  ;;  %v6570_v54 = vrot.slane %v6560_v33, 7  ;;  %2489 = vst.msk [vmem:[#allocation3 + $0x138] sm:$0x7f] %vm2470_vm12, %v6513_v57  ;;  %v4270_v22 = vpack.c.bf16 %v2685_v19, %v2684_v1 }
 0x1de   : > { %4266 = vmatprep.subr.bf16.mxu0 %v7934_v0  ;;  %4354 = vmatprep.subr.bf16.mxu1 %v7934_v0  ;;  %v1628_v9 = vadd.f32 %v1598_v39, %v1534_v53  ;;  %2510 = vst.msk [vmem:[#allocation3 + $0x13f] sm:$0x1] %vm2500_vm13, %v7909_v30  ;;  %v6642_v1 = vsel %vm1998_vm6, %v2008_v58, %v6626_v61  ;;  %v3359_v58 = vld [vmem:[#allocation10 + $0x190] sm:$0xff] }
 0x1df   : > { %1876 = vst.msk [vmem:[#allocation3 + $0x240] sm:$0xfe] %vm1847_vm4, %v6570_v54 }
 0x1e0   : > { %1884 = vrot.lane.b32.xlu1 %v6423_v10, %s4717_s15  ;;  %2250 = vrot.lane.b32.xlu0 %v6426_v50, %s4719_s30  ;;  %v1665_v43 = vadd.f32 %v6247_v41, %v1628_v9 }
 0x1e1   : > { %4268 = vmatpush1.bf16.msra.mxu0 %v4267_v63  ;;  %4366 = vmatpush1.bf16.msra.mxu1 %v4267_v63 }
 0x1e2   : > { %4269 = vmatprep.subr.bf16.mxu0 %v7934_v0  ;;  %4355 = vmatprep.subr.bf16.mxu1 %v7934_v0  ;;  %v6587_v38 = vmax.f32 %v1665_v43, 0.0 }
 0x1e4   : > { %2341 = vrot.lane.b32.xlu1 %v7906_v40, %s4718_s7  ;;  %2050 = vrot.lane.b32.xlu0 %v6465_v60, %s4719_s30  ;;  %v1815_v50 = vrot.slane %v6587_v38, 7 }
 0x1e5   : > { %4271 = vmatpush1.bf16.msra.mxu0 %v4270_v22  ;;  %4367 = vmatpush1.bf16.msra.mxu1 %v4270_v22  ;;  %v2632_v41 = vld [vmem:[#allocation3 + $0x138] sm:$0xff] }
 0x1e6   : > { %4272 = vmatprep.subr.bf16.mxu1 %v7934_v0  ;;  %4308 = vmatprep.subr.bf16.mxu0 %v7934_v0  ;;  %v6598_v56 = vsel %vm1771_vm5, %v6570_v54, %v1815_v50  ;;  %v7942_v50 = vld [vmem:[#allocation77_spill] sm:$0xff] }
 0x1e7   : > { %4155 = vmatprep.mubr.msk.f32.mxu1 %vm1708_vm7, %v2632_v41  ;;  %1877 = vst.msk [vmem:[#allocation3 + $0x250] sm:$0xff] %vm374_vm0, %v6598_v56  ;;  %v6672_v41 = vrot.slane %v7942_v50, 1 }
 0x1e8   : > { %1916 = vrot.lane.b32.xlu1 %v7935_v12, %s4717_s15  ;;  %2220 = vrot.lane.b32.xlu0 %v6328_v52, %s4719_s30  ;;  %v1903_v40 = vpop.permute.xlu1 %1902 }
 0x1e9   : > { %1980 = vst.msk [vmem:[#allocation3 + $0x140] sm:$0xff] %vm380_vm1, %v1903_v40  ;;  %v7943_v40 = vld [vmem:[#allocation75_spill] sm:$0xff] }
 0x1ec   : > { %2373 = vrot.lane.b32.xlu1 %v6499_v23, %s4718_s7  ;;  %2082 = vrot.lane.b32.xlu0 %v6513_v57, %s4719_s30  ;;  %v2328_v12 = vpop.permute.xlu0 %2327  ;;  %v6623_v57 = vrot.slane %v7939_v21, 1 }
 0x1ed   : > { %2413 = vst.msk [vmem:[#allocation3 + $0x48] sm:$0xff] %vm374_vm0, %v2328_v12 }
 0x1ee   : > { %2474 = vst.msk [vmem:[#allocation3 + $0x48] sm:$0xff] %vm380_vm1, %v2007_v26 }
 0x1f0   : > { %1886 = vrot.lane.b32.xlu1 %v7938_v15, %s4717_s15  ;;  %2252 = vrot.lane.b32.xlu0 %v6529_v28, %s4719_s30  ;;  %v2330_v52 = vpop.permute.xlu0 %2329  ;;  %v7940_v28 = vld [vmem:[#allocation72_spill] sm:$0xff]  ;;  %v2032_v15 = vrot.slane %v7943_v40, 1 }
 0x1f1   : > { %2414 = vst.msk [vmem:[#allocation3 + $0x58] sm:$0xff] %vm374_vm0, %v2330_v52  ;;  %v2029_v18 = vrot.slane %v7940_v28, 1  ;;  %v3357_v52 = vld [vmem:[#allocation10 + $0x180] sm:$0xff] }
 0x1f2   : > { %2475 = vst.msk [vmem:[#allocation3 + $0x58] sm:$0x7f] %vm2470_vm12, %v2006_v42 }
 0x1f3   : > { %2503 = vst.msk [vmem:[#allocation3 + $0x5f] sm:$0x1] %vm2500_vm13, %v7909_v30  ;;  %v2031_v59 = vsel %vm1998_vm6, %v2029_v18, %v6623_v57 }
 0x1f4   : > { %2343 = vrot.lane.b32.xlu1 %v5767_v16, %s4718_s7  ;;  %2052 = vrot.lane.b32.xlu0 %v2007_v26, %s4719_s30  ;;  %v2360_v39 = vpop.permute.xlu1 %2359  ;;  %v2332_v63 = vpop.permute.xlu0 %2331  ;;  %v6682_v26 = vsel %vm1998_vm6, %v2032_v15, %v6672_v41  ;;  %v2579_v15 = vld [vmem:[#allocation10 + $0x18] sm:$0xff] }
 0x1f5   : > { %2429 = vst.msk [vmem:[#allocation3 + $0x148] sm:$0xff] %vm374_vm0, %v2360_v39  ;;  %2415 = vst.msk [vmem:[#allocation3 + $0x68] sm:$0xff] %vm374_vm0, %v2332_v63  ;;  %v2602_v53 = vld [vmem:[#allocation3 + $0x48] sm:$0xff] }
 0x1f6   : > { %4140 = vmatprep.mubr.msk.f32.mxu0 %vm1708_vm7, %v2602_v53  ;;  %2490 = vst.msk [vmem:[#allocation3 + $0x148] sm:$0xff] %vm380_vm1, %v2031_v59  ;;  %2476 = vst.msk [vmem:[#allocation3 + $0x68] sm:$0xff] %vm380_vm1, %v6642_v1  ;;  %v3360_v63 = vld [vmem:[#allocation10 + $0x198] sm:$0xff]  ;;  %v2576_v53 = vld [vmem:[#allocation10] sm:$0xff] }
 0x1f8   : > { %1918 = vrot.lane.b32.xlu1 %v7940_v28, %s4717_s15  ;;  %2222 = vrot.lane.b32.xlu0 %v6252_v51, %s4719_s30  ;;  %v1905_v16 = vpop.permute.xlu1 %1904  ;;  %v2067_v19 = vpop.permute.xlu0 %2066 }
 0x1f9   : > { %1981 = vst.msk [vmem:[#allocation3 + $0x150] sm:$0xff] %vm380_vm1, %v1905_v16  ;;  %v4312_v16 = vpack.c.bf16 %v3360_v63, %v3359_v58 }
 0x1fa   : > { %2147 = vst.msk [vmem:[#allocation3 + $0x130] sm:$0x7f] %vm2136_vm14, %v2067_v19 }
 0x1fb   : > { %2173 = vst.msk [vmem:[#allocation3 + $0x157] sm:$0x1] %vm2166_vm11, %v7909_v30 }
 0x1fc   : > { %2375 = vrot.lane.b32.xlu1 %v6560_v33, %s4718_s7  ;;  %2084 = vrot.lane.b32.xlu0 %v2031_v59, %s4719_s30  ;;  %v2362_v9 = vpop.permute.xlu1 %2361  ;;  %v2207_v22 = vpop.permute.xlu0 %2206  ;;  %v2577_v59 = vld [vmem:[#allocation10 + $0x8] sm:$0xff] }
 0x1fd   : > { %2430 = vst.msk [vmem:[#allocation3 + $0x158] sm:$0xff] %vm374_vm0, %v2362_v9 }
 0x1fe   : > { %2293 = vst.msk [vmem:[#allocation3 + $0x40] sm:$0xfe] %vm2288_vm15, %v2207_v22  ;;  %v2606_v22 = vld [vmem:[#allocation3 + $0x68] sm:$0xff] }
 0x1ff   : > { %2491 = vst.msk [vmem:[#allocation3 + $0x158] sm:$0x7f] %vm2470_vm12, %v6623_v57 }
 0x200   : > { %2511 = vst.msk [vmem:[#allocation3 + $0x15f] sm:$0x1] %vm2500_vm13, %v7909_v30  ;;  %1888 = vrot.lane.b32.xlu1 %v7937_v2, %s4717_s15  ;;  %2254 = vrot.lane.b32.xlu0 %v6570_v54, %s4719_s30  ;;  %v1907_v51 = vpop.permute.xlu1 %1906  ;;  %v2071_v43 = vpop.permute.xlu0 %2070  ;;  %v2604_v54 = vld [vmem:[#allocation3 + $0x58] sm:$0xff] }
 0x201   : > { %1982 = vst.msk [vmem:[#allocation3 + $0x160] sm:$0xff] %vm380_vm1, %v1907_v51  ;;  %v4273_v51 = vpack.c.bf16 %v2577_v59, %v2576_v53  ;;  %v2583_v59 = vld [vmem:[#allocation10 + $0x38] sm:$0xff] }
 0x202   : > { %2149 = vst.msk [vmem:[#allocation3 + $0x150] sm:$0x7f] %vm2136_vm14, %v2071_v43  ;;  %v2634_v43 = vld [vmem:[#allocation3 + $0x148] sm:$0xff] }
 0x204   : > { %2345 = vrot.lane.b32.xlu1 %v5781_v31, %s4718_s7  ;;  %2054 = vrot.lane.b32.xlu0 %v2006_v42, %s4719_s30  ;;  %v2364_v2 = vpop.permute.xlu1 %2363  ;;  %v2211_v62 = vpop.permute.xlu0 %2210 }
 0x205   : > { %v2601_v12 = vld [vmem:[#allocation3 + $0x40] sm:$0xff]  ;;  %2431 = vst.msk [vmem:[#allocation3 + $0x168] sm:$0xff] %vm374_vm0, %v2364_v2  ;;  %v3362_v2 = vld [vmem:[#allocation10 + $0x1a8] sm:$0xff] }
 0x206   : > { %2295 = vst.msk [vmem:[#allocation3 + $0x60] sm:$0xfe] %vm2288_vm15, %v2211_v62  ;;  %2841 = vmatmul.mubr.f32.vlgmr.msra.gmra.mrb[0].mxu0 %v2601_v12 }
 0x207   : > { %4141 = vmatprep.mubr.msk.f32.mxu0 %vm1708_vm7, %v2604_v54  ;;  %2492 = vst.msk [vmem:[#allocation3 + $0x168] sm:$0xff] %vm380_vm1, %v6682_v26 }
 0x208   : > { %1920 = vrot.lane.b32.xlu1 %v7939_v21, %s4717_s15  ;;  %2224 = vrot.lane.b32.xlu0 %v6395_v27, %s4719_s30  ;;  %v2239_v31 = vpop.permute.xlu1 %2238  ;;  %v2069_v42 = vpop.permute.xlu0 %2068  ;;  %v3358_v21 = vld [vmem:[#allocation10 + $0x188] sm:$0xff] }
 0x209   : > { %2148 = vst.msk [vmem:[#allocation3 + $0x140] sm:$0xff] %vm2134_vm2, %v2069_v42  ;;  %v4309_v27 = vpack.c.bf16 %v3358_v21, %v3357_v52  ;;  %v2636_v21 = vld [vmem:[#allocation3 + $0x158] sm:$0xff] }
 0x20a   : > { %2193 = vst.msk [vmem:[#allocation3 + $0x140] sm:$0x1] %vm2182_vm10, %v7909_v30 }
 0x20b   : > { %2309 = vst.msk [vmem:[#allocation3 + $0x140] sm:$0xfe] %vm2288_vm15, %v2239_v31  ;;  %4310 = vmatpush1.bf16.msra.mxu0 %v4309_v27 }
 0x20c   : > { %2377 = vrot.lane.b32.xlu1 %v6587_v38, %s4718_s7  ;;  %2086 = vrot.lane.b32.xlu0 %v6623_v57, %s4719_s30  ;;  %v2237_v28 = vpop.permute.xlu1 %2236  ;;  %v2209_v18 = vpop.permute.xlu0 %2208 }
 0x20d   : > { %2308 = vst.msk [vmem:[#allocation3 + $0x130] sm:$0xff] %vm1706_vm3, %v2237_v28  ;;  %2294 = vst.msk [vmem:[#allocation3 + $0x50] sm:$0xff] %vm1706_vm3, %v2209_v18  ;;  %4311 = vmatprep.subr.bf16.mxu0 %v7934_v0  ;;  %v2605_v54 = vld [vmem:[#allocation3 + $0x60] sm:$0xff]  ;;  %v2581_v28 = vld [vmem:[#allocation10 + $0x28] sm:$0xff] }
 0x20e   : > { %v3364_v18 = vld [vmem:[#allocation10 + $0x1b8] sm:$0xff] }
 0x20f   : > { %4313 = vmatpush1.bf16.msra.mxu0 %v4312_v16  ;;  %v3365_v16 = vld [vmem:[#allocation10 + $0x1c0] sm:$0xff] }
 0x210   : > { %1890 = vrot.lane.b32.xlu1 %v7941_v14, %s4717_s15  ;;  %2256 = vrot.lane.b32.xlu0 %v6598_v56, %s4719_s30  ;;  %v2241_v39 = vpop.permute.xlu1 %2240  ;;  %v2073_v57 = vpop.permute.xlu0 %2072 }
 0x211   : > { %2310 = vst.msk [vmem:[#allocation3 + $0x150] sm:$0xff] %vm1706_vm3, %v2241_v39  ;;  %4314 = vmatprep.subr.bf16.mxu0 %v7934_v0 }
 0x212   : > { %2150 = vst.msk [vmem:[#allocation3 + $0x160] sm:$0xff] %vm2134_vm2, %v2073_v57  ;;  %v2633_v31 = vld [vmem:[#allocation3 + $0x140] sm:$0xff]  ;;  %v2638_v57 = vld [vmem:[#allocation3 + $0x168] sm:$0xff] }
 0x213   : > { %2194 = vst.msk [vmem:[#allocation3 + $0x160] sm:$0x1] %vm2182_vm10, %v7909_v30 }
 0x214   : > { %2347 = vrot.lane.b32.xlu1 %v5895_v32, %s4718_s7  ;;  %2056 = vrot.lane.b32.xlu0 %v6642_v1, %s4719_s30  ;;  %v2243_v56 = vpop.permute.xlu1 %2242  ;;  %v2334_v14 = vpop.permute.xlu0 %2333  ;;  %v2603_v19 = vld [vmem:[#allocation3 + $0x50] sm:$0xff]  ;;  %v2578_v32 = vld [vmem:[#allocation10 + $0x10] sm:$0xff] }
 0x215   : > { %v2631_v9 = vld [vmem:[#allocation3 + $0x130] sm:$0xff]  ;;  %2311 = vst.msk [vmem:[#allocation3 + $0x160] sm:$0xfe] %vm2288_vm15, %v2243_v56  ;;  %2846 = vmatmul.mubr.f32.gmra.mrb[2].mxu0 %v2603_v19  ;;  %v4276_v42 = vpack.c.bf16 %v2579_v15, %v2578_v32  ;;  %v2011_v15 = vrot.slane %v6096_v4, 1 }
 0x216   : > { %2416 = vst.msk [vmem:[#allocation3 + $0x78] sm:$0xff] %vm374_vm0, %v2334_v14  ;;  %2916 = vmatmul.mubr.f32.vlgmr.msra.gmra.mrb[0].mxu1 %v2631_v9  ;;  %4142 = vmatprep.mubr.msk.f32.mxu0 %vm1708_vm7, %v2606_v22  ;;  %v3361_v1 = vld [vmem:[#allocation10 + $0x1a0] sm:$0xff] }
 0x217   : > { %2477 = vst.msk [vmem:[#allocation3 + $0x78] sm:$0x7f] %vm2470_vm12, %v6626_v61  ;;  %4156 = vmatprep.mubr.msk.f32.mxu1 %vm1708_vm7, %v2634_v43  ;;  %4274 = vmatpush1.bf16.msra.mxu1 %v4273_v51  ;;  %v4315_v52 = vpack.c.bf16 %v3362_v2, %v3361_v1  ;;  %v3366_v51 = vld [vmem:[#allocation10 + $0x1c8] sm:$0xff]  ;;  %v3367_v1 = vld [vmem:[#allocation10 + $0x1d0] sm:$0xff]  ;;  %v3368_v2 = vld [vmem:[#allocation10 + $0x1d8] sm:$0xff] }
 0x218   : > { %2504 = vst.msk [vmem:[#allocation3 + $0x7f] sm:$0x1] %vm2500_vm13, %v7909_v30  ;;  %2226 = vrot.lane.b32.xlu1 %v6457_v29, %s4719_s30  ;;  %1922 = vrot.lane.b32.xlu0 %v7943_v40, %s4717_s15  ;;  %v1909_v62 = vpop.permute.xlu1 %1908  ;;  %v2213_v12 = vpop.permute.xlu0 %2212  ;;  %v2580_v29 = vld [vmem:[#allocation10 + $0x20] sm:$0xff]  ;;  %v3363_v40 = vld [vmem:[#allocation10 + $0x1b0] sm:$0xff]  ;;  %v2585_v43 = vld [vmem:[#allocation10 + $0x48] sm:$0xff]  ;;  %v4321_v32 = vpack.c.bf16 %v3366_v51, %v3365_v16 }
 0x219   : > { %1983 = vst.msk [vmem:[#allocation3 + $0x170] sm:$0xff] %vm380_vm1, %v1909_v62  ;;  %2851 = vmatmul.mubr.f32.gmra.mrb[4].mxu0 %v2605_v54  ;;  %4275 = vmatprep.subr.bf16.mxu1 %v7934_v0  ;;  %v2635_v39 = vld [vmem:[#allocation3 + $0x150] sm:$0xff]  ;;  %v4279_v63 = vpack.c.bf16 %v2581_v28, %v2580_v29  ;;  %v2590_v16 = vld [vmem:[#allocation10 + $0x70] sm:$0xff] }
 0x21a   : > { %2296 = vst.msk [vmem:[#allocation3 + $0x70] sm:$0xff] %vm1706_vm3, %v2213_v12  ;;  %2921 = vmatmul.mubr.f32.gmra.mrb[2].mxu1 %v2633_v31  ;;  %4316 = vmatpush1.bf16.msra.mxu0 %v4315_v52  ;;  %v4324_v52 = vpack.c.bf16 %v3368_v2, %v3367_v1  ;;  %v3374_v1 = vld [vmem:[#allocation10 + $0x208] sm:$0xff] }
 0x21b   : > { %2174 = vst.msk [vmem:[#allocation3 + $0x177] sm:$0x1] %vm2166_vm11, %v7909_v30  ;;  %4157 = vmatprep.mubr.msk.f32.mxu1 %vm1708_vm7, %v2636_v21  ;;  %4277 = vmatpush1.bf16.msra.mxu1 %v4276_v42  ;;  %v2587_v42 = vld [vmem:[#allocation10 + $0x58] sm:$0xff] }
 0x21c   : > { %1892 = vrot.lane.b32.xlu1 %v5987_v34, %s4717_s15  ;;  %2088 = vrot.lane.b32.xlu0 %v6682_v26, %s4719_s30  ;;  %v2366_v27 = vpop.permute.xlu1 %2365  ;;  %v2075_v58 = vpop.permute.xlu0 %2074  ;;  %v2582_v34 = vld [vmem:[#allocation10 + $0x30] sm:$0xff]  ;;  %v4318_v26 = vpack.c.bf16 %v3364_v18, %v3363_v40  ;;  %v6780_v18 = vrot.slane %v6297_v6, 1 }
 0x21d   : > { %2432 = vst.msk [vmem:[#allocation3 + $0x178] sm:$0xff] %vm374_vm0, %v2366_v27  ;;  %4278 = vmatprep.subr.bf16.mxu1 %v7934_v0  ;;  %v2637_v9 = vld [vmem:[#allocation3 + $0x160] sm:$0xff]  ;;  %v4282_v22 = vpack.c.bf16 %v2583_v59, %v2582_v34  ;;  %4317 = vmatprep.subr.bf16.mxu0 %v7934_v0  ;;  %v2589_v27 = vld [vmem:[#allocation10 + $0x68] sm:$0xff] }
 0x21e   : > { %2151 = vst.msk [vmem:[#allocation3 + $0x170] sm:$0x7f] %vm2136_vm14, %v2075_v58  ;;  %2926 = vmatmul.mubr.f32.gmra.mrb[4].mxu1 %v2635_v39  ;;  %4319 = vmatpush1.bf16.msra.mxu0 %v4318_v26  ;;  %v3369_v39 = vld [vmem:[#allocation10 + $0x1e0] sm:$0xff] }
 0x21f   : > { %v2608_v53 = vld [vmem:[#allocation3 + $0x78] sm:$0xff]  ;;  %2493 = vst.msk [vmem:[#allocation3 + $0x178] sm:$0x7f] %vm2470_vm12, %v6672_v41  ;;  %4158 = vmatprep.mubr.msk.f32.mxu1 %vm1708_vm7, %v2638_v57  ;;  %4280 = vmatpush1.bf16.msra.mxu1 %v4279_v63 }
 0x220   : > { %2512 = vst.msk [vmem:[#allocation3 + $0x17f] sm:$0x1] %vm2500_vm13, %v7909_v30  ;;  %4143 = vmatprep.mubr.msk.f32.mxu0 %vm1708_vm7, %v2608_v53  ;;  %2349 = vrot.lane.b32.xlu1 %v5952_v55, %s4718_s7  ;;  %v2245_v56 = vpop.permute.xlu0 %2244  ;;  %v6754_v55 = vrot.slane %v6284_v37, 1  ;;  %v3370_v57 = vld [vmem:[#allocation10 + $0x1e8] sm:$0xff] }
 0x221   : > { %2058 = vrot.lane.b32.xlu0 %v6626_v61, %s4719_s30  ;;  %v1879_v14 = vpop.permute.xlu1 %1878  ;;  %v2607_v19 = vld [vmem:[#allocation3 + $0x70] sm:$0xff]  ;;  %2312 = vst.msk [vmem:[#allocation3 + $0x170] sm:$0xff] %vm1706_vm3, %v2245_v56  ;;  %4281 = vmatprep.subr.bf16.mxu1 %v7934_v0  ;;  %v4327_v59 = vpack.c.bf16 %v3370_v57, %v3369_v39  ;;  %v2591_v56 = vld [vmem:[#allocation10 + $0x78] sm:$0xff]  ;;  %v3378_v39 = vld [vmem:[#allocation10 + $0x228] sm:$0xff] }
 0x222   : > { %1968 = vst.msk [vmem:[#allocation3 + $0x80] sm:$0xff] %vm380_vm1, %v1879_v14  ;;  %2856 = vmatmul.mubr.f32.gmra.mrb[6].mxu0 %v2607_v19  ;;  %2931 = vmatmul.mubr.f32.gmra.mrb[6].mxu1 %v2637_v9  ;;  %v2584_v61 = vld [vmem:[#allocation10 + $0x40] sm:$0xff]  ;;  %v3371_v14 = vld [vmem:[#allocation10 + $0x1f0] sm:$0xff]  ;;  %v3372_v19 = vld [vmem:[#allocation10 + $0x1f8] sm:$0xff] }
 0x223   : > { %4283 = vmatpush1.bf16.msra.mxu1 %v4282_v22  ;;  %v4285_v54 = vpack.c.bf16 %v2585_v43, %v2584_v61  ;;  %4320 = vmatprep.subr.bf16.mxu0 %v7934_v0  ;;  %v4294_v61 = vpack.c.bf16 %v2591_v56, %v2590_v16  ;;  %v4330_v43 = vpack.c.bf16 %v3372_v19, %v3371_v14  ;;  %v2598_v57 = vld [vmem:[#allocation10 + $0xb0] sm:$0xff]  ;;  %v3380_v14 = vld [vmem:[#allocation10 + $0x238] sm:$0xff] }
 0x224   : > { %2228 = vrot.lane.b32.xlu1 %v6503_v3, %s4719_s30  ;;  %v2013_v3 = vsel %vm1998_vm6, %v2011_v15, %v6754_v55  ;;  %4284 = vmatprep.subr.bf16.mxu1 %v7934_v0  ;;  %v3373_v15 = vld [vmem:[#allocation10 + $0x200] sm:$0xff]  ;;  %v3379_v56 = vld [vmem:[#allocation10 + $0x230] sm:$0xff] }
 0x225   : > { %1924 = vrot.lane.b32.xlu0 %v7942_v50, %s4717_s15  ;;  %v2336_v62 = vpop.permute.xlu1 %2335  ;;  %v2586_v50 = vld [vmem:[#allocation10 + $0x50] sm:$0xff]  ;;  %4322 = vmatpush1.bf16.msra.mxu0 %v4321_v32  ;;  %v2593_v32 = vld [vmem:[#allocation10 + $0x88] sm:$0xff] }
 0x226   : > { %v2045_v12 = vpop.permute.xlu0 %2044  ;;  %2417 = vst.msk [vmem:[#allocation3 + $0x88] sm:$0xff] %vm374_vm0, %v2336_v62  ;;  %v4288_v40 = vpack.c.bf16 %v2587_v42, %v2586_v50  ;;  %4323 = vmatprep.subr.bf16.mxu0 %v7934_v0  ;;  %v3375_v50 = vld [vmem:[#allocation10 + $0x210] sm:$0xff] }
 0x227   : > { %2135 = vst.msk [vmem:[#allocation3 + $0x80] sm:$0xff] %vm2134_vm2, %v2045_v12  ;;  %v2640_v31 = vld [vmem:[#allocation3 + $0x178] sm:$0xff]  ;;  %4286 = vmatpush1.bf16.msra.mxu1 %v4285_v54  ;;  %v4333_v54 = vpack.c.bf16 %v3374_v1, %v3373_v15  ;;  %v2039_v15 = vrot.slane %v6499_v23, 1  ;;  %v2038_v1 = vrot.slane %v6415_v47, 1 }
 0x228   : > { %2187 = vst.msk [vmem:[#allocation3 + $0x80] sm:$0x1] %vm2182_vm10, %v7909_v30  ;;  %4159 = vmatprep.mubr.msk.f32.mxu1 %vm1708_vm7, %v2640_v31  ;;  %1894 = vrot.lane.b32.xlu1 %v6096_v4, %s4717_s15  ;;  %v2639_v28 = vld [vmem:[#allocation3 + $0x170] sm:$0xff] }
 0x229   : > { %2478 = vst.msk [vmem:[#allocation3 + $0x88] sm:$0xff] %vm380_vm1, %v2013_v3  ;;  %2090 = vrot.lane.b32.xlu0 %v6672_v41, %s4719_s30  ;;  %v1911_v21 = vpop.permute.xlu1 %1910  ;;  %2936 = vmatmul.mubr.f32.gmra.mrb[8].mxu1 %v2639_v28  ;;  %v2588_v4 = vld [vmem:[#allocation10 + $0x60] sm:$0xff]  ;;  %v7944_v41 = vld [vmem:[#allocation19_spill] sm:$0xff]  ;;  %v3376_v28 = vld [vmem:[#allocation10 + $0x218] sm:$0xff] }
 0x22a   : > { %v2215_v29 = vpop.permute.xlu0 %2214  ;;  %1984 = vst.msk [vmem:[#allocation3 + $0x180] sm:$0xff] %vm380_vm1, %v1911_v21  ;;  %4287 = vmatprep.subr.bf16.mxu1 %v7934_v0  ;;  %4325 = vmatpush1.bf16.msra.mxu0 %v4324_v52  ;;  %v2035_v58 = vrot.slane %v7944_v41, 1  ;;  %v4291_v34 = vpack.c.bf16 %v2589_v27, %v2588_v4 }
 0x22b   : > { %2297 = vst.msk [vmem:[#allocation3 + $0x80] sm:$0xfe] %vm2288_vm15, %v2215_v29  ;;  %4289 = vmatpush1.bf16.msra.mxu1 %v4288_v40  ;;  %4326 = vmatprep.subr.bf16.mxu0 %v7934_v0  ;;  %v2597_v40 = vld [vmem:[#allocation10 + $0xa8] sm:$0xff] }
 0x22c   : > { %2351 = vrot.lane.b32.xlu1 %v6150_v13, %s4718_s7  ;;  %v2037_v13 = vsel %vm1998_vm6, %v2035_v58, %v6780_v18  ;;  %4290 = vmatprep.subr.bf16.mxu1 %v7934_v0 }
 0x22d   : > { %2060 = vrot.lane.b32.xlu0 %v2013_v3, %s4719_s30  ;;  %v2595_v3 = vld [vmem:[#allocation10 + $0x98] sm:$0xff] }
 0x22e   : > { %v2368_v63 = vpop.permute.xlu1 %2367  ;;  %v2077_v53 = vpop.permute.xlu0 %2076  ;;  %4328 = vmatpush1.bf16.msra.mxu0 %v4327_v59 }
 0x22f   : > { %2433 = vst.msk [vmem:[#allocation3 + $0x188] sm:$0xff] %vm374_vm0, %v2368_v63  ;;  %4292 = vmatpush1.bf16.msra.mxu1 %v4291_v34  ;;  %4329 = vmatprep.subr.bf16.mxu0 %v7934_v0 }
 0x230   : > { %2152 = vst.msk [vmem:[#allocation3 + $0x180] sm:$0xff] %vm2134_vm2, %v2077_v53  ;;  %v6790_v26 = vld [vmem:[#allocation3 + $0x88] sm:$0xff]  ;;  %2230 = vrot.lane.b32.xlu1 %v6506_v24, %s4719_s30  ;;  %4293 = vmatprep.subr.bf16.mxu1 %v7934_v0  ;;  %v2592_v24 = vld [vmem:[#allocation10 + $0x80] sm:$0xff] }
 0x231   : > { %2195 = vst.msk [vmem:[#allocation3 + $0x180] sm:$0x1] %vm2182_vm10, %v7909_v30  ;;  %4144 = vmatprep.mubr.msk.f32.mxu0 %vm1708_vm7, %v6790_v26  ;;  %1926 = vrot.lane.b32.xlu0 %v7944_v41, %s4717_s15  ;;  %v4297_v12 = vpack.c.bf16 %v2593_v32, %v2592_v24 }
 0x232   : > { %2494 = vst.msk [vmem:[#allocation3 + $0x188] sm:$0xff] %vm380_vm1, %v2037_v13  ;;  %v1881_v9 = vpop.permute.xlu1 %1880  ;;  %v2247_v22 = vpop.permute.xlu0 %2246  ;;  %v6804_v51 = vld [vmem:[#allocation3 + $0x80] sm:$0xff]  ;;  %4331 = vmatpush1.bf16.msra.mxu0 %v4330_v43  ;;  %v7947_v43 = vld [vmem:[#allocation29_spill] sm:$0xff] }
 0x233   : > { %1969 = vst.msk [vmem:[#allocation3 + $0x90] sm:$0xff] %vm380_vm1, %v1881_v9  ;;  %2861 = vmatmul.mubr.f32.gmra.mrb[8].mxu0 %v6804_v51  ;;  %4295 = vmatpush1.bf16.msra.mxu1 %v4294_v61 }
 0x234   : > { %2313 = vst.msk [vmem:[#allocation3 + $0x180] sm:$0xfe] %vm2288_vm15, %v2247_v22  ;;  %1896 = vrot.lane.b32.xlu1 %v6284_v37, %s4717_s15  ;;  %4332 = vmatprep.subr.bf16.mxu0 %v7934_v0  ;;  %v2594_v37 = vld [vmem:[#allocation10 + $0x90] sm:$0xff]  ;;  %v4342_v22 = vpack.c.bf16 %v3380_v14, %v3379_v56 }
 0x235   : > { %2167 = vst.msk [vmem:[#allocation3 + $0x97] sm:$0x1] %vm2166_vm11, %v7909_v30  ;;  %2092 = vrot.lane.b32.xlu0 %v2037_v13, %s4719_s30  ;;  %4296 = vmatprep.subr.bf16.mxu1 %v7934_v0  ;;  %v4300_v29 = vpack.c.bf16 %v2595_v3, %v2594_v37  ;;  %v2599_v13 = vld [vmem:[#allocation10 + $0xb8] sm:$0xff] }
 0x236   : > { %v2338_v2 = vpop.permute.xlu1 %2337  ;;  %v2047_v62 = vpop.permute.xlu0 %2046  ;;  %4334 = vmatpush1.bf16.msra.mxu0 %v4333_v54 }
 0x237   : > { %2418 = vst.msk [vmem:[#allocation3 + $0x98] sm:$0xff] %vm374_vm0, %v2338_v2  ;;  %4298 = vmatpush1.bf16.msra.mxu1 %v4297_v12  ;;  %4335 = vmatprep.subr.bf16.mxu0 %v7934_v0  ;;  %v2040_v12 = vsel %vm1998_vm6, %v2038_v1, %v2039_v15 }
 0x238   : > { %2137 = vst.msk [vmem:[#allocation3 + $0x90] sm:$0x7f] %vm2136_vm14, %v2047_v62  ;;  %2353 = vrot.lane.b32.xlu1 %v6261_v20, %s4718_s7  ;;  %4299 = vmatprep.subr.bf16.mxu1 %v7934_v0  ;;  %v4336_v20 = vpack.c.bf16 %v3376_v28, %v3375_v50 }
 0x239   : > { %v2642_v31 = vld [vmem:[#allocation3 + $0x188] sm:$0xff]  ;;  %2479 = vst.msk [vmem:[#allocation3 + $0x98] sm:$0x7f] %vm2470_vm12, %v6754_v55  ;;  %2062 = vrot.lane.b32.xlu0 %v6754_v55, %s4719_s30  ;;  %v2596_v55 = vld [vmem:[#allocation10 + $0xa0] sm:$0xff] }
 0x23a   : > { %2505 = vst.msk [vmem:[#allocation3 + $0x9f] sm:$0x1] %vm2500_vm13, %v7909_v30  ;;  %4160 = vmatprep.mubr.msk.f32.mxu1 %vm1708_vm7, %v2642_v31  ;;  %v1913_v42 = vpop.permute.xlu1 %1912  ;;  %v2217_v52 = vpop.permute.xlu0 %2216  ;;  %4337 = vmatpush1.bf16.msra.mxu0 %v4336_v20  ;;  %v4303_v41 = vpack.c.bf16 %v2597_v40, %v2596_v55  ;;  %v7948_v40 = vld [vmem:[#allocation73_spill] sm:$0xff] }
 0x23b   : > { %v2641_v21 = vld [vmem:[#allocation3 + $0x180] sm:$0xff]  ;;  %1985 = vst.msk [vmem:[#allocation3 + $0x190] sm:$0xff] %vm380_vm1, %v1913_v42  ;;  %4301 = vmatpush1.bf16.msra.mxu1 %v4300_v29  ;;  %4338 = vmatprep.subr.bf16.mxu0 %v7934_v0  ;;  %v2042_v42 = vrot.slane %v6587_v38, 1 }
 0x23c   : > { %2298 = vst.msk [vmem:[#allocation3 + $0x90] sm:$0xff] %vm1706_vm3, %v2217_v52  ;;  %2941 = vmatmul.mubr.f32.gmra.mrb[10].mxu1 %v2641_v21  ;;  %2232 = vrot.lane.b32.xlu1 %v6543_v11, %s4719_s30  ;;  %v3377_v11 = vld [vmem:[#allocation10 + $0x220] sm:$0xff] }
 0x23d   : > { %2175 = vst.msk [vmem:[#allocation3 + $0x197] sm:$0x1] %vm2166_vm11, %v7909_v30  ;;  %1928 = vrot.lane.b32.xlu0 %v6297_v6, %s4717_s15  ;;  %4302 = vmatprep.subr.bf16.mxu1 %v7934_v0  ;;  %v2014_v6 = vrot.slane %v6289_v44, 1  ;;  %v4339_v59 = vpack.c.bf16 %v3378_v39, %v3377_v11 }
 0x23e   : > { %v2370_v4 = vpop.permute.xlu1 %2369  ;;  %v2079_v27 = vpop.permute.xlu0 %2078 }
 0x23f   : > { %2434 = vst.msk [vmem:[#allocation3 + $0x198] sm:$0xff] %vm374_vm0, %v2370_v4  ;;  %4304 = vmatpush1.bf16.msra.mxu1 %v4303_v41  ;;  %4340 = vmatpush1.bf16.msra.mxu0 %v4339_v59 }
 0x240   : > { %2153 = vst.msk [vmem:[#allocation3 + $0x190] sm:$0x7f] %vm2136_vm14, %v2079_v27  ;;  %1898 = vrot.lane.b32.xlu1 %v6289_v44, %s4717_s15  ;;  %4305 = vmatprep.subr.bf16.mxu1 %v7934_v0  ;;  %v4306_v44 = vpack.c.bf16 %v2599_v13, %v2598_v57 }
 0x241   : > { %v6841_v58 = vld [vmem:[#allocation3 + $0x98] sm:$0xff]  ;;  %2495 = vst.msk [vmem:[#allocation3 + $0x198] sm:$0x7f] %vm2470_vm12, %v6780_v18  ;;  %2094 = vrot.lane.b32.xlu0 %v6780_v18, %s4719_s30  ;;  %v7945_v18 = vld [vmem:[#allocation61_spill] sm:$0xff]  ;;  %4341 = vmatprep.subr.bf16.mxu0 %v7934_v0 }
 0x242   : > { %2513 = vst.msk [vmem:[#allocation3 + $0x19f] sm:$0x1] %vm2500_vm13, %v7909_v30  ;;  %4145 = vmatprep.mubr.msk.f32.mxu0 %vm1708_vm7, %v6841_v58  ;;  %v1883_v63 = vpop.permute.xlu1 %1882  ;;  %v2249_v53 = vpop.permute.xlu0 %2248  ;;  %v2016_v16 = vsel %vm1998_vm6, %v2014_v6, %v7945_v18 }
 0x243   : > { %v6856_v34 = vld [vmem:[#allocation3 + $0x90] sm:$0xff]  ;;  %1970 = vst.msk [vmem:[#allocation3 + $0xa0] sm:$0xff] %vm380_vm1, %v1883_v63  ;;  %4307 = vmatpush1.bf16.msra.mxu1 %v4306_v44  ;;  %4343 = vmatpush1.bf16.msra.mxu0 %v4342_v22  ;;  %v7949_v44 = vld [vmem:[#allocation69_spill] sm:$0xff] }
 0x244   : > { %2314 = vst.msk [vmem:[#allocation3 + $0x190] sm:$0xff] %vm1706_vm3, %v2249_v53  ;;  %2866 = vmatmul.mubr.f32.gmra.mrb[10].mxu0 %v6856_v34  ;;  %2355 = vrot.lane.b32.xlu1 %v7936_v7, %s4718_s7  ;;  %v7946_v7 = vld [vmem:[#allocation67_spill] sm:$0xff] }
 0x245   : > { %2064 = vrot.lane.b32.xlu0 %v2016_v16, %s4719_s30 }
 0x246   : > { %v2340_v19 = vpop.permute.xlu1 %2339  ;;  %v2049_v9 = vpop.permute.xlu0 %2048 }
 0x247   : > { %2419 = vst.msk [vmem:[#allocation3 + $0xa8] sm:$0xff] %vm374_vm0, %v2340_v19 }
 0x248   : > { %2138 = vst.msk [vmem:[#allocation3 + $0xa0] sm:$0xff] %vm2134_vm2, %v2049_v9  ;;  %2234 = vrot.lane.b32.xlu1 %v7946_v7, %s4719_s30 }
 0x249   : > { %v2644_v61 = vld [vmem:[#allocation3 + $0x198] sm:$0xff]  ;;  %2480 = vst.msk [vmem:[#allocation3 + $0xa8] sm:$0xff] %vm380_vm1, %v2016_v16  ;;  %2319 = vrot.lane.b32.xlu0 %v7947_v43, %s4718_s7 }
 0x24a   : > { %2188 = vst.msk [vmem:[#allocation3 + $0xa0] sm:$0x1] %vm2182_vm10, %v7909_v30  ;;  %4161 = vmatprep.mubr.msk.f32.mxu1 %vm1708_vm7, %v2644_v61  ;;  %v1915_v0 = vpop.permute.xlu1 %1914  ;;  %v2219_v24 = vpop.permute.xlu0 %2218 }
 0x24b   : > { %v2643_v32 = vld [vmem:[#allocation3 + $0x190] sm:$0xff]  ;;  %1986 = vst.msk [vmem:[#allocation3 + $0x1a0] sm:$0xff] %vm380_vm1, %v1915_v0 }
 0x24c   : > { %2299 = vst.msk [vmem:[#allocation3 + $0xa0] sm:$0xfe] %vm2288_vm15, %v2219_v24  ;;  %2946 = vmatmul.mubr.f32.gmra.mrb[12].mxu1 %v2643_v32  ;;  %2198 = vrot.lane.b32.xlu1 %v6094_v48, %s4719_s30  ;;  %v7950_v32 = vld [vmem:[#allocation18_spill] sm:$0xff] }
 0x24d   : > { %2321 = vrot.lane.b32.xlu0 %v6124_v35, %s4718_s7 }
 0x24e   : > { %v2372_v2 = vpop.permute.xlu1 %2371  ;;  %v2081_v62 = vpop.permute.xlu0 %2080 }
 0x24f   : > { %2435 = vst.msk [vmem:[#allocation3 + $0x1a8] sm:$0xff] %vm374_vm0, %v2372_v2 }
 0x250   : > { %2154 = vst.msk [vmem:[#allocation3 + $0x1a0] sm:$0xff] %vm2134_vm2, %v2081_v62  ;;  %v6889_v54 = vld [vmem:[#allocation3 + $0xa8] sm:$0xff]  ;;  %2200 = vrot.lane.b32.xlu1 %v6533_v25, %s4719_s30 }
 0x251   : > { %2496 = vst.msk [vmem:[#allocation3 + $0x1a8] sm:$0xff] %vm380_vm1, %v2040_v12  ;;  %4146 = vmatprep.mubr.msk.f32.mxu0 %vm1708_vm7, %v6889_v54  ;;  %2323 = vrot.lane.b32.xlu0 %v6365_v46, %s4718_s7 }
 0x252   : > { %2196 = vst.msk [vmem:[#allocation3 + $0x1a0] sm:$0x1] %vm2182_vm10, %v7909_v30  ;;  %v1885_v48 = vpop.permute.xlu1 %1884  ;;  %v2251_v35 = vpop.permute.xlu0 %2250 }
 0x253   : > { %v6900_v31 = vld [vmem:[#allocation3 + $0xa0] sm:$0xff]  ;;  %1971 = vst.msk [vmem:[#allocation3 + $0xb0] sm:$0xff] %vm380_vm1, %v1885_v48 }
 0x254   : > { %2315 = vst.msk [vmem:[#allocation3 + $0x1a0] sm:$0xfe] %vm2288_vm15, %v2251_v35  ;;  %2871 = vmatmul.mubr.f32.gmra.mrb[12].mxu0 %v6900_v31  ;;  %2202 = vrot.lane.b32.xlu1 %v6373_v5, %s4719_s30 }
 0x255   : > { %2168 = vst.msk [vmem:[#allocation3 + $0xb7] sm:$0x1] %vm2166_vm11, %v7909_v30  ;;  %2325 = vrot.lane.b32.xlu0 %v6423_v10, %s4718_s7 }
 0x256   : > { %v2342_v46 = vpop.permute.xlu1 %2341  ;;  %v2051_v25 = vpop.permute.xlu0 %2050 }
 0x257   : > { %2420 = vst.msk [vmem:[#allocation3 + $0xb8] sm:$0xff] %vm374_vm0, %v2342_v46 }
 0x258   : > { %2139 = vst.msk [vmem:[#allocation3 + $0xb0] sm:$0x7f] %vm2136_vm14, %v2051_v25  ;;  %v2646_v37 = vld [vmem:[#allocation3 + $0x1a8] sm:$0xff]  ;;  %2204 = vrot.lane.b32.xlu1 %v6564_v49, %s4719_s30 }
 0x259   : > { %2481 = vst.msk [vmem:[#allocation3 + $0xb8] sm:$0x7f] %vm2470_vm12, %v7945_v18  ;;  %4162 = vmatprep.mubr.msk.f32.mxu1 %vm1708_vm7, %v2646_v37  ;;  %1930 = vrot.lane.b32.xlu0 %v6415_v47, %s4717_s15 }
 0x25a   : > { %2506 = vst.msk [vmem:[#allocation3 + $0xbf] sm:$0x1] %vm2500_vm13, %v7909_v30  ;;  %v1917_v5 = vpop.permute.xlu1 %1916  ;;  %v2221_v3 = vpop.permute.xlu0 %2220 }
 0x25b   : > { %v2645_v10 = vld [vmem:[#allocation3 + $0x1a0] sm:$0xff]  ;;  %1987 = vst.msk [vmem:[#allocation3 + $0x1b0] sm:$0xff] %vm380_vm1, %v1917_v5 }
 0x25c   : > { %2951 = vmatmul.mubr.f32.gmra.mrb[14].mxu1 %v2645_v10  ;;  %2176 = vst.msk [vmem:[#allocation3 + $0x1b7] sm:$0x1] %vm2166_vm11, %v7909_v30  ;;  %2096 = vrot.lane.b32.xlu1 %v2040_v12, %s4719_s30  ;;  %v7951_v5 = vld [vmem:[#allocation76_spill] sm:$0xff]  ;;  %v7051_v10 = vld [vmem:[#allocation3 + $0x1f8] sm:$0xff] }
 0x25d   : > { %2300 = vst.msk [vmem:[#allocation3 + $0xb0] sm:$0xff] %vm1706_vm3, %v2221_v3  ;;  %1932 = vrot.lane.b32.xlu0 %v6499_v23, %s4717_s15  ;;  %v2041_v23 = vrot.slane %v6560_v33, 1 }
 0x25e   : > { %v2374_v47 = vpop.permute.xlu1 %2373  ;;  %v2083_v49 = vpop.permute.xlu0 %2082 }
 0x25f   : > { %2436 = vst.msk [vmem:[#allocation3 + $0x1b8] sm:$0xff] %vm374_vm0, %v2374_v47  ;;  %v2043_v28 = vsel %vm1998_vm6, %v2041_v23, %v2042_v42 }
 0x260   : > { %2497 = vst.msk [vmem:[#allocation3 + $0x1b8] sm:$0x7f] %vm2470_vm12, %v2039_v15  ;;  %2098 = vrot.lane.b32.xlu1 %v2039_v15, %s4719_s30  ;;  %v7025_v15 = vld [vmem:[#allocation3 + $0x1e8] sm:$0xff] }
 0x261   : > { %v6930_v50 = vld [vmem:[#allocation3 + $0xb8] sm:$0xff]  ;;  %2514 = vst.msk [vmem:[#allocation3 + $0x1bf] sm:$0x1] %vm2500_vm13, %v7909_v30  ;;  %1934 = vrot.lane.b32.xlu0 %v6560_v33, %s4717_s15 }
 0x262   : > { %2155 = vst.msk [vmem:[#allocation3 + $0x1b0] sm:$0x7f] %vm2136_vm14, %v2083_v49  ;;  %4147 = vmatprep.mubr.msk.f32.mxu0 %vm1708_vm7, %v6930_v50  ;;  %v1887_v52 = vpop.permute.xlu1 %1886  ;;  %v2253_v21 = vpop.permute.xlu0 %2252 }
 0x263   : > { %1972 = vst.msk [vmem:[#allocation3 + $0xc0] sm:$0xff] %vm380_vm1, %v1887_v52 }
 0x264   : > { %v6944_v29 = vld [vmem:[#allocation3 + $0xb0] sm:$0xff]  ;;  %2316 = vst.msk [vmem:[#allocation3 + $0x1b0] sm:$0xff] %vm1706_vm3, %v2253_v21  ;;  %2100 = vrot.lane.b32.xlu1 %v2043_v28, %s4719_s30 }
 0x265   : > { %2876 = vmatmul.mubr.f32.gmra.mrb[14].mxu0 %v6944_v29  ;;  %1936 = vrot.lane.b32.xlu0 %v6587_v38, %s4717_s15  ;;  %s4635_s15 = scalar_lea.vmem %s4634_s14, 7680 }
 0x266   : > { %v2344_v33 = vpop.permute.xlu1 %2343  ;;  %v2053_v20 = vpop.permute.xlu0 %2052  ;;  %p4637_p5 = scmp.lt.s32.totalorder %s4635_s15, %s4629_s27 }
 0x267   : > { %2421 = vst.msk [vmem:[#allocation3 + $0xc8] sm:$0xff] %vm374_vm0, %v2344_v33 }
 0x268   : > { %v6953_v55 = vld [vmem:[#allocation3 + $0x1b8] sm:$0xff]  ;;  %2482 = vst.msk [vmem:[#allocation3 + $0xc8] sm:$0xff] %vm380_vm1, %v7948_v40  ;;  %2102 = vrot.lane.b32.xlu1 %v2042_v42, %s4719_s30  ;;  %v7077_v40 = vld [vmem:[#allocation3 + $0x208] sm:$0xff]  ;;  %p4638_p3 = por %p4637_p5, %p4636_p4 }
 0x269   : > { %2140 = vst.msk [vmem:[#allocation3 + $0xc0] sm:$0xff] %vm2134_vm2, %v2053_v20  ;;  %4163 = vmatprep.mubr.msk.f32.mxu1 %vm1708_vm7, %v6953_v55  ;;  %v7952_v20 = vld [vmem:[#allocation33_spill] sm:$0xff] }
 0x26a   : > { %2189 = vst.msk [vmem:[#allocation3 + $0xc0] sm:$0x1] %vm2182_vm10, %v7909_v30  ;;  %v1919_v38 = vpop.permute.xlu1 %1918  ;;  %v2223_v4 = vpop.permute.xlu0 %2222  ;;  %p4639_p7 = pnand %p4638_p3, %p4632_p10 }
 0x26b   : > { %1988 = vst.msk [vmem:[#allocation3 + $0x1c0] sm:$0xff] %vm380_vm1, %v1919_v38  ;;  %v6964_v27 = vld [vmem:[#allocation3 + $0x1b0] sm:$0xff] }
 0x26c   : > { %2301 = vst.msk [vmem:[#allocation3 + $0xc0] sm:$0xfe] %vm2288_vm15, %v2223_v4  ;;  %2956 = vmatmul.mubr.f32.gmra.mrb[16].mxu1 %v6964_v27 }
 0x26e   : > { %v2376_v41 = vpop.permute.xlu1 %2375  ;;  %v2085_v6 = vpop.permute.xlu0 %2084 }
 0x26f   : > { %2437 = vst.msk [vmem:[#allocation3 + $0x1c8] sm:$0xff] %vm374_vm0, %v2376_v41  ;;  %v6969_v11 = vld [vmem:[#allocation3 + $0xc8] sm:$0xff] }
 0x270   : > { %2498 = vst.msk [vmem:[#allocation3 + $0x1c8] sm:$0xff] %vm380_vm1, %v2043_v28  ;;  %4148 = vmatprep.mubr.msk.f32.mxu0 %vm1708_vm7, %v6969_v11 }
 0x271   : > { %2156 = vst.msk [vmem:[#allocation3 + $0x1c0] sm:$0xff] %vm2134_vm2, %v2085_v6 }
 0x272   : > { %2197 = vst.msk [vmem:[#allocation3 + $0x1c0] sm:$0x1] %vm2182_vm10, %v7909_v30  ;;  %v1889_v39 = vpop.permute.xlu1 %1888  ;;  %v2255_v57 = vpop.permute.xlu0 %2254 }
 0x273   : > { %1973 = vst.msk [vmem:[#allocation3 + $0xd0] sm:$0xff] %vm380_vm1, %v1889_v39  ;;  %v6978_v63 = vld [vmem:[#allocation3 + $0xc0] sm:$0xff] }
 0x274   : > { %2169 = vst.msk [vmem:[#allocation3 + $0xd7] sm:$0x1] %vm2166_vm11, %v7909_v30  ;;  %2881 = vmatmul.mubr.f32.gmra.mrb[16].mxu0 %v6978_v63 }
 0x275   : > { %2317 = vst.msk [vmem:[#allocation3 + $0x1c0] sm:$0xfe] %vm2288_vm15, %v2255_v57 }
 0x276   : > { %v2346_v53 = vpop.permute.xlu1 %2345  ;;  %v2055_v59 = vpop.permute.xlu0 %2054 }
 0x277   : > { %2422 = vst.msk [vmem:[#allocation3 + $0xd8] sm:$0xff] %vm374_vm0, %v2346_v53  ;;  %v6985_v13 = vld [vmem:[#allocation3 + $0x1c8] sm:$0xff] }
 0x278   : > { %2483 = vst.msk [vmem:[#allocation3 + $0xd8] sm:$0x7f] %vm2470_vm12, %v7949_v44  ;;  %4164 = vmatprep.mubr.msk.f32.mxu1 %vm1708_vm7, %v6985_v13 }
 0x279   : > { %2507 = vst.msk [vmem:[#allocation3 + $0xdf] sm:$0x1] %vm2500_vm13, %v7909_v30 }
 0x27a   : > { %2141 = vst.msk [vmem:[#allocation3 + $0xd0] sm:$0x7f] %vm2136_vm14, %v2055_v59  ;;  %v1921_v18 = vpop.permute.xlu1 %1920  ;;  %v2225_v16 = vpop.permute.xlu0 %2224 }
 0x27b   : > { %1989 = vst.msk [vmem:[#allocation3 + $0x1d0] sm:$0xff] %vm380_vm1, %v1921_v18  ;;  %v7103_v18 = vld [vmem:[#allocation3 + $0x218] sm:$0xff] }
 0x27c   : > { %v6995_v56 = vld [vmem:[#allocation3 + $0x1c0] sm:$0xff]  ;;  %2177 = vst.msk [vmem:[#allocation3 + $0x1d7] sm:$0x1] %vm2166_vm11, %v7909_v30 }
 0x27d   : > { %2302 = vst.msk [vmem:[#allocation3 + $0xd0] sm:$0xff] %vm1706_vm3, %v2225_v16  ;;  %2961 = vmatmul.mubr.f32.gmra.mrb[18].mxu1 %v6995_v56 }
 0x27e   : > { %v2378_v14 = vpop.permute.xlu1 %2377  ;;  %v2087_v19 = vpop.permute.xlu0 %2086 }
 0x27f   : > { %2438 = vst.msk [vmem:[#allocation3 + $0x1d8] sm:$0xff] %vm374_vm0, %v2378_v14 }
 0x280   : > { %v7002_v9 = vld [vmem:[#allocation3 + $0xd8] sm:$0xff]  ;;  %2499 = vst.msk [vmem:[#allocation3 + $0x1d8] sm:$0x7f] %vm2470_vm12, %v2042_v42 }
 0x281   : > { %2515 = vst.msk [vmem:[#allocation3 + $0x1df] sm:$0x1] %vm2500_vm13, %v7909_v30  ;;  %4149 = vmatprep.mubr.msk.f32.mxu0 %vm1708_vm7, %v7002_v9 }
 0x282   : > { %2157 = vst.msk [vmem:[#allocation3 + $0x1d0] sm:$0x7f] %vm2136_vm14, %v2087_v19  ;;  %v1891_v22 = vpop.permute.xlu1 %1890  ;;  %v2257_v61 = vpop.permute.xlu0 %2256 }
 0x283   : > { %1974 = vst.msk [vmem:[#allocation3 + $0xe0] sm:$0xff] %vm380_vm1, %v1891_v22 }
 0x284   : > { %v7011_v7 = vld [vmem:[#allocation3 + $0xd0] sm:$0xff]  ;;  %2318 = vst.msk [vmem:[#allocation3 + $0x1d0] sm:$0xff] %vm1706_vm3, %v2257_v61 }
 0x285   : > { %2886 = vmatmul.mubr.f32.gmra.mrb[18].mxu0 %v7011_v7 }
 0x286   : > { %v2348_v43 = vpop.permute.xlu1 %2347  ;;  %v2057_v0 = vpop.permute.xlu0 %2056 }
 0x287   : > { %2423 = vst.msk [vmem:[#allocation3 + $0xe8] sm:$0xff] %vm374_vm0, %v2348_v43 }
 0x288   : > { %v7016_v24 = vld [vmem:[#allocation3 + $0x1d8] sm:$0xff]  ;;  %2484 = vst.msk [vmem:[#allocation3 + $0xe8] sm:$0xff] %vm380_vm1, %v7950_v32 }
 0x289   : > { %2142 = vst.msk [vmem:[#allocation3 + $0xe0] sm:$0xff] %vm2134_vm2, %v2057_v0  ;;  %4165 = vmatprep.mubr.msk.f32.mxu1 %vm1708_vm7, %v7016_v24 }
 0x28a   : > { %2190 = vst.msk [vmem:[#allocation3 + $0xe0] sm:$0x1] %vm2182_vm10, %v7909_v30  ;;  %v2227_v1 = vpop.permute.xlu1 %2226  ;;  %v1923_v2 = vpop.permute.xlu0 %1922 }
 0x28b   : > { %v7027_v62 = vld [vmem:[#allocation3 + $0x1d0] sm:$0xff]  ;;  %2303 = vst.msk [vmem:[#allocation3 + $0xe0] sm:$0xfe] %vm2288_vm15, %v2227_v1 }
 0x28c   : > { %1990 = vst.msk [vmem:[#allocation3 + $0x1e0] sm:$0xff] %vm380_vm1, %v1923_v2  ;;  %2966 = vmatmul.mubr.f32.gmra.mrb[20].mxu1 %v7027_v62 }
 0x28d   : > { %4166 = vmatprep.mubr.msk.f32.mxu1 %vm1708_vm7, %v7025_v15 }
 0x28e   : > { %v1893_v12 = vpop.permute.xlu1 %1892  ;;  %v2089_v48 = vpop.permute.xlu0 %2088 }
 0x28f   : > { %v7034_v35 = vld [vmem:[#allocation3 + $0xe8] sm:$0xff]  ;;  %1975 = vst.msk [vmem:[#allocation3 + $0xf0] sm:$0xff] %vm380_vm1, %v1893_v12 }
 0x290   : > { %2158 = vst.msk [vmem:[#allocation3 + $0x1e0] sm:$0xff] %vm2134_vm2, %v2089_v48  ;;  %4150 = vmatprep.mubr.msk.f32.mxu0 %vm1708_vm7, %v7034_v35  ;;  %v7953_v48 = vld [vmem:[#allocation30_spill] sm:$0xff] }
 0x291   : > { %2170 = vst.msk [vmem:[#allocation3 + $0xf7] sm:$0x1] %vm2166_vm11, %v7909_v30 }
 0x292   : > { %v2350_v46 = vpop.permute.xlu1 %2349  ;;  %v7042_v37 = vld [vmem:[#allocation3 + $0xe0] sm:$0xff] }
 0x293   : > { %v2059_v25 = vpop.permute.xlu0 %2058  ;;  %2424 = vst.msk [vmem:[#allocation3 + $0xf8] sm:$0xff] %vm374_vm0, %v2350_v46  ;;  %2891 = vmatmul.mubr.f32.gmra.mrb[20].mxu0 %v7042_v37 }
 0x294   : > { %2143 = vst.msk [vmem:[#allocation3 + $0xf0] sm:$0x7f] %vm2136_vm14, %v2059_v25 }
 0x295   : > { %2485 = vst.msk [vmem:[#allocation3 + $0xf8] sm:$0x7f] %vm2470_vm12, %v7951_v5 }
 0x296   : > { %2508 = vst.msk [vmem:[#allocation3 + $0xff] sm:$0x1] %vm2500_vm13, %v7909_v30  ;;  %v2229_v3 = vpop.permute.xlu1 %2228 }
 0x297   : > { %v1925_v47 = vpop.permute.xlu0 %1924  ;;  %v7053_v49 = vld [vmem:[#allocation3 + $0x1e0] sm:$0xff]  ;;  %2304 = vst.msk [vmem:[#allocation3 + $0xf0] sm:$0xff] %vm1706_vm3, %v2229_v3 }
 0x298   : > { %1991 = vst.msk [vmem:[#allocation3 + $0x1f0] sm:$0xff] %vm380_vm1, %v1925_v47  ;;  %2971 = vmatmul.mubr.f32.gmra.mrb[22].mxu1 %v7053_v49 }
 0x299   : > { %2178 = vst.msk [vmem:[#allocation3 + $0x1f7] sm:$0x1] %vm2166_vm11, %v7909_v30  ;;  %4167 = vmatprep.mubr.msk.f32.mxu1 %vm1708_vm7, %v7051_v10 }
 0x29a   : > { %v1895_v23 = vpop.permute.xlu1 %1894 }
 0x29b   : > { %v2091_v42 = vpop.permute.xlu0 %2090  ;;  %1976 = vst.msk [vmem:[#allocation3 + $0x100] sm:$0xff] %vm380_vm1, %v1895_v23 }
 0x29c   : > { %2159 = vst.msk [vmem:[#allocation3 + $0x1f0] sm:$0x7f] %vm2136_vm14, %v2091_v42 }
 0x29d   : > { %v7064_v52 = vld [vmem:[#allocation3 + $0xf8] sm:$0xff] }
 0x29e   : > { %4151 = vmatprep.mubr.msk.f32.mxu0 %vm1708_vm7, %v7064_v52  ;;  %v2352_v21 = vpop.permute.xlu1 %2351  ;;  %v7068_v33 = vld [vmem:[#allocation3 + $0xf0] sm:$0xff] }
 0x29f   : > { %v2061_v28 = vpop.permute.xlu0 %2060  ;;  %2425 = vst.msk [vmem:[#allocation3 + $0x108] sm:$0xff] %vm374_vm0, %v2352_v21  ;;  %2896 = vmatmul.mubr.f32.gmra.mrb[22].mxu0 %v7068_v33 }
 0x2a0   : > { %2144 = vst.msk [vmem:[#allocation3 + $0x100] sm:$0xff] %vm2134_vm2, %v2061_v28 }
 0x2a1   : > { %2486 = vst.msk [vmem:[#allocation3 + $0x108] sm:$0xff] %vm380_vm1, %v7952_v20 }
 0x2a2   : > { %2191 = vst.msk [vmem:[#allocation3 + $0x100] sm:$0x1] %vm2182_vm10, %v7909_v30  ;;  %v2231_v38 = vpop.permute.xlu1 %2230 }
 0x2a3   : > { %v1927_v4 = vpop.permute.xlu0 %1926  ;;  %v7079_v41 = vld [vmem:[#allocation3 + $0x1f0] sm:$0xff]  ;;  %2305 = vst.msk [vmem:[#allocation3 + $0x100] sm:$0xfe] %vm2288_vm15, %v2231_v38 }
 0x2a4   : > { %1992 = vst.msk [vmem:[#allocation3 + $0x200] sm:$0xff] %vm380_vm1, %v1927_v4  ;;  %2976 = vmatmul.mubr.f32.gmra.mrb[24].mxu1 %v7079_v41 }
 0x2a5   : > { %4168 = vmatprep.mubr.msk.f32.mxu1 %vm1708_vm7, %v7077_v40 }
 0x2a6   : > { %v1897_v6 = vpop.permute.xlu1 %1896 }
 0x2a7   : > { %v2093_v39 = vpop.permute.xlu0 %2092  ;;  %1977 = vst.msk [vmem:[#allocation3 + $0x110] sm:$0xff] %vm380_vm1, %v1897_v6 }
 0x2a8   : > { %2160 = vst.msk [vmem:[#allocation3 + $0x200] sm:$0xff] %vm2134_vm2, %v2093_v39  ;;  %v7088_v57 = vld [vmem:[#allocation3 + $0x108] sm:$0xff] }
 0x2a9   : > { %2171 = vst.msk [vmem:[#allocation3 + $0x117] sm:$0x1] %vm2166_vm11, %v7909_v30  ;;  %4152 = vmatprep.mubr.msk.f32.mxu0 %vm1708_vm7, %v7088_v57 }
 0x2aa   : > { %v2354_v53 = vpop.permute.xlu1 %2353  ;;  %v7094_v44 = vld [vmem:[#allocation3 + $0x100] sm:$0xff] }
 0x2ab   : > { %v2063_v59 = vpop.permute.xlu0 %2062  ;;  %2426 = vst.msk [vmem:[#allocation3 + $0x118] sm:$0xff] %vm374_vm0, %v2354_v53  ;;  %2901 = vmatmul.mubr.f32.gmra.mrb[24].mxu0 %v7094_v44 }
 0x2ac   : > { %2145 = vst.msk [vmem:[#allocation3 + $0x110] sm:$0x7f] %vm2136_vm14, %v2063_v59 }
 0x2ad   : > { %2487 = vst.msk [vmem:[#allocation3 + $0x118] sm:$0x7f] %vm2470_vm12, %v6282_v8 }
 0x2ae   : > { %2509 = vst.msk [vmem:[#allocation3 + $0x11f] sm:$0x1] %vm2500_vm13, %v7909_v30  ;;  %v2233_v16 = vpop.permute.xlu1 %2232 }
 0x2af   : > { %v1929_v14 = vpop.permute.xlu0 %1928  ;;  %v7105_v19 = vld [vmem:[#allocation3 + $0x200] sm:$0xff]  ;;  %2306 = vst.msk [vmem:[#allocation3 + $0x110] sm:$0xff] %vm1706_vm3, %v2233_v16  ;;  %v2525_v16 = vld [vmem:[#allocation3 + $0x48] sm:$0xff] }
 0x2b0   : > { %1993 = vst.msk [vmem:[#allocation3 + $0x210] sm:$0xff] %vm380_vm1, %v1929_v14  ;;  %2981 = vmatmul.mubr.f32.gmra.mrb[26].mxu1 %v7105_v19 }
 0x2b1   : > { %2179 = vst.msk [vmem:[#allocation3 + $0x217] sm:$0x1] %vm2166_vm11, %v7909_v30  ;;  %4169 = vmatprep.mubr.msk.f32.mxu1 %vm1708_vm7, %v7103_v18 }
 0x2b2   : > { %v1899_v8 = vpop.permute.xlu1 %1898 }
 0x2b3   : > { %v2095_v22 = vpop.permute.xlu0 %2094  ;;  %1978 = vst.msk [vmem:[#allocation3 + $0x120] sm:$0xff] %vm380_vm1, %v1899_v8 }
 0x2b4   : > { %2161 = vst.msk [vmem:[#allocation3 + $0x210] sm:$0x7f] %vm2136_vm14, %v2095_v22  ;;  %v2524_v22 = vld [vmem:[#allocation3 + $0x40] sm:$0xff] }
 0x2b5   : > { %v7116_v61 = vld [vmem:[#allocation3 + $0x118] sm:$0xff] }
 0x2b6   : > { %4153 = vmatprep.mubr.msk.f32.mxu0 %vm1708_vm7, %v7116_v61  ;;  %v2356_v43 = vpop.permute.xlu1 %2355  ;;  %v7120_v32 = vld [vmem:[#allocation3 + $0x110] sm:$0xff] }
 0x2b7   : > { %v2065_v0 = vpop.permute.xlu0 %2064  ;;  %2427 = vst.msk [vmem:[#allocation3 + $0x128] sm:$0xff] %vm374_vm0, %v2356_v43  ;;  %2906 = vmatmul.mubr.f32.gmra.mrb[26].mxu0 %v7120_v32  ;;  %v2527_v43 = vld [vmem:[#allocation3 + $0x58] sm:$0xff] }
 0x2b8   : > { %2146 = vst.msk [vmem:[#allocation3 + $0x120] sm:$0xff] %vm2134_vm2, %v2065_v0 }
 0x2b9   : > { %2488 = vst.msk [vmem:[#allocation3 + $0x128] sm:$0xff] %vm380_vm1, %v6553_v17 }
 0x2ba   : > { %2192 = vst.msk [vmem:[#allocation3 + $0x120] sm:$0x1] %vm2182_vm10, %v7909_v30  ;;  %v2235_v1 = vpop.permute.xlu1 %2234 }
 0x2bb   : > { %v2320_v2 = vpop.permute.xlu0 %2319  ;;  %v7129_v12 = vld [vmem:[#allocation3 + $0x210] sm:$0xff]  ;;  %2307 = vst.msk [vmem:[#allocation3 + $0x120] sm:$0xfe] %vm2288_vm15, %v2235_v1 }
 0x2bc   : > { %2409 = vst.msk [vmem:[#allocation3 + $0x8] sm:$0xff] %vm374_vm0, %v2320_v2  ;;  %2986 = vmatmul.mubr.f32.gmra.mrb[28].mxu1 %v7129_v12 }
 0x2bd   : > { %2469 = vst.msk [vmem:[#allocation3 + $0x8] sm:$0xff] %vm380_vm1, %v7953_v48  ;;  %v2526_v48 = vld [vmem:[#allocation3 + $0x50] sm:$0xff] }
 0x2be   : > { %v2199_v25 = vpop.permute.xlu1 %2198 }
 0x2bf   : > { %v2322_v46 = vpop.permute.xlu0 %2321  ;;  %2289 = vst.msk [vmem:[#allocation3] sm:$0xfe] %vm2288_vm15, %v2199_v25  ;;  %v2531_v25 = vld [vmem:[#allocation3 + $0x78] sm:$0xff] }
 0x2c0   : > { %2410 = vst.msk [vmem:[#allocation3 + $0x18] sm:$0xff] %vm374_vm0, %v2322_v46  ;;  %v7138_v17 = vld [vmem:[#allocation3 + $0x128] sm:$0xff] }
 0x2c1   : > { %2471 = vst.msk [vmem:[#allocation3 + $0x18] sm:$0x7f] %vm2470_vm12, %v6148_v36  ;;  %4154 = vmatprep.mubr.msk.f32.mxu0 %vm1708_vm7, %v7138_v17  ;;  %v2529_v46 = vld [vmem:[#allocation3 + $0x68] sm:$0xff] }
 0x2c2   : > { %2501 = vst.msk [vmem:[#allocation3 + $0x1f] sm:$0x1] %vm2500_vm13, %v7909_v30  ;;  %v2201_v3 = vpop.permute.xlu1 %2200  ;;  %v7146_v47 = vld [vmem:[#allocation3 + $0x120] sm:$0xff] }
 0x2c3   : > { %v2324_v5 = vpop.permute.xlu0 %2323  ;;  %2290 = vst.msk [vmem:[#allocation3 + $0x10] sm:$0xff] %vm1706_vm3, %v2201_v3  ;;  %2911 = vmatmul.mubr.f32.gmra.mrb[28].mxu0 %v7146_v47  ;;  %v2533_v3 = vld [vmem:[#allocation3 + $0x88] sm:$0xff] }
 0x2c4   : > { %2411 = vst.msk [vmem:[#allocation3 + $0x28] sm:$0xff] %vm374_vm0, %v2324_v5  ;;  %v2517_v23 = vld [vmem:[#allocation3 + $0x8] sm:$0xff]  ;;  %4200 = vmatprep.mubr.msk.f32.mxu0 %vm1708_vm7, %v6790_v26  ;;  %v2530_v5 = vld [vmem:[#allocation3 + $0x70] sm:$0xff] }
 0x2c5   : > { %2472 = vst.msk [vmem:[#allocation3 + $0x28] sm:$0xff] %vm380_vm1, %v6488_v45  ;;  %4170 = vmatprep.mubr.msk.f32.mxu1 %vm1708_vm7, %v2517_v23  ;;  %v2532_v23 = vld [vmem:[#allocation3 + $0x80] sm:$0xff] }
 0x2c6   : > { %v2203_v42 = vpop.permute.xlu1 %2202  ;;  %v2516_v21 = vld [vmem:[#allocation3] sm:$0xff] }
 0x2c7   : > { %v2326_v36 = vpop.permute.xlu0 %2325  ;;  %2291 = vst.msk [vmem:[#allocation3 + $0x20] sm:$0xfe] %vm2288_vm15, %v2203_v42  ;;  %3146 = vmatmul.mubr.f32.vlgmr.msra.gmra.mrb[30].mxu1 %v2516_v21  ;;  %3536 = vmatmul.mubr.f32.vlgmr.msra.gmra.mrb[30].mxu0 %v6804_v51 }
 0x2c8   : > { %2412 = vst.msk [vmem:[#allocation3 + $0x38] sm:$0xff] %vm374_vm0, %v2326_v36  ;;  %4201 = vmatprep.mubr.msk.f32.mxu0 %vm1708_vm7, %v6841_v58 }
 0x2c9   : > { %v2519_v28 = vld [vmem:[#allocation3 + $0x18] sm:$0xff]  ;;  %2473 = vst.msk [vmem:[#allocation3 + $0x38] sm:$0x7f] %vm2470_vm12, %v6465_v60 }
 0x2ca   : > { %2502 = vst.msk [vmem:[#allocation3 + $0x3f] sm:$0x1] %vm2500_vm13, %v7909_v30  ;;  %4171 = vmatprep.mubr.msk.f32.mxu1 %vm1708_vm7, %v2519_v28  ;;  %v2205_v26 = vpop.permute.xlu1 %2204  ;;  %v2518_v20 = vld [vmem:[#allocation3 + $0x10] sm:$0xff] }
 0x2cb   : > { %v1931_v45 = vpop.permute.xlu0 %1930  ;;  %2292 = vst.msk [vmem:[#allocation3 + $0x30] sm:$0xff] %vm1706_vm3, %v2205_v26  ;;  %3151 = vmatmul.mubr.f32.gmra.mrb[32].mxu1 %v2518_v20  ;;  %3541 = vmatmul.mubr.f32.gmra.mrb[32].mxu0 %v6856_v34 }
 0x2cc   : > { %1994 = vst.msk [vmem:[#allocation3 + $0x220] sm:$0xff] %vm380_vm1, %v1931_v45  ;;  %v2521_v51 = vld [vmem:[#allocation3 + $0x28] sm:$0xff]  ;;  %4202 = vmatprep.mubr.msk.f32.mxu0 %vm1708_vm7, %v6889_v54 }
 0x2cd   : > { %4172 = vmatprep.mubr.msk.f32.mxu1 %vm1708_vm7, %v2521_v51  ;;  %v3319_v51 = vld [vmem:[#allocation3 + $0x138] sm:$0xff] }
 0x2ce   : > { %v2097_v38 = vpop.permute.xlu1 %2096  ;;  %v2520_v4 = vld [vmem:[#allocation3 + $0x20] sm:$0xff] }
 0x2cf   : > { %v1933_v60 = vpop.permute.xlu0 %1932  ;;  %2162 = vst.msk [vmem:[#allocation3 + $0x220] sm:$0xff] %vm2134_vm2, %v2097_v38  ;;  %3156 = vmatmul.mubr.f32.gmra.mrb[34].mxu1 %v2520_v4  ;;  %3546 = vmatmul.mubr.f32.gmra.mrb[34].mxu0 %v6900_v31  ;;  %v3321_v38 = vld [vmem:[#allocation3 + $0x148] sm:$0xff] }
 0x2d0   : > { %1995 = vst.msk [vmem:[#allocation3 + $0x230] sm:$0xff] %vm380_vm1, %v1933_v60  ;;  %4203 = vmatprep.mubr.msk.f32.mxu0 %vm1708_vm7, %v6930_v50  ;;  %v3318_v60 = vld [vmem:[#allocation3 + $0x130] sm:$0xff] }
 0x2d1   : > { %v2523_v6 = vld [vmem:[#allocation3 + $0x38] sm:$0xff]  ;;  %2180 = vst.msk [vmem:[#allocation3 + $0x237] sm:$0x1] %vm2166_vm11, %v7909_v30 }
 0x2d2   : > { %4173 = vmatprep.mubr.msk.f32.mxu1 %vm1708_vm7, %v2523_v6  ;;  %v2099_v53 = vpop.permute.xlu1 %2098  ;;  %v2522_v59 = vld [vmem:[#allocation3 + $0x30] sm:$0xff] }
 0x2d3   : > { %v1935_v39 = vpop.permute.xlu0 %1934  ;;  %2163 = vst.msk [vmem:[#allocation3 + $0x230] sm:$0x7f] %vm2136_vm14, %v2099_v53  ;;  %3161 = vmatmul.mubr.f32.gmra.mrb[36].mxu1 %v2522_v59  ;;  %3551 = vmatmul.mubr.f32.gmra.mrb[36].mxu0 %v6944_v29  ;;  %v3323_v53 = vld [vmem:[#allocation3 + $0x158] sm:$0xff] }
 0x2d4   : > { %1996 = vst.msk [vmem:[#allocation3 + $0x240] sm:$0xff] %vm380_vm1, %v1935_v39  ;;  %4174 = vmatprep.mubr.msk.f32.mxu1 %vm1708_vm7, %v2525_v16  ;;  %4204 = vmatprep.mubr.msk.f32.mxu0 %vm1708_vm7, %v6969_v11  ;;  %v3320_v39 = vld [vmem:[#allocation3 + $0x140] sm:$0xff] }
 0x2d5   : > { %v3324_v16 = vld [vmem:[#allocation3 + $0x160] sm:$0xff] }
 0x2d6   : > { %v2101_v8 = vpop.permute.xlu1 %2100 }
 0x2d7   : > { %v1937_v14 = vpop.permute.xlu0 %1936  ;;  %2164 = vst.msk [vmem:[#allocation3 + $0x240] sm:$0xff] %vm2134_vm2, %v2101_v8  ;;  %3166 = vmatmul.mubr.f32.gmra.mrb[38].mxu1 %v2524_v22  ;;  %3556 = vmatmul.mubr.f32.gmra.mrb[38].mxu0 %v6978_v63  ;;  %v3328_v8 = vld [vmem:[#allocation3 + $0x180] sm:$0xff] }
 0x2d8   : > { %1997 = vst.msk [vmem:[#allocation3 + $0x250] sm:$0xff] %vm380_vm1, %v1937_v14  ;;  %4175 = vmatprep.mubr.msk.f32.mxu1 %vm1708_vm7, %v2527_v43  ;;  %4205 = vmatprep.mubr.msk.f32.mxu0 %vm1708_vm7, %v7002_v9  ;;  %v3332_v43 = vld [vmem:[#allocation3 + $0x1a0] sm:$0xff] }
 0x2d9   : > { %2181 = vst.msk [vmem:[#allocation3 + $0x257] sm:$0x1] %vm2166_vm11, %v7909_v30  ;;  %v7194_v0 = vpop.f32.mrb[0].mxu0  ;;  %v2528_v30 = vld [vmem:[#allocation3 + $0x60] sm:$0xff] }
 0x2da   : > { %v2103_v1 = vpop.permute.xlu1 %2102  ;;  %v2844_v2 = vpop.f32.mrb[1].mxu0 }
 0x2db   : > { %2165 = vst.msk [vmem:[#allocation3 + $0x250] sm:$0x7f] %vm2136_vm14, %v2103_v1  ;;  %3171 = vmatmul.mubr.f32.gmra.mrb[40].mxu1 %v2526_v48  ;;  %3561 = vmatmul.mubr.f32.gmra.mrb[40].mxu0 %v7011_v7  ;;  %v2572_v1 = vld [vmem:[#allocation3 + $0x1c0] sm:$0xff] }
 0x2dc   : > { %4176 = vmatprep.mubr.msk.f32.mxu1 %vm1708_vm7, %v2529_v46  ;;  %4206 = vmatprep.mubr.msk.f32.mxu0 %vm1708_vm7, %v7034_v35  ;;  %v2575_v46 = vld [vmem:[#allocation3 + $0x1d8] sm:$0xff] }
 0x2de   : > { %v3352_v2 = vld [vmem:[#allocation3 + $0x240] sm:$0xff] }
 0x2df   : > { %3176 = vmatmul.mubr.f32.gmra.mrb[42].mxu1 %v2528_v30  ;;  %3566 = vmatmul.mubr.f32.gmra.mrb[42].mxu0 %v7042_v37  ;;  %v2574_v30 = vld [vmem:[#allocation3 + $0x1d0] sm:$0xff] }
 0x2e0   : > { %4177 = vmatprep.mubr.msk.f32.mxu1 %vm1708_vm7, %v2531_v25  ;;  %4207 = vmatprep.mubr.msk.f32.mxu0 %vm1708_vm7, %v7064_v52 }
 0x2e2   : > { %v3354_v25 = vld [vmem:[#allocation3 + $0x250] sm:$0xff] }
 0x2e3   : > { %3181 = vmatmul.mubr.f32.gmra.mrb[44].mxu1 %v2530_v5  ;;  %3571 = vmatmul.mubr.f32.gmra.mrb[44].mxu0 %v7068_v33 }
 0x2e4   : > { %4178 = vmatprep.mubr.msk.f32.mxu1 %vm1708_vm7, %v2533_v3  ;;  %4208 = vmatprep.mubr.msk.f32.mxu0 %vm1708_vm7, %v7088_v57 }
 0x2e7   : > { %3186 = vmatmul.mubr.f32.gmra.mrb[46].mxu1 %v2532_v23  ;;  %3576 = vmatmul.mubr.f32.gmra.mrb[46].mxu0 %v7094_v44 }
 0x2e8   : > { %4179 = vmatprep.mubr.msk.f32.mxu1 %vm1708_vm7, %v6841_v58  ;;  %4209 = vmatprep.mubr.msk.f32.mxu0 %vm1708_vm7, %v7116_v61  ;;  %v7214_v36 = vpop.f32.mrb[2].mxu0 }
 0x2e9   : > { %v7216_v42 = vpop.f32.mrb[0].mxu1  ;;  %v2849_v21 = vpop.f32.mrb[3].mxu0 }
 0x2ea   : > { %v2919_v28 = vpop.f32.mrb[1].mxu1 }
 0x2eb   : > { %3191 = vmatmul.mubr.f32.gmra.mrb[48].mxu1 %v6856_v34  ;;  %3581 = vmatmul.mubr.f32.gmra.mrb[48].mxu0 %v7120_v32 }
 0x2ec   : > { %4180 = vmatprep.mubr.msk.f32.mxu1 %vm1708_vm7, %v6889_v54  ;;  %4210 = vmatprep.mubr.msk.f32.mxu0 %vm1708_vm7, %v7138_v17  ;;  %v7224_v58 = vpop.f32.mrb[4].mxu0 }
 0x2ed   : > { %v7226_v45 = vpop.f32.mrb[2].mxu1  ;;  %v2854_v26 = vpop.f32.mrb[5].mxu0 }
 0x2ee   : > { %v2924_v20 = vpop.f32.mrb[3].mxu1 }
 0x2ef   : > { %3196 = vmatmul.mubr.f32.gmra.mrb[50].mxu1 %v6900_v31  ;;  %3586 = vmatmul.mubr.f32.gmra.mrb[50].mxu0 %v7146_v47 }
 0x2f0   : > { %4181 = vmatprep.mubr.msk.f32.mxu1 %vm1708_vm7, %v6930_v50  ;;  %4211 = vmatprep.mubr.msk.f32.mxu0 %vm1708_vm7, %v3319_v51 }
 0x2f1   : > { %v7233_v34 = vpop.f32.mrb[4].mxu1 }
 0x2f2   : > { %v2929_v54 = vpop.f32.mrb[5].mxu1 }
 0x2f3   : > { %3201 = vmatmul.mubr.f32.gmra.mrb[52].mxu1 %v6944_v29  ;;  %3591 = vmatmul.mubr.f32.gmra.mrb[52].mxu0 %v3318_v60  ;;  %v3322_v29 = vld [vmem:[#allocation3 + $0x150] sm:$0xff] }
 0x2f4   : > { %4182 = vmatprep.mubr.msk.f32.mxu1 %vm1708_vm7, %v6969_v11  ;;  %4212 = vmatprep.mubr.msk.f32.mxu0 %vm1708_vm7, %v3321_v38  ;;  %v3325_v11 = vld [vmem:[#allocation3 + $0x168] sm:$0xff] }
 0x2f5   : > { %v7239_v31 = vpop.f32.mrb[6].mxu0  ;;  %v7241_v4 = vpop.f32.mrb[6].mxu1 }
 0x2f6   : > { %v2859_v50 = vpop.f32.mrb[7].mxu0  ;;  %v2934_v6 = vpop.f32.mrb[7].mxu1 }
 0x2f7   : > { %3206 = vmatmul.mubr.f32.gmra.mrb[54].mxu1 %v6978_v63  ;;  %3596 = vmatmul.mubr.f32.gmra.mrb[54].mxu0 %v3320_v39 }
 0x2f8   : > { %4183 = vmatprep.mubr.msk.f32.mxu1 %vm1708_vm7, %v7002_v9  ;;  %4213 = vmatprep.mubr.msk.f32.mxu0 %vm1708_vm7, %v3323_v53  ;;  %v3327_v9 = vld [vmem:[#allocation3 + $0x178] sm:$0xff] }
 0x2fb   : > { %3211 = vmatmul.mubr.f32.gmra.mrb[56].mxu1 %v7011_v7  ;;  %3601 = vmatmul.mubr.f32.gmra.mrb[56].mxu0 %v3322_v29  ;;  %v3326_v7 = vld [vmem:[#allocation3 + $0x170] sm:$0xff] }
 0x2fc   : > { %4184 = vmatprep.mubr.msk.f32.mxu1 %vm1708_vm7, %v7034_v35  ;;  %4214 = vmatprep.mubr.msk.f32.mxu0 %vm1708_vm7, %v3325_v11  ;;  %v7251_v59 = vpop.f32.mrb[8].mxu1  ;;  %v3329_v35 = vld [vmem:[#allocation3 + $0x188] sm:$0xff] }
 0x2fd   : > { %v2939_v63 = vpop.f32.mrb[9].mxu1 }
 0x2ff   : > { %3216 = vmatmul.mubr.f32.gmra.mrb[58].mxu1 %v7042_v37  ;;  %3606 = vmatmul.mubr.f32.gmra.mrb[58].mxu0 %v3324_v16 }
 0x300   : > { %4185 = vmatprep.mubr.msk.f32.mxu1 %vm1708_vm7, %v7064_v52  ;;  %4215 = vmatprep.mubr.msk.f32.mxu0 %vm1708_vm7, %v3327_v9  ;;  %v3331_v52 = vld [vmem:[#allocation3 + $0x198] sm:$0xff] }
 0x303   : > { %3221 = vmatmul.mubr.f32.gmra.mrb[60].mxu1 %v7068_v33  ;;  %3611 = vmatmul.mubr.f32.gmra.mrb[60].mxu0 %v3326_v7  ;;  %v3330_v33 = vld [vmem:[#allocation3 + $0x190] sm:$0xff] }
 0x304   : > { %4186 = vmatprep.mubr.msk.f32.mxu1 %vm1708_vm7, %v7088_v57  ;;  %4216 = vmatprep.mubr.msk.f32.mxu0 %vm1708_vm7, %v3329_v35  ;;  %v3333_v57 = vld [vmem:[#allocation3 + $0x1a8] sm:$0xff] }
 0x306   : > { %v7261_v14 = vpop.f32.mrb[8].mxu0 }
 0x307   : > { %v2864_v37 = vpop.f32.mrb[9].mxu0  ;;  %3226 = vmatmul.mubr.f32.gmra.mrb[62].mxu1 %v7094_v44  ;;  %3616 = vmatmul.mubr.f32.gmra.mrb[62].mxu0 %v3328_v8 }
 0x308   : > { %4187 = vmatprep.mubr.msk.f32.mxu1 %vm1708_vm7, %v7116_v61  ;;  %4217 = vmatprep.mubr.msk.f32.mxu0 %vm1708_vm7, %v3331_v52 }
 0x30b   : > { %3231 = vmatmul.mubr.f32.gmra.mrb[64].mxu1 %v7120_v32  ;;  %3621 = vmatmul.mubr.f32.gmra.mrb[64].mxu0 %v3330_v33 }
 0x30c   : > { %4188 = vmatprep.mubr.msk.f32.mxu1 %vm1708_vm7, %v7138_v17  ;;  %4218 = vmatprep.mubr.msk.f32.mxu0 %vm1708_vm7, %v3333_v57  ;;  %v3355_v17 = vld [vmem:[#allocation3 + $0x258] sm:$0xff] }
 0x30f   : > { %v7271_v22 = vpop.f32.mrb[10].mxu1  ;;  %3236 = vmatmul.mubr.f32.gmra.mrb[66].mxu1 %v7146_v47  ;;  %3626 = vmatmul.mubr.f32.gmra.mrb[66].mxu0 %v3332_v43 }
 0x310   : > { %v2944_v44 = vpop.f32.mrb[11].mxu1  ;;  %4189 = vmatprep.mubr.msk.f32.mxu1 %vm1708_vm7, %v3319_v51  ;;  %4219 = vmatprep.mubr.msk.f32.mxu0 %vm1708_vm7, %v6953_v55 }
 0x313   : > { %3241 = vmatmul.mubr.f32.gmra.mrb[68].mxu1 %v3318_v60  ;;  %3631 = vmatmul.mubr.f32.gmra.mrb[68].mxu0 %v6964_v27 }
 0x314   : > { %4190 = vmatprep.mubr.msk.f32.mxu1 %vm1708_vm7, %v3321_v38  ;;  %4220 = vmatprep.mubr.msk.f32.mxu0 %vm1708_vm7, %v6985_v13 }
 0x317   : > { %v7281_v61 = vpop.f32.mrb[10].mxu0  ;;  %3246 = vmatmul.mubr.f32.gmra.mrb[70].mxu1 %v3320_v39  ;;  %3636 = vmatmul.mubr.f32.gmra.mrb[70].mxu0 %v6995_v56 }
 0x318   : > { %v2869_v32 = vpop.f32.mrb[11].mxu0  ;;  %4191 = vmatprep.mubr.msk.f32.mxu1 %vm1708_vm7, %v3323_v53  ;;  %4221 = vmatprep.mubr.msk.f32.mxu0 %vm1708_vm7, %v7016_v24  ;;  %v3349_v24 = vld [vmem:[#allocation3 + $0x228] sm:$0xff] }
 0x31b   : > { %3251 = vmatmul.mubr.f32.gmra.mrb[72].mxu1 %v3322_v29  ;;  %3641 = vmatmul.mubr.f32.gmra.mrb[72].mxu0 %v7027_v62  ;;  %v3351_v62 = vld [vmem:[#allocation3 + $0x238] sm:$0xff] }
 0x31c   : > { %4192 = vmatprep.mubr.msk.f32.mxu1 %vm1708_vm7, %v3325_v11  ;;  %4222 = vmatprep.mubr.msk.f32.mxu0 %vm1708_vm7, %v7025_v15 }
 0x31f   : > { %v7291_v55 = vpop.f32.mrb[12].mxu1  ;;  %3256 = vmatmul.mubr.f32.gmra.mrb[74].mxu1 %v3324_v16  ;;  %3646 = vmatmul.mubr.f32.gmra.mrb[74].mxu0 %v7053_v49  ;;  %v3348_v49 = vld [vmem:[#allocation3 + $0x220] sm:$0xff] }
 0x320   : > { %v2949_v27 = vpop.f32.mrb[13].mxu1  ;;  %4193 = vmatprep.mubr.msk.f32.mxu1 %vm1708_vm7, %v3327_v9  ;;  %4223 = vmatprep.mubr.msk.f32.mxu0 %vm1708_vm7, %v7051_v10 }
 0x323   : > { %3261 = vmatmul.mubr.f32.gmra.mrb[76].mxu1 %v3326_v7  ;;  %3651 = vmatmul.mubr.f32.gmra.mrb[76].mxu0 %v7079_v41  ;;  %v3353_v41 = vld [vmem:[#allocation3 + $0x248] sm:$0xff] }
 0x324   : > { %4194 = vmatprep.mubr.msk.f32.mxu1 %vm1708_vm7, %v3329_v35  ;;  %4224 = vmatprep.mubr.msk.f32.mxu0 %vm1708_vm7, %v7077_v40  ;;  %v2571_v40 = vld [vmem:[#allocation3 + $0x1b8] sm:$0xff] }
 0x327   : > { %v7301_v13 = vpop.f32.mrb[12].mxu0  ;;  %3266 = vmatmul.mubr.f32.gmra.mrb[78].mxu1 %v3328_v8  ;;  %3656 = vmatmul.mubr.f32.gmra.mrb[78].mxu0 %v7105_v19  ;;  %v3350_v19 = vld [vmem:[#allocation3 + $0x230] sm:$0xff] }
 0x328   : > { %v2874_v56 = vpop.f32.mrb[13].mxu0  ;;  %4195 = vmatprep.mubr.msk.f32.mxu1 %vm1708_vm7, %v3331_v52  ;;  %4225 = vmatprep.mubr.msk.f32.mxu0 %vm1708_vm7, %v7103_v18  ;;  %v2570_v18 = vld [vmem:[#allocation3 + $0x1b0] sm:$0xff] }
 0x32b   : > { %3271 = vmatmul.mubr.f32.gmra.mrb[80].mxu1 %v3330_v33  ;;  %3661 = vmatmul.mubr.f32.gmra.mrb[80].mxu0 %v7129_v12  ;;  %v2573_v12 = vld [vmem:[#allocation3 + $0x1c8] sm:$0xff] }
 0x32c   : > { %4196 = vmatprep.mubr.msk.f32.mxu1 %vm1708_vm7, %v3333_v57  ;;  %4226 = vmatprep.mubr.msk.f32.mxu0 %vm1708_vm7, %v3349_v24 }
 0x32f   : > { %v7310_v15 = vpop.f32.mrb[14].mxu1  ;;  %3276 = vmatmul.mubr.f32.gmra.mrb[82].mxu1 %v3332_v43  ;;  %3666 = vmatmul.mubr.f32.gmra.mrb[82].mxu0 %v3348_v49 }
 0x330   : > { %v2954_v10 = vpop.f32.mrb[15].mxu1  ;;  %4197 = vmatprep.mubr.msk.f32.mxu1 %vm1708_vm7, %v2571_v40  ;;  %4227 = vmatprep.mubr.msk.f32.mxu0 %vm1708_vm7, %v3351_v62  ;;  %v7352_v62 = vld [vmem:[%s7742_s5] ss:$0 sm:$0xff] }
 0x333   : > { %3281 = vmatmul.mubr.f32.gmra.mrb[84].mxu1 %v2570_v18  ;;  %3671 = vmatmul.mubr.f32.gmra.mrb[84].mxu0 %v3350_v19 }
 0x334   : > { %4198 = vmatprep.mubr.msk.f32.mxu1 %vm1708_vm7, %v2573_v12  ;;  %4228 = vmatprep.mubr.msk.f32.mxu0 %vm1708_vm7, %v3353_v41 }
 0x337   : > { %3286 = vmatmul.mubr.f32.gmra.mrb[86].mxu1 %v2572_v1  ;;  %3676 = vmatmul.mubr.f32.gmra.mrb[86].mxu0 %v3352_v2 }
 0x338   : > { %v7316_v47 = vpop.f32.mrb[14].mxu0  ;;  %4199 = vmatprep.mubr.msk.f32.mxu1 %vm1708_vm7, %v2575_v46  ;;  %4229 = vmatprep.mubr.msk.f32.mxu0 %vm1708_vm7, %v3355_v17 }
 0x339   : > { %v2879_v48 = vpop.f32.mrb[15].mxu0 }
 0x33b   : > { %3291 = vmatmul.mubr.f32.gmra.mrb[88].mxu1 %v2574_v30  ;;  %3681 = vmatmul.mubr.f32.gmra.mrb[88].mxu0 %v3354_v25 }
 0x33f   : > { %v7320_v5 = vpop.f32.mrb[16].mxu1 }
 0x340   : > { %v2959_v3 = vpop.f32.mrb[17].mxu1 }
 0x347   : > { %v7322_v23 = vpop.f32.mrb[16].mxu0 }
 0x348   : > { %v2884_v21 = vpop.f32.mrb[17].mxu0 }
 0x350   : > { %v7324_v28 = vpop.f32.mrb[18].mxu1 }
 0x351   : > { %v2964_v26 = vpop.f32.mrb[19].mxu1 }
 0x358   : > { %v7326_v20 = vpop.f32.mrb[18].mxu0 }
 0x359   : > { %v2889_v51 = vpop.f32.mrb[19].mxu0 }
 0x35f   : > { %v7328_v54 = vpop.f32.mrb[20].mxu1 }
 0x360   : > { %v2969_v60 = vpop.f32.mrb[21].mxu1 }
 0x366   : > { %v7330_v38 = vpop.f32.mrb[20].mxu0 }
 0x367   : > { %v2894_v50 = vpop.f32.mrb[21].mxu0 }
 0x36b   : > { %v7332_v6 = vpop.f32.mrb[22].mxu1 }
 0x36c   : > { %v2974_v39 = vpop.f32.mrb[23].mxu1 }
 0x372   : > { %v7334_v53 = vpop.f32.mrb[22].mxu0 }
 0x373   : > { %v2899_v29 = vpop.f32.mrb[23].mxu0 }
 0x377   : > { %v7336_v11 = vpop.f32.mrb[24].mxu1 }
 0x378   : > { %v2979_v63 = vpop.f32.mrb[25].mxu1 }
 0x37e   : > { %v7338_v16 = vpop.f32.mrb[24].mxu0 }
 0x37f   : > { %v2904_v9 = vpop.f32.mrb[25].mxu0 }
 0x383   : > { %v7340_v7 = vpop.f32.mrb[26].mxu1 }
 0x384   : > { %v2984_v35 = vpop.f32.mrb[27].mxu1 }
 0x38a   : > { %v7342_v37 = vpop.f32.mrb[26].mxu0 }
 0x38b   : > { %v2909_v8 = vpop.f32.mrb[27].mxu0 }
 0x38f   : > { %v7344_v52 = vpop.f32.mrb[28].mxu1 }
 0x390   : > { %v2989_v33 = vpop.f32.mrb[29].mxu1 }
 0x396   : > { %v7346_v57 = vpop.f32.mrb[28].mxu0 }
 0x397   : > { %v2914_v44 = vpop.f32.mrb[29].mxu0 }
 0x39a   : > { %v3147_v43 = vpop.f32.mrb[30].mxu1  ;;  %v3537_v32 = vpop.f32.mrb[30].mxu0 }
 0x39b   : > { %v3148_v27 = vadd.f32 %v3147_v43, %v7194_v0  ;;  %v3149_v56 = vpop.f32.mrb[31].mxu1  ;;  %v3539_v24 = vpop.f32.mrb[31].mxu0 }
 0x39d   : > { %v3686_v10 = vadd.f32 %v3537_v32, %v3148_v27 }
 0x39e   : > { %v3152_v49 = vpop.f32.mrb[32].mxu1  ;;  %v3542_v40 = vpop.f32.mrb[32].mxu0 }
 0x39f   : > { %v7355_v41 = vadd.f32 %v7352_v62, %v3686_v10  ;;  %v3153_v18 = vadd.f32 %v3152_v49, %v7214_v36  ;;  %v3154_v19 = vpop.f32.mrb[33].mxu1  ;;  %v3544_v12 = vpop.f32.mrb[33].mxu0 }
 0x3a1   : > { %v3753_v17 = vmax.f32 %v7355_v41, 0.0  ;;  %v3687_v0 = vadd.f32 %v3542_v40, %v3153_v18 }
 0x3a2   : > { %v3157_v1 = vpop.f32.mrb[34].mxu1  ;;  %v3547_v2 = vpop.f32.mrb[34].mxu0 }
 0x3a3   : > { %v7360_v48 = vadd.f32 %v7352_v62, %v3687_v0  ;;  %v3158_v46 = vadd.f32 %v3157_v1, %v7224_v58  ;;  %v3159_v30 = vpop.f32.mrb[35].mxu1  ;;  %3783 = vrot.lane.b32.xlu0 %v3753_v17, %s4719_s30  ;;  %v3549_v25 = vpop.f32.mrb[35].mxu0 }
 0x3a5   : > { %v3754_v36 = vmax.f32 %v7360_v48, 0.0  ;;  %v3688_v3 = vadd.f32 %v3547_v2, %v3158_v46 }
 0x3a6   : > { %v3162_v21 = vpop.f32.mrb[36].mxu1  ;;  %v3552_v26 = vpop.f32.mrb[36].mxu0 }
 0x3a7   : > { %v7368_v51 = vadd.f32 %v7352_v62, %v3688_v3  ;;  %v3163_v60 = vadd.f32 %v3162_v21, %v7239_v31  ;;  %v3164_v50 = vpop.f32.mrb[37].mxu1  ;;  %3785 = vrot.lane.b32.xlu1 %v3754_v36, %s4719_s30  ;;  %v3554_v58 = vpop.f32.mrb[37].mxu0 }
 0x3a9   : > { %v3755_v39 = vmax.f32 %v7368_v51, 0.0  ;;  %v3689_v29 = vadd.f32 %v3552_v26, %v3163_v60 }
 0x3aa   : > { %v3167_v63 = vpop.f32.mrb[38].mxu1  ;;  %v3557_v9 = vpop.f32.mrb[38].mxu0 }
 0x3ab   : > { %v7376_v35 = vadd.f32 %v7352_v62, %v3689_v29  ;;  %v3168_v8 = vadd.f32 %v3167_v63, %v7261_v14  ;;  %v3169_v33 = vpop.f32.mrb[39].mxu1  ;;  %3787 = vrot.lane.b32.xlu0 %v3755_v39, %s4719_s30  ;;  %v3559_v31 = vpop.f32.mrb[39].mxu0 }
 0x3ad   : > { %v3756_v44 = vmax.f32 %v7376_v35, 0.0  ;;  %v3690_v43 = vadd.f32 %v3557_v9, %v3168_v8 }
 0x3ae   : > { %v3172_v32 = vpop.f32.mrb[40].mxu1  ;;  %v3562_v27 = vpop.f32.mrb[40].mxu0 }
 0x3af   : > { %v7384_v56 = vadd.f32 %v7352_v62, %v3690_v43  ;;  %v3173_v24 = vadd.f32 %v3172_v32, %v7281_v61  ;;  %v3174_v10 = vpop.f32.mrb[41].mxu1  ;;  %3789 = vrot.lane.b32.xlu1 %v3756_v44, %s4719_s30  ;;  %v3564_v14 = vpop.f32.mrb[41].mxu0 }
 0x3b1   : > { %v3757_v49 = vmax.f32 %v7384_v56, 0.0  ;;  %v3691_v40 = vadd.f32 %v3562_v27, %v3173_v24 }
 0x3b2   : > { %v3177_v18 = vpop.f32.mrb[42].mxu1  ;;  %v3567_v19 = vpop.f32.mrb[42].mxu0 }
 0x3b3   : > { %v7392_v12 = vadd.f32 %v7352_v62, %v3691_v40  ;;  %v3178_v0 = vadd.f32 %v3177_v18, %v7301_v13  ;;  %v3179_v1 = vpop.f32.mrb[43].mxu1  ;;  %3791 = vrot.lane.b32.xlu0 %v3757_v49, %s4719_s30  ;;  %v3569_v61 = vpop.f32.mrb[43].mxu0 }
 0x3b5   : > { %v3758_v2 = vmax.f32 %v7392_v12, 0.0  ;;  %v3692_v46 = vadd.f32 %v3567_v19, %v3178_v0 }
 0x3b6   : > { %v3182_v30 = vpop.f32.mrb[44].mxu1  ;;  %v3572_v25 = vpop.f32.mrb[44].mxu0 }
 0x3b7   : > { %v7400_v3 = vadd.f32 %v7352_v62, %v3692_v46  ;;  %v3183_v21 = vadd.f32 %v3182_v30, %v7316_v47  ;;  %v3184_v26 = vpop.f32.mrb[45].mxu1  ;;  %3793 = vrot.lane.b32.xlu1 %v3758_v2, %s4719_s30  ;;  %v3574_v13 = vpop.f32.mrb[45].mxu0 }
 0x3b9   : > { %v3759_v60 = vmax.f32 %v7400_v3, 0.0  ;;  %v3693_v50 = vadd.f32 %v3572_v25, %v3183_v21 }
 0x3ba   : > { %v3187_v58 = vpop.f32.mrb[46].mxu1  ;;  %v3577_v29 = vpop.f32.mrb[46].mxu0 }
 0x3bb   : > { %v7408_v63 = vadd.f32 %v7352_v62, %v3693_v50  ;;  %v3188_v9 = vadd.f32 %v3187_v58, %v7322_v23  ;;  %v3189_v8 = vpop.f32.mrb[47].mxu1  ;;  %3795 = vrot.lane.b32.xlu0 %v3759_v60, %s4719_s30  ;;  %v3579_v47 = vpop.f32.mrb[47].mxu0 }
 0x3bd   : > { %v3760_v33 = vmax.f32 %v7408_v63, 0.0  ;;  %v3694_v31 = vadd.f32 %v3577_v29, %v3188_v9 }
 0x3be   : > { %v3192_v43 = vpop.f32.mrb[48].mxu1  ;;  %v3582_v32 = vpop.f32.mrb[48].mxu0 }
 0x3bf   : > { %v7416_v27 = vadd.f32 %v7352_v62, %v3694_v31  ;;  %v3193_v24 = vadd.f32 %v3192_v43, %v7326_v20  ;;  %3797 = vrot.lane.b32.xlu1 %v3760_v33, %s4719_s30  ;;  %v3194_v23 = vpop.f32.mrb[49].mxu1  ;;  %v3584_v10 = vpop.f32.mrb[49].mxu0 }
 0x3c1   : > { %v3761_v14 = vmax.f32 %v7416_v27, 0.0  ;;  %v3695_v40 = vadd.f32 %v3582_v32, %v3193_v24 }
 0x3c2   : > { %v3197_v18 = vpop.f32.mrb[50].mxu1  ;;  %v3587_v19 = vpop.f32.mrb[50].mxu0 }
 0x3c3   : > { %v7424_v0 = vadd.f32 %v7352_v62, %v3695_v40  ;;  %v3198_v1 = vadd.f32 %v3197_v18, %v7330_v38  ;;  %3799 = vrot.lane.b32.xlu0 %v3761_v14, %s4719_s30  ;;  %v3199_v20 = vpop.f32.mrb[51].mxu1  ;;  %v3589_v61 = vpop.f32.mrb[51].mxu0 }
 0x3c5   : > { %v3762_v46 = vmax.f32 %v7424_v0, 0.0  ;;  %v3696_v30 = vadd.f32 %v3587_v19, %v3198_v1 }
 0x3c6   : > { %v3202_v25 = vpop.f32.mrb[52].mxu1  ;;  %v3592_v21 = vpop.f32.mrb[52].mxu0 }
 0x3c7   : > { %v7432_v26 = vadd.f32 %v7352_v62, %v3696_v30  ;;  %v3203_v13 = vadd.f32 %v3202_v25, %v7334_v53  ;;  %v3204_v50 = vpop.f32.mrb[53].mxu1  ;;  %v3594_v58 = vpop.f32.mrb[53].mxu0  ;;  %3801 = vrot.lane.b32.xlu1 %v3762_v46, %s4719_s30 }
 0x3c9   : > { %v3763_v38 = vmax.f32 %v7432_v26, 0.0  ;;  %v3697_v29 = vadd.f32 %v3592_v21, %v3203_v13 }
 0x3ca   : > { %v3207_v9 = vpop.f32.mrb[54].mxu1  ;;  %v3597_v8 = vpop.f32.mrb[54].mxu0 }
 0x3cb   : > { %v7440_v47 = vadd.f32 %v7352_v62, %v3697_v29  ;;  %v3208_v31 = vadd.f32 %v3207_v9, %v7338_v16  ;;  %v3209_v43 = vpop.f32.mrb[55].mxu1  ;;  %v3599_v32 = vpop.f32.mrb[55].mxu0  ;;  %3803 = vrot.lane.b32.xlu0 %v3763_v38, %s4719_s30 }
 0x3cd   : > { %v3764_v53 = vmax.f32 %v7440_v47, 0.0  ;;  %v3698_v24 = vadd.f32 %v3597_v8, %v3208_v31 }
 0x3ce   : > { %v3212_v23 = vpop.f32.mrb[56].mxu1  ;;  %v3602_v10 = vpop.f32.mrb[56].mxu0 }
 0x3cf   : > { %v7448_v40 = vadd.f32 %v7352_v62, %v3698_v24  ;;  %v3213_v18 = vadd.f32 %v3212_v23, %v7342_v37  ;;  %v3214_v19 = vpop.f32.mrb[57].mxu1  ;;  %v3604_v1 = vpop.f32.mrb[57].mxu0  ;;  %3805 = vrot.lane.b32.xlu1 %v3764_v53, %s4719_s30 }
 0x3d1   : > { %v3765_v16 = vmax.f32 %v7448_v40, 0.0  ;;  %v3699_v20 = vadd.f32 %v3602_v10, %v3213_v18 }
 0x3d2   : > { %v3217_v61 = vpop.f32.mrb[58].mxu1  ;;  %v3607_v30 = vpop.f32.mrb[58].mxu0 }
 0x3d3   : > { %v7456_v25 = vadd.f32 %v7352_v62, %v3699_v20  ;;  %v3218_v21 = vadd.f32 %v3217_v61, %v7346_v57  ;;  %v3219_v13 = vpop.f32.mrb[59].mxu1  ;;  %v3609_v50 = vpop.f32.mrb[59].mxu0  ;;  %3807 = vrot.lane.b32.xlu0 %v3765_v16, %s4719_s30 }
 0x3d5   : > { %v3766_v37 = vmax.f32 %v7456_v25, 0.0  ;;  %v3700_v58 = vadd.f32 %v3607_v30, %v3218_v21 }
 0x3d6   : > { %v3222_v29 = vpop.f32.mrb[60].mxu1  ;;  %v3612_v9 = vpop.f32.mrb[60].mxu0 }
 0x3d7   : > { %v7464_v8 = vadd.f32 %v7352_v62, %v3700_v58  ;;  %v3223_v31 = vadd.f32 %v3222_v29, %v7216_v42  ;;  %v3224_v43 = vpop.f32.mrb[61].mxu1  ;;  %v3614_v32 = vpop.f32.mrb[61].mxu0  ;;  %3809 = vrot.lane.b32.xlu1 %v3766_v37, %s4719_s30 }
 0x3d9   : > { %v3767_v57 = vmax.f32 %v7464_v8, 0.0  ;;  %v3701_v24 = vadd.f32 %v3612_v9, %v3223_v31 }
 0x3da   : > { %v3227_v23 = vpop.f32.mrb[62].mxu1  ;;  %v3617_v10 = vpop.f32.mrb[62].mxu0 }
 0x3db   : > { %v7472_v18 = vadd.f32 %v7352_v62, %v3701_v24  ;;  %v3228_v19 = vadd.f32 %v3227_v23, %v7226_v45  ;;  %v3229_v1 = vpop.f32.mrb[63].mxu1  ;;  %v3619_v20 = vpop.f32.mrb[63].mxu0  ;;  %3811 = vrot.lane.b32.xlu0 %v3767_v57, %s4719_s30 }
 0x3dd   : > { %v3768_v42 = vmax.f32 %v7472_v18, 0.0  ;;  %v3702_v61 = vadd.f32 %v3617_v10, %v3228_v19 }
 0x3de   : > { %v3232_v30 = vpop.f32.mrb[64].mxu1  ;;  %v3622_v21 = vpop.f32.mrb[64].mxu0 }
 0x3df   : > { %v7480_v13 = vadd.f32 %v7352_v62, %v3702_v61  ;;  %v3233_v50 = vadd.f32 %v3232_v30, %v7233_v34  ;;  %v3234_v58 = vpop.f32.mrb[65].mxu1  ;;  %v3624_v29 = vpop.f32.mrb[65].mxu0  ;;  %3813 = vrot.lane.b32.xlu1 %v3768_v42, %s4719_s30 }
 0x3e1   : > { %v3769_v45 = vmax.f32 %v7480_v13, 0.0  ;;  %v3703_v9 = vadd.f32 %v3622_v21, %v3233_v50 }
 0x3e2   : > { %v3237_v31 = vpop.f32.mrb[66].mxu1  ;;  %v3627_v43 = vpop.f32.mrb[66].mxu0 }
 0x3e3   : > { %v7488_v32 = vadd.f32 %v7352_v62, %v3703_v9  ;;  %v3238_v24 = vadd.f32 %v3237_v31, %v7241_v4  ;;  %v3239_v23 = vpop.f32.mrb[67].mxu1  ;;  %v3629_v10 = vpop.f32.mrb[67].mxu0  ;;  %3815 = vrot.lane.b32.xlu0 %v3769_v45, %s4719_s30 }
 0x3e5   : > { %v3770_v34 = vmax.f32 %v7488_v32, 0.0  ;;  %v3704_v19 = vadd.f32 %v3627_v43, %v3238_v24 }
 0x3e6   : > { %v3242_v1 = vpop.f32.mrb[68].mxu1  ;;  %v3632_v20 = vpop.f32.mrb[68].mxu0 }
 0x3e7   : > { %v7496_v61 = vadd.f32 %v7352_v62, %v3704_v19  ;;  %v3243_v30 = vadd.f32 %v3242_v1, %v7251_v59  ;;  %v3244_v21 = vpop.f32.mrb[69].mxu1  ;;  %v3634_v50 = vpop.f32.mrb[69].mxu0  ;;  %3817 = vrot.lane.b32.xlu1 %v3770_v34, %s4719_s30 }
 0x3e9   : > { %v3771_v4 = vmax.f32 %v7496_v61, 0.0  ;;  %v3705_v58 = vadd.f32 %v3632_v20, %v3243_v30 }
 0x3ea   : > { %v3247_v29 = vpop.f32.mrb[70].mxu1  ;;  %v3637_v9 = vpop.f32.mrb[70].mxu0 }
 0x3eb   : > { %v7504_v31 = vadd.f32 %v7352_v62, %v3705_v58  ;;  %v3248_v43 = vadd.f32 %v3247_v29, %v7271_v22  ;;  %v3249_v24 = vpop.f32.mrb[71].mxu1  ;;  %v3639_v23 = vpop.f32.mrb[71].mxu0  ;;  %3819 = vrot.lane.b32.xlu0 %v3771_v4, %s4719_s30 }
 0x3ed   : > { %v7791_v59 = vmax.f32 %v7504_v31, 0.0  ;;  %v3706_v10 = vadd.f32 %v3637_v9, %v3248_v43  ;;  %v7954_v32 = vmax.f32 %v7504_v31, 0.0 }
 0x3ee   : > { %v3252_v19 = vpop.f32.mrb[72].mxu1  ;;  %v3642_v1 = vpop.f32.mrb[72].mxu0 }
 0x3ef   : > { %v7512_v20 = vadd.f32 %v7352_v62, %v3706_v10  ;;  %v3253_v30 = vadd.f32 %v3252_v19, %v7291_v55  ;;  %v3254_v21 = vpop.f32.mrb[73].mxu1  ;;  %v3644_v50 = vpop.f32.mrb[73].mxu0  ;;  %3821 = vrot.lane.b32.xlu1 %v7791_v59, %s4719_s30 }
 0x3f1   : > { %v7792_v22 = vmax.f32 %v7512_v20, 0.0  ;;  %v3707_v58 = vadd.f32 %v3642_v1, %v3253_v30  ;;  %v7955_v61 = vmax.f32 %v7512_v20, 0.0 }
 0x3f2   : > { %v3257_v29 = vpop.f32.mrb[74].mxu1  ;;  %v3647_v24 = vpop.f32.mrb[74].mxu0 }
 0x3f3   : > { %v7520_v9 = vadd.f32 %v7352_v62, %v3707_v58  ;;  %v3258_v43 = vadd.f32 %v3257_v29, %v7310_v15  ;;  %v3259_v23 = vpop.f32.mrb[75].mxu1  ;;  %v3649_v10 = vpop.f32.mrb[75].mxu0  ;;  %3823 = vrot.lane.b32.xlu0 %v7792_v22, %s4719_s30 }
 0x3f5   : > { %v7793_v55 = vmax.f32 %v7520_v9, 0.0  ;;  %v3708_v19 = vadd.f32 %v3647_v24, %v3258_v43  ;;  %v7956_v31 = vmax.f32 %v7520_v9, 0.0 }
 0x3f6   : > { %v3262_v21 = vpop.f32.mrb[76].mxu1  ;;  %v3652_v50 = vpop.f32.mrb[76].mxu0 }
 0x3f7   : > { %v7528_v1 = vadd.f32 %v7352_v62, %v3708_v19  ;;  %v3263_v30 = vadd.f32 %v3262_v21, %v7320_v5  ;;  %v3264_v58 = vpop.f32.mrb[77].mxu1  ;;  %v3654_v59 = vpop.f32.mrb[77].mxu0  ;;  %3825 = vrot.lane.b32.xlu1 %v7793_v55, %s4719_s30 }
 0x3f9   : > { %v7794_v15 = vmax.f32 %v7528_v1, 0.0  ;;  %v3709_v29 = vadd.f32 %v3652_v50, %v3263_v30  ;;  %v7957_v20 = vmax.f32 %v7528_v1, 0.0 }
 0x3fa   : > { %v3267_v23 = vpop.f32.mrb[78].mxu1  ;;  %v3657_v10 = vpop.f32.mrb[78].mxu0 }
 0x3fb   : > { %v7536_v24 = vadd.f32 %v7352_v62, %v3709_v29  ;;  %v3268_v43 = vadd.f32 %v3267_v23, %v7324_v28  ;;  %v3269_v19 = vpop.f32.mrb[79].mxu1  ;;  %v3659_v22 = vpop.f32.mrb[79].mxu0  ;;  %3827 = vrot.lane.b32.xlu0 %v7794_v15, %s4719_s30 }
 0x3fd   : > { %v7795_v5 = vmax.f32 %v7536_v24, 0.0  ;;  %v3710_v59 = vadd.f32 %v3657_v10, %v3268_v43  ;;  %v7958_v9 = vmax.f32 %v7536_v24, 0.0 }
 0x3fe   : > { %v3272_v21 = vpop.f32.mrb[80].mxu1  ;;  %v3662_v58 = vpop.f32.mrb[80].mxu0 }
 0x3ff   : > { %v7544_v50 = vadd.f32 %v7352_v62, %v3710_v59  ;;  %v3273_v30 = vadd.f32 %v3272_v21, %v7328_v54  ;;  %v3274_v29 = vpop.f32.mrb[81].mxu1  ;;  %v3664_v55 = vpop.f32.mrb[81].mxu0  ;;  %3829 = vrot.lane.b32.xlu1 %v7795_v5, %s4719_s30 }
 0x401   : > { %v7796_v28 = vmax.f32 %v7544_v50, 0.0  ;;  %v3711_v22 = vadd.f32 %v3662_v58, %v3273_v30  ;;  %v7959_v1 = vmax.f32 %v7544_v50, 0.0 }
 0x402   : > { %v3277_v23 = vpop.f32.mrb[82].mxu1  ;;  %v3667_v19 = vpop.f32.mrb[82].mxu0 }
 0x403   : > { %v7552_v10 = vadd.f32 %v7352_v62, %v3711_v22  ;;  %v3278_v43 = vadd.f32 %v3277_v23, %v7332_v6  ;;  %v3279_v59 = vpop.f32.mrb[83].mxu1  ;;  %v3669_v15 = vpop.f32.mrb[83].mxu0  ;;  %3831 = vrot.lane.b32.xlu0 %v7796_v28, %s4719_s30 }
 0x405   : > { %v7797_v54 = vmax.f32 %v7552_v10, 0.0  ;;  %v3712_v55 = vadd.f32 %v3667_v19, %v3278_v43  ;;  %v7960_v24 = vmax.f32 %v7552_v10, 0.0 }
 0x406   : > { %v3282_v21 = vpop.f32.mrb[84].mxu1  ;;  %v3672_v29 = vpop.f32.mrb[84].mxu0 }
 0x407   : > { %v7560_v58 = vadd.f32 %v7352_v62, %v3712_v55  ;;  %v3283_v30 = vadd.f32 %v3282_v21, %v7336_v11  ;;  %v3284_v22 = vpop.f32.mrb[85].mxu1  ;;  %v3674_v5 = vpop.f32.mrb[85].mxu0  ;;  %3833 = vrot.lane.b32.xlu1 %v7797_v54, %s4719_s30 }
 0x409   : > { %v3779_v6 = vmax.f32 %v7560_v58, 0.0  ;;  %v3713_v15 = vadd.f32 %v3672_v29, %v3283_v30 }
 0x40a   : > { %v3287_v23 = vpop.f32.mrb[86].mxu1  ;;  %v3677_v59 = vpop.f32.mrb[86].mxu0 }
 0x40b   : > { %v7568_v19 = vadd.f32 %v7352_v62, %v3713_v15  ;;  %v3288_v43 = vadd.f32 %v3287_v23, %v7340_v7  ;;  %v3289_v55 = vpop.f32.mrb[87].mxu1  ;;  %v3679_v28 = vpop.f32.mrb[87].mxu0  ;;  %3835 = vrot.lane.b32.xlu0 %v3779_v6, %s4719_s30 }
 0x40d   : > { %v3780_v11 = vmax.f32 %v7568_v19, 0.0  ;;  %v3714_v5 = vadd.f32 %v3677_v59, %v3288_v43 }
 0x40e   : > { %v3292_v21 = vpop.f32.mrb[88].mxu1  ;;  %v3682_v22 = vpop.f32.mrb[88].mxu0 }
 0x40f   : > { %v7576_v29 = vadd.f32 %v7352_v62, %v3714_v5  ;;  %v3293_v30 = vadd.f32 %v3292_v21, %v7344_v52  ;;  %v3294_v15 = vpop.f32.mrb[89].mxu1  ;;  %v3684_v54 = vpop.f32.mrb[89].mxu0  ;;  %3837 = vrot.lane.b32.xlu1 %v3780_v11, %s4719_s30 }
 0x411   : > { %v3781_v7 = vmax.f32 %v7576_v29, 0.0  ;;  %v3715_v28 = vadd.f32 %v3682_v22, %v3293_v30 }
 0x413   : > { %v7584_v23 = vadd.f32 %v7352_v62, %v3715_v28  ;;  %3839 = vrot.lane.b32.xlu0 %v3781_v7, %s4719_s30 }
 0x415   : > { %v3782_v59 = vmax.f32 %v7584_v23, 0.0  ;;  %v3784_v52 = vpop.permute.xlu0 %3783 }
 0x416   : > { %v3843_v54 = vadd.f32 %v3784_v52, %v3753_v17 }
 0x417   : > { %3841 = vrot.lane.b32.xlu1 %v3782_v59, %s4719_s30 }
 0x418   : > { %4451 = vtanh.f32 %v3843_v54 }
 0x419   : > { %v3786_v43 = vpop.permute.xlu1 %3785 }
 0x41a   : > { %v3844_v62 = vadd.f32 %v3786_v43, %v3754_v36 }
 0x41c   : > { %4453 = vtanh.f32 %v3844_v62 }
 0x41d   : > { %v3788_v55 = vpop.permute.xlu0 %3787 }
 0x41e   : > { %v3845_v5 = vadd.f32 %v3788_v55, %v3755_v39 }
 0x420   : > { %4455 = vtanh.f32 %v3845_v5 }
 0x421   : > { %v3790_v21 = vpop.permute.xlu1 %3789 }
 0x422   : > { %v4452_v22 = vpop.eup %4451  ;;  %v3846_v41 = vadd.f32 %v3790_v21, %v3756_v44 }
 0x423   : > { %v3903_v17 = vadd.f32 1.0, %v4452_v22 }
 0x424   : > { %4457 = vtanh.f32 %v3846_v41 }
 0x425   : > { %v3933_v30 = vmul.f32 0.5, %v3903_v17  ;;  %v3792_v15 = vpop.permute.xlu0 %3791 }
 0x426   : > { %v4454_v28 = vpop.eup %4453  ;;  %v3847_v48 = vadd.f32 %v3792_v15, %v3757_v49 }
 0x427   : > { %3963 = vst [vmem:[%s7604_s0] sm:$0xff] %v3933_v30  ;;  %v3904_v36 = vadd.f32 1.0, %v4454_v28 }
 0x428   : > { %4459 = vtanh.f32 %v3847_v48 }
 0x429   : > { %v3934_v51 = vmul.f32 0.5, %v3904_v36  ;;  %v3794_v39 = vpop.permute.xlu1 %3793 }
 0x42a   : > { %v4456_v35 = vpop.eup %4455  ;;  %v3848_v44 = vadd.f32 %v3794_v39, %v3758_v2 }
 0x42b   : > { %3964 = vst [vmem:[%s7604_s0 + $0x8] sm:$0xff] %v3934_v51  ;;  %v3905_v52 = vadd.f32 1.0, %v4456_v35 }
 0x42c   : > { %4461 = vtanh.f32 %v3848_v44 }
 0x42d   : > { %v3935_v56 = vmul.f32 0.5, %v3905_v52  ;;  %v3796_v49 = vpop.permute.xlu0 %3795 }
 0x42e   : > { %v4458_v54 = vpop.eup %4457  ;;  %v3849_v43 = vadd.f32 %v3796_v49, %v3759_v60 }
 0x42f   : > { %3965 = vst [vmem:[%s7604_s0 + $0x10] sm:$0xff] %v3935_v56  ;;  %v3906_v62 = vadd.f32 1.0, %v4458_v54 }
 0x430   : > { %4463 = vtanh.f32 %v3849_v43 }
 0x431   : > { %v3936_v55 = vmul.f32 0.5, %v3906_v62  ;;  %v3798_v5 = vpop.permute.xlu1 %3797 }
 0x432   : > { %v4460_v21 = vpop.eup %4459  ;;  %v3850_v12 = vadd.f32 %v3798_v5, %v3760_v33 }
 0x433   : > { %3966 = vst [vmem:[%s7604_s0 + $0x18] sm:$0xff] %v3936_v55  ;;  %v3907_v2 = vadd.f32 1.0, %v4460_v21 }
 0x434   : > { %4465 = vtanh.f32 %v3850_v12 }
 0x435   : > { %v3937_v22 = vmul.f32 0.5, %v3907_v2  ;;  %v3800_v41 = vpop.permute.xlu0 %3799 }
 0x436   : > { %v4462_v17 = vpop.eup %4461  ;;  %v3851_v3 = vadd.f32 %v3800_v41, %v3761_v14 }
 0x437   : > { %3967 = vst [vmem:[%s7604_s0 + $0x20] sm:$0xff] %v3937_v22  ;;  %v3908_v60 = vadd.f32 1.0, %v4462_v17 }
 0x438   : > { %4467 = vtanh.f32 %v3851_v3 }
 0x439   : > { %v3938_v30 = vmul.f32 0.5, %v3908_v60  ;;  %v3802_v15 = vpop.permute.xlu1 %3801 }
 0x43a   : > { %v4464_v28 = vpop.eup %4463  ;;  %v3852_v63 = vadd.f32 %v3802_v15, %v3762_v46 }
 0x43b   : > { %3968 = vst [vmem:[%s7604_s0 + $0x28] sm:$0xff] %v3938_v30  ;;  %v3909_v33 = vadd.f32 1.0, %v4464_v28 }
 0x43c   : > { %4469 = vtanh.f32 %v3852_v63 }
 0x43d   : > { %v3939_v48 = vmul.f32 0.5, %v3909_v33  ;;  %v3804_v36 = vpop.permute.xlu0 %3803 }
 0x43e   : > { %v4466_v51 = vpop.eup %4465  ;;  %v3853_v27 = vadd.f32 %v3804_v36, %v3763_v38 }
 0x43f   : > { %3969 = vst [vmem:[%s7604_s0 + $0x30] sm:$0xff] %v3939_v48  ;;  %v3910_v14 = vadd.f32 1.0, %v4466_v51 }
 0x440   : > { %4471 = vtanh.f32 %v3853_v27 }
 0x441   : > { %v3940_v39 = vmul.f32 0.5, %v3910_v14  ;;  %v3806_v35 = vpop.permute.xlu1 %3805 }
 0x442   : > { %v4468_v44 = vpop.eup %4467  ;;  %v3854_v0 = vadd.f32 %v3806_v35, %v3764_v53 }
 0x443   : > { %3970 = vst [vmem:[%s7604_s0 + $0x38] sm:$0xff] %v3940_v39  ;;  %v3911_v46 = vadd.f32 1.0, %v4468_v44 }
 0x444   : > { %4473 = vtanh.f32 %v3854_v0 }
 0x445   : > { %v3941_v52 = vmul.f32 0.5, %v3911_v46  ;;  %v3808_v56 = vpop.permute.xlu0 %3807 }
 0x446   : > { %v4470_v49 = vpop.eup %4469  ;;  %v3855_v26 = vadd.f32 %v3808_v56, %v3765_v16 }
 0x447   : > { %3971 = vst [vmem:[%s7604_s0 + $0x40] sm:$0xff] %v3941_v52  ;;  %v3912_v38 = vadd.f32 1.0, %v4470_v49 }
 0x448   : > { %4475 = vtanh.f32 %v3855_v26 }
 0x449   : > { %v3942_v54 = vmul.f32 0.5, %v3912_v38  ;;  %v3810_v43 = vpop.permute.xlu1 %3809 }
 0x44a   : > { %v4472_v62 = vpop.eup %4471  ;;  %v3856_v47 = vadd.f32 %v3810_v43, %v3766_v37 }
 0x44b   : > { %3972 = vst [vmem:[%s7604_s0 + $0x48] sm:$0xff] %v3942_v54  ;;  %v3913_v53 = vadd.f32 1.0, %v4472_v62 }
 0x44c   : > { %4477 = vtanh.f32 %v3856_v47 }
 0x44d   : > { %v3943_v55 = vmul.f32 0.5, %v3913_v53  ;;  %v3812_v5 = vpop.permute.xlu0 %3811 }
 0x44e   : > { %v4474_v21 = vpop.eup %4473  ;;  %v3857_v40 = vadd.f32 %v3812_v5, %v3767_v57 }
 0x44f   : > { %3973 = vst [vmem:[%s7604_s0 + $0x50] sm:$0xff] %v3943_v55  ;;  %v3914_v16 = vadd.f32 1.0, %v4474_v21 }
 0x450   : > { %4479 = vtanh.f32 %v3857_v40 }
 0x451   : > { %v3944_v12 = vmul.f32 0.5, %v3914_v16  ;;  %v3814_v2 = vpop.permute.xlu1 %3813 }
 0x452   : > { %v4476_v22 = vpop.eup %4475  ;;  %v3858_v25 = vadd.f32 %v3814_v2, %v3768_v42 }
 0x453   : > { %3974 = vst [vmem:[%s7604_s0 + $0x58] sm:$0xff] %v3944_v12  ;;  %v3915_v37 = vadd.f32 1.0, %v4476_v22 }
 0x454   : > { %4481 = vtanh.f32 %v3858_v25 }
 0x455   : > { %v3945_v41 = vmul.f32 0.5, %v3915_v37  ;;  %v3816_v17 = vpop.permute.xlu0 %3815 }
 0x456   : > { %v4478_v3 = vpop.eup %4477  ;;  %v3859_v8 = vadd.f32 %v3816_v17, %v3769_v45 }
 0x457   : > { %3975 = vst [vmem:[%s7604_s0 + $0x60] sm:$0xff] %v3945_v41  ;;  %v3916_v57 = vadd.f32 1.0, %v4478_v3 }
 0x458   : > { %4483 = vtanh.f32 %v3859_v8 }
 0x459   : > { %v3946_v60 = vmul.f32 0.5, %v3916_v57  ;;  %v3818_v30 = vpop.permute.xlu1 %3817 }
 0x45a   : > { %v4480_v15 = vpop.eup %4479  ;;  %v3860_v18 = vadd.f32 %v3818_v30, %v3770_v34 }
 0x45b   : > { %3976 = vst [vmem:[%s7604_s0 + $0x68] sm:$0xff] %v3946_v60  ;;  %v3917_v42 = vadd.f32 1.0, %v4480_v15 }
 0x45c   : > { %4485 = vtanh.f32 %v3860_v18 }
 0x45d   : > { %v3947_v28 = vmul.f32 0.5, %v3917_v42  ;;  %v3820_v63 = vpop.permute.xlu0 %3819 }
 0x45e   : > { %v4482_v33 = vpop.eup %4481  ;;  %v3861_v13 = vadd.f32 %v3820_v63, %v3771_v4 }
 0x45f   : > { %3977 = vst [vmem:[%s7604_s0 + $0x70] sm:$0xff] %v3947_v28  ;;  %v3918_v45 = vadd.f32 1.0, %v4482_v33 }
 0x460   : > { %4487 = vtanh.f32 %v3861_v13 }
 0x461   : > { %v3948_v48 = vmul.f32 0.5, %v3918_v45  ;;  %v3822_v36 = vpop.permute.xlu1 %3821 }
 0x462   : > { %v4484_v51 = vpop.eup %4483  ;;  %v3862_v34 = vadd.f32 %v3822_v36, %v7954_v32 }
 0x463   : > { %3978 = vst [vmem:[%s7604_s0 + $0x78] sm:$0xff] %v3948_v48  ;;  %v3919_v27 = vadd.f32 1.0, %v4484_v51 }
 0x464   : > { %4489 = vtanh.f32 %v3862_v34 }
 0x465   : > { %v3949_v14 = vmul.f32 0.5, %v3919_v27  ;;  %v3824_v39 = vpop.permute.xlu0 %3823 }
 0x466   : > { %v4486_v35 = vpop.eup %4485  ;;  %v3863_v4 = vadd.f32 %v3824_v39, %v7955_v61 }
 0x467   : > { %3979 = vst [vmem:[%s7604_s0 + $0x80] sm:$0xff] %v3949_v14  ;;  %v3920_v44 = vadd.f32 1.0, %v4486_v35 }
 0x468   : > { %4491 = vtanh.f32 %v3863_v4 }
 0x469   : > { %v3950_v0 = vmul.f32 0.5, %v3920_v44  ;;  %v3826_v46 = vpop.permute.xlu1 %3825 }
 0x46a   : > { %v4488_v52 = vpop.eup %4487  ;;  %v3864_v56 = vadd.f32 %v3826_v46, %v7956_v31 }
 0x46b   : > { %3980 = vst [vmem:[%s7604_s0 + $0x88] sm:$0xff] %v3950_v0  ;;  %v3921_v49 = vadd.f32 1.0, %v4488_v52 }
 0x46c   : > { %4493 = vtanh.f32 %v3864_v56 }
 0x46d   : > { %v3951_v26 = vmul.f32 0.5, %v3921_v49  ;;  %v3828_v38 = vpop.permute.xlu0 %3827 }
 0x46e   : > { %v4490_v54 = vpop.eup %4489  ;;  %v3865_v43 = vadd.f32 %v3828_v38, %v7957_v20 }
 0x46f   : > { %3981 = vst [vmem:[%s7604_s0 + $0x90] sm:$0xff] %v3951_v26  ;;  %v3922_v62 = vadd.f32 1.0, %v4490_v54 }
 0x470   : > { %4495 = vtanh.f32 %v3865_v43 }
 0x471   : > { %v3952_v47 = vmul.f32 0.5, %v3922_v62  ;;  %v3830_v53 = vpop.permute.xlu1 %3829 }
 0x472   : > { %v4492_v55 = vpop.eup %4491  ;;  %v3866_v5 = vadd.f32 %v3830_v53, %v7958_v9 }
 0x473   : > { %3982 = vst [vmem:[%s7604_s0 + $0x98] sm:$0xff] %v3952_v47  ;;  %v3923_v21 = vadd.f32 1.0, %v4492_v55 }
 0x474   : > { %4497 = vtanh.f32 %v3866_v5 }
 0x475   : > { %v3953_v40 = vmul.f32 0.5, %v3923_v21  ;;  %v3832_v16 = vpop.permute.xlu0 %3831 }
 0x476   : > { %v4494_v12 = vpop.eup %4493  ;;  %v3867_v2 = vadd.f32 %v3832_v16, %v7959_v1 }
 0x477   : > { %3983 = vst [vmem:[%s7604_s0 + $0xa0] sm:$0xff] %v3953_v40  ;;  %v3924_v22 = vadd.f32 1.0, %v4494_v12 }
 0x478   : > { %4499 = vtanh.f32 %v3867_v2 }
 0x479   : > { %v3954_v25 = vmul.f32 0.5, %v3924_v22  ;;  %v3834_v37 = vpop.permute.xlu1 %3833 }
 0x47a   : > { %v4496_v41 = vpop.eup %4495  ;;  %v3868_v17 = vadd.f32 %v3834_v37, %v7960_v24 }
 0x47b   : > { %3984 = vst [vmem:[%s7604_s0 + $0xa8] sm:$0xff] %v3954_v25  ;;  %v3925_v3 = vadd.f32 1.0, %v4496_v41 }
 0x47c   : > { %4501 = vtanh.f32 %v3868_v17 }
 0x47d   : > { %v3955_v8 = vmul.f32 0.5, %v3925_v3  ;;  %v3836_v57 = vpop.permute.xlu0 %3835 }
 0x47e   : > { %v4498_v60 = vpop.eup %4497  ;;  %v3869_v50 = vadd.f32 %v3836_v57, %v3779_v6 }
 0x47f   : > { %3985 = vst [vmem:[%s7604_s0 + $0xb0] sm:$0xff] %v3955_v8  ;;  %v3926_v30 = vadd.f32 1.0, %v4498_v60 }
 0x480   : > { %4503 = vtanh.f32 %v3869_v50 }
 0x481   : > { %v3956_v15 = vmul.f32 0.5, %v3926_v30  ;;  %v3838_v18 = vpop.permute.xlu1 %3837 }
 0x482   : > { %v4500_v42 = vpop.eup %4499  ;;  %v3870_v10 = vadd.f32 %v3838_v18, %v3780_v11 }
 0x483   : > { %3986 = vst [vmem:[%s7604_s0 + $0xb8] sm:$0xff] %v3956_v15  ;;  %v3927_v28 = vadd.f32 1.0, %v4500_v42 }
 0x484   : > { %4505 = vtanh.f32 %v3870_v10 }
 0x485   : > { %v3957_v63 = vmul.f32 0.5, %v3927_v28  ;;  %v3840_v33 = vpop.permute.xlu0 %3839 }
 0x486   : > { %v4502_v13 = vpop.eup %4501  ;;  %v3871_v58 = vadd.f32 %v3840_v33, %v3781_v7 }
 0x487   : > { %3987 = vst [vmem:[%s7604_s0 + $0xc0] sm:$0xff] %v3957_v63  ;;  %v3928_v6 = vadd.f32 1.0, %v4502_v13 }
 0x488   : > { %4507 = vtanh.f32 %v3871_v58 }
 0x489   : > { %v3958_v45 = vmul.f32 0.5, %v3928_v6  ;;  %v3842_v48 = vpop.permute.xlu1 %3841 }
 0x48a   : > { %v4504_v19 = vpop.eup %4503  ;;  %v3872_v11 = vadd.f32 %v3842_v48, %v3782_v59 }
 0x48b   : > { %3988 = vst [vmem:[%s7604_s0 + $0xc8] sm:$0xff] %v3958_v45  ;;  %v3929_v36 = vadd.f32 1.0, %v4504_v19 }
 0x48c   : > { %4509 = vtanh.f32 %v3872_v11 }
 0x48d   : > { %v3959_v51 = vmul.f32 0.5, %v3929_v36 }
 0x48e   : > { %v4506_v32 = vpop.eup %4505 }
 0x48f   : > { %3989 = vst [vmem:[%s7604_s0 + $0xd0] sm:$0xff] %v3959_v51  ;;  %v3930_v29 = vadd.f32 1.0, %v4506_v32 }
 0x491   : > { %v3960_v7 = vmul.f32 0.5, %v3930_v29 }
 0x492   : > { %v4508_v34 = vpop.eup %4507 }
 0x493   : > { %3990 = vst [vmem:[%s7604_s0 + $0xd8] sm:$0xff] %v3960_v7  ;;  %v3931_v27 = vadd.f32 1.0, %v4508_v34 }
 0x495   : > { %v3961_v14 = vmul.f32 0.5, %v3931_v27 }
 0x496   : > { %v4510_v23 = vpop.eup %4509 }
 0x497   : > { %3991 = vst [vmem:[%s7604_s0 + $0xe0] sm:$0xff] %v3961_v14  ;;  %v3932_v59 = vadd.f32 1.0, %v4510_v23 }
 0x499   : > { %v3962_v39 = vmul.f32 0.5, %v3932_v59 }
 0x49b   : > { %3992 = vst [vmem:[%s7604_s0 + $0xe8] sm:$0xff] %v3962_v39 }
 0x49c   : > { %4642 = shalt.err (!%p4639_p7)
}
 0x49d   : > { %s4643_s7 = scalar_lea.hbm %s7690_s29, 3840  ;;  %s4647_s13 = scalar_lea.hbm %s7743_s6, 7680 }
 0x49e   : > { %p4644_p9 = scmp.ne.s32.totalorder %s7690_s29, %s4643_s7  ;;  %p4648_p11 = scmp.lt.u32.totalorder %s7690_s29, %s7743_s6 }
 0x49f   : > { %p4649_p2 = scmp.lt.u32.totalorder %s4647_s13, %s4643_s7  ;;  %p4651_p1 = scmp.lt.u32.totalorder %s4643_s7, %s7690_s29 }
 0x4a0   : > { %p4645_p0 = pnand %p4644_p9, %p7961_p13 }
 0x4a1   : > { %p4650_p12 = por %p4649_p2, %p4648_p11 }
 0x4a2   : > { %p4646_p8 = pneg %p4645_p0 }
 0x4a3   : > { %p4652_p6 = por %p4651_p1, %p4650_p12 }
 0x4a5   : > { %p4653_p10 = pnand %p4652_p6, %p4646_p8 }
 0x4a7   : > { %4656 = shalt.err (!%p4653_p10)
}
 0x4a8   : > { %s4721_s17 = smov 128   ;;  %s4722_s0 = smov 8  }
 0x4a9   : > { %4382 = dma.vmem_to_hbm [thread:$0]  (%p7961_p13), %s7692_s12, 3840, %s7690_s29, %s3994_s18, %s4721_s17, %s4721_s17, %s4722_s0  }
 0x4aa PF: > { %s4022_s10 = sand.u32 1, %s4695_s21   ;;  %p7962_p4 = scmp.ne.s32.totalorder %s7802_s28, 0 }
 0x4ab   : > { %p7963_p5 = scmp.ge.s32.totalorder %s4707_s24, 2  ;;  %s4023_s2 = scalar_lea.sflag [#allocation6], %s4022_s10 }
 0x4ad   : > { %p4399_p3 = pnand %p7963_p5, %p7962_p4 }
 0x4af   : > { %4690 = dma.done.wait (!%p4399_p3), %s4023_s2, 3840  }
 0x4b0   : > { %4692 = vsyncadd (!%p4399_p3), %s4023_s2, 4294963456  ;;  %p23_p7 = scmp.ge.s32.totalorder %s4874_s8, 4   ;;  %s7964_s21 = smov %s4699_s22 }
 0x4b1   : > { %s7965_s22 = smov %s4703_s23  ;;  %s7966_s23 = smov %s4890_s11 }
 0x4b2   : > { %s7967_s24 = smov %s4874_s8  ;;  %25 = sbr.rel (!%p23_p7) target bundleno = 12 (0xc), region = 118 }
 0x4b9   :  { %4028 = vsyncpa [#allocation5], 1 }
 0x4ba   :  { %4030 = vsyncpa [#allocation5 + $0x1], 1 }
 0x4bb   :  { %4031 = vsyncpa [#allocation8], 1 }
 0x4bc   :  { %4033 = vsyncpa [#allocation8 + $0x1], 1 }
 0x4bd   :  { %4034 = vsyncpa [#allocation11], 1 }
 0x4be   :  { %4035 = vsyncpa [#allocation6], 1 }
 0x4bf   :  { %4037 = vsyncpa [#allocation6 + $0x1], 1 }

</bundles_post_ra>
